<compile_context>
chip_gen: v7x
topology: tpu7x:2x2x1
jax: 0.10.0
libtpu: 0.0.40
codegen_flags: <defaults>
</compile_context>

<pallas_src>
import jax
import jax.numpy as jnp
from jax.experimental import pallas as pl
from jax.experimental.pallas import tpu as pltpu


def _round_up(x, m):
    return ((x + m - 1) // m) * m


# --------------------------- fused Pallas kernel ----------------------------

def uninformed_students_forward(image_nchw, teacher_w, teacher_b,
                                students_w, students_b, patch_size):
    """Returns (regression_error, predictive_uncertainty) as f32 scalars."""
    B, C, H, W = image_nchw.shape
    p = patch_size
    OH, OW = H - p + 1, W - p + 1
    D = teacher_w.shape[0]
    S = students_w.shape[0]
    assert S >= 2, "unbiased variance (ddof=1) requires at least 2 students"

    HW = H * W                     # full-grid output positions per image
    Cp = C + 1                     # +1 ones-channel carrying the biases
    NO = (S + 1) * D               # teacher + students feature columns
    NP = _round_up(NO, 128)        # lane-dense partial-sum width
    PP = p * p
    MAX_SHIFT = (p - 1) * W + (p - 1)
    ROWS = _round_up(HW + MAX_SHIFT, 8)   # flat rows + halo for shifted reads

    # ---- host-side packing: raw NHWC rows only (no im2col) ----
    x_nhwc = jnp.transpose(image_nchw.astype(jnp.float32), (0, 2, 3, 1))
    ones = jnp.ones((B, H, W, 1), jnp.float32)
    x_flat = jnp.concatenate([x_nhwc, ones], axis=-1).reshape(B, HW, Cp)
    x_flat = jnp.pad(x_flat, ((0, 0), (0, ROWS - HW), (0, 0)))
    x_flat = x_flat.astype(jnp.bfloat16)                          # (B, ROWS, Cp)

    # Per-shift weight slices (PP, Cp, NO); biases folded into the ones-channel
    # row of shift (0, 0) only.
    w_cat = jnp.concatenate([teacher_w[None], students_w], axis=0)  # (S+1,D,C,p,p)
    w_khw = jnp.transpose(w_cat, (3, 4, 2, 0, 1)).reshape(PP, C, NO)
    b_all = jnp.concatenate([teacher_b[None], students_b], axis=0).reshape(1, NO)
    ones_row = jnp.zeros((PP, 1, NO), jnp.float32).at[0].set(b_all)
    w_shift = jnp.concatenate([w_khw.astype(jnp.float32), ones_row], axis=1)
    w_shift = w_shift.astype(jnp.bfloat16)                        # (PP, Cp, NO)

    # Validity mask over the full (h, w) grid (VALID-conv region only).
    hh = jnp.arange(HW) // W
    ww = jnp.arange(HW) % W
    mask = ((hh < OH) & (ww < OW)).astype(jnp.float32).reshape(HW, 1)

    # Combining matrix: out @ P = [students_mean - teacher | dev_0 | ... | dev_{S-1}]
    eyeD = jnp.eye(D, dtype=jnp.float32)
    zeroD = jnp.zeros((D, D), jnp.float32)
    diff_cols = jnp.concatenate([-eyeD] + [eyeD / S] * S, axis=0)          # (NO, D)
    dev_cols = [
        jnp.concatenate(
            [zeroD] + [eyeD * ((S - 1.0) / S if r == s else -1.0 / S)
                       for r in range(S)], axis=0)
        for s in range(S)
    ]
    p_mat = jnp.concatenate([diff_cols] + dev_cols, axis=1)                # (NO, NO)
    p_mat = jnp.pad(p_mat, ((0, 0), (0, NP - NO)))                         # (NO, NP)

    def kernel(x_ref, w_ref, m_ref, p_ref, o_ref):
        # x_ref: (1, ROWS, Cp) bf16   w_ref: (PP, Cp, NO) bf16
        # m_ref: (HW, 1) f32          p_ref: (NO, NP) f32
        # o_ref: (1, 1, NP) f32       (per-batch partial column sums)
        acc = None
        for kh in range(p):
            for kw in range(p):
                shift = kh * W + kw
                xs = x_ref[0, shift:shift + HW, :]                 # (HW, Cp)
                part = jnp.dot(xs, w_ref[kh * p + kw],
                               preferred_element_type=jnp.float32)  # (HW, NO)
                acc = part if acc is None else acc + part
        acc = acc * m_ref[...]            # zero wrapped / partial-window rows
        proj = jnp.dot(acc, p_ref[...], preferred_element_type=jnp.float32)
        o_ref[0] = jnp.sum(proj * proj, axis=0, keepdims=True)    # (1, NP)

    partials = pl.pallas_call(
        kernel,
        grid=(B,),
        in_specs=[
            pl.BlockSpec((1, ROWS, Cp), lambda b: (b, 0, 0)),   # per-batch image rows
            pl.BlockSpec((PP, Cp, NO), lambda b: (0, 0, 0)),    # weights, VMEM resident
            pl.BlockSpec((HW, 1), lambda b: (0, 0)),            # validity mask, resident
            pl.BlockSpec((NO, NP), lambda b: (0, 0)),           # combining matrix, resident
        ],
        out_specs=pl.BlockSpec((1, 1, NP), lambda b: (b, 0, 0)),
        out_shape=jax.ShapeDtypeStruct((B, 1, NP), jnp.float32),
        compiler_params=pltpu.CompilerParams(
            # Disjoint per-batch output blocks -> batch axis can be split
            # across v7x's two TensorCores.
            dimension_semantics=("parallel",),
            vmem_limit_bytes=32 * 1024 * 1024,
        ),
    )(x_flat, w_shift, mask, p_mat)

    # Final tiny cross-lane reduce + normalization outside the kernel.
    col_sums = jnp.sum(partials, axis=(0, 1))                    # (NP,)
    mv = B * OH * OW
    reg = jnp.sum(col_sums[:D]) / (mv * D)
    unc = jnp.sum(col_sums[D:NO]) / ((S - 1) * mv * D)
    return reg, unc


# -------------------------- pure-JAX reference -----------------------------

def _reference_forward(image_nchw, teacher_w, teacher_b, students_w, students_b):
    # Mirror the kernel's bf16 streaming of inputs/weights, compute in f32.
    cast = lambda a: a.astype(jnp.bfloat16).astype(jnp.float32)
    image_nchw, teacher_w, teacher_b = cast(image_nchw), cast(teacher_w), cast(teacher_b)
    students_w, students_b = cast(students_w), cast(students_b)

    def conv(x, w, b):
        y = jax.lax.conv_general_dilated(
            x, w, (1, 1), "VALID",
            dimension_numbers=("NCHW", "OIHW", "NCHW"),
            precision=jax.lax.Precision.HIGHEST)
        return y + b[None, :, None, None]

    t = conv(image_nchw, teacher_w, teacher_b)                       # (B,D,OH,OW)
    s = jnp.stack([conv(image_nchw, students_w[i], students_b[i])
                   for i in range(students_w.shape[0])], axis=0)     # (S,B,D,OH,OW)
    reg = jnp.mean((s.mean(axis=0) - t) ** 2)
    unc = jnp.mean(jnp.var(s, axis=0, ddof=1))
    return reg, unc


# ---------------------------------- main -----------------------------------

if __name__ == "__main__":
    B, C, H, W = 2, 3, 16, 16        # CIFAR-like small input
    patch_size = 5
    D = 32                           # dense descriptor dimension
    num_students = 3

    key = jax.random.PRNGKey(0)
    k_img, k_tw, k_tb, k_sw, k_sb = jax.random.split(key, 5)

    image = jax.random.normal(k_img, (B, C, H, W), dtype=jnp.float32)
    teacher_w = 0.1 * jax.random.normal(k_tw, (D, C, patch_size, patch_size),
                                        dtype=jnp.float32)
    teacher_b = 0.1 * jax.random.normal(k_tb, (D,), dtype=jnp.float32)
    students_w = 0.1 * jax.random.normal(
        k_sw, (num_students, D, C, patch_size, patch_size), dtype=jnp.float32)
    students_b = 0.1 * jax.random.normal(k_sb, (num_students, D),
                                         dtype=jnp.float32)

    reg, unc = uninformed_students_forward(
        image, teacher_w, teacher_b, students_w, students_b, patch_size)
    reg, unc = jax.block_until_ready((reg, unc))

    reg_ref, unc_ref = _reference_forward(
        image, teacher_w, teacher_b, students_w, students_b)
    # Tolerance accounts for bf16 streaming of X/W and MXU rounding in the
    # f32 combining matmul (values are O(1)).
    assert jnp.allclose(reg, reg_ref, rtol=2e-2, atol=1e-4), (reg, reg_ref)
    assert jnp.allclose(unc, unc_ref, rtol=2e-2, atol=1e-4), (unc, unc_ref)

    print("KERNEL_OK")
</pallas_src>

<mosaic_0001>
module attributes {stable_mosaic.version = 11 : i64} {
  func.func @kernel(%arg0: i32, %arg1: memref<1x328x4xbf16, #tpu.memory_space<vmem>>, %arg2: memref<25x4x128xbf16, #tpu.memory_space<vmem>>, %arg3: memref<256x1xf32, #tpu.memory_space<vmem>>, %arg4: memref<128x128xf32, #tpu.memory_space<vmem>>, %arg5: memref<1x1x128xf32, #tpu.memory_space<vmem>>) attributes {dimension_semantics = [#tpu.dimension_semantics<parallel>], iteration_bounds = array<i64: 2>, scalar_prefetch = 0 : i64, scratch_operands = 0 : i64, tpu.core_type = #tpu.core_type<tc>, window_params = [{transform_indices = @transform_0, window_bounds = array<i64: 1, 328, 4>}, {pipeline_mode = #tpu.pipeline_mode<synchronous>, transform_indices = @transform_1, window_bounds = array<i64: 25, 4, 128>}, {pipeline_mode = #tpu.pipeline_mode<synchronous>, transform_indices = @transform_2, window_bounds = array<i64: 256, 1>}, {pipeline_mode = #tpu.pipeline_mode<synchronous>, transform_indices = @transform_3, window_bounds = array<i64: 128, 128>}, {transform_indices = @transform_4, window_bounds = array<i64: 1, 1, 128>}]} {
    %c0 = arith.constant 0 : index
    %c0_0 = arith.constant 0 : index
    %c0_1 = arith.constant 0 : index
    %0 = vector.load %arg1[%c0, %c0_0, %c0_1] : memref<1x328x4xbf16, #tpu.memory_space<vmem>>, vector<1x256x4xbf16>
    %1 = vector.shape_cast %0 : vector<1x256x4xbf16> to vector<256x4xbf16>
    %c0_2 = arith.constant 0 : index
    %c0_3 = arith.constant 0 : index
    %c0_4 = arith.constant 0 : index
    %2 = vector.load %arg2[%c0_2, %c0_3, %c0_4] : memref<25x4x128xbf16, #tpu.memory_space<vmem>>, vector<1x4x128xbf16>
    %3 = vector.shape_cast %2 : vector<1x4x128xbf16> to vector<4x128xbf16>
    %cst = arith.constant dense<0.000000e+00> : vector<256x128xf32>
    %4 = tpu.matmul %1, %3, %cst {dimension_numbers = #tpu.dot_dimension_numbers<[1], [0], [0], [1], [0, 0, 1, 1], [], []>} : vector<256x4xbf16>, vector<4x128xbf16>, vector<256x128xf32> -> vector<256x128xf32>
    %c0_5 = arith.constant 0 : index
    %c1 = arith.constant 1 : index
    %c0_6 = arith.constant 0 : index
    %5 = vector.load %arg1[%c0_5, %c1, %c0_6] : memref<1x328x4xbf16, #tpu.memory_space<vmem>>, vector<1x256x4xbf16>
    %6 = vector.shape_cast %5 : vector<1x256x4xbf16> to vector<256x4xbf16>
    %c1_7 = arith.constant 1 : index
    %c0_8 = arith.constant 0 : index
    %c0_9 = arith.constant 0 : index
    %7 = vector.load %arg2[%c1_7, %c0_8, %c0_9] : memref<25x4x128xbf16, #tpu.memory_space<vmem>>, vector<1x4x128xbf16>
    %8 = vector.shape_cast %7 : vector<1x4x128xbf16> to vector<4x128xbf16>
    %cst_10 = arith.constant dense<0.000000e+00> : vector<256x128xf32>
    %9 = tpu.matmul %6, %8, %cst_10 {dimension_numbers = #tpu.dot_dimension_numbers<[1], [0], [0], [1], [0, 0, 1, 1], [], []>} : vector<256x4xbf16>, vector<4x128xbf16>, vector<256x128xf32> -> vector<256x128xf32>
    %10 = arith.addf %4, %9 : vector<256x128xf32>
    %c0_11 = arith.constant 0 : index
    %c2 = arith.constant 2 : index
    %c0_12 = arith.constant 0 : index
    %11 = vector.load %arg1[%c0_11, %c2, %c0_12] : memref<1x328x4xbf16, #tpu.memory_space<vmem>>, vector<1x256x4xbf16>
    %12 = vector.shape_cast %11 : vector<1x256x4xbf16> to vector<256x4xbf16>
    %c2_13 = arith.constant 2 : index
    %c0_14 = arith.constant 0 : index
    %c0_15 = arith.constant 0 : index
    %13 = vector.load %arg2[%c2_13, %c0_14, %c0_15] : memref<25x4x128xbf16, #tpu.memory_space<vmem>>, vector<1x4x128xbf16>
    %14 = vector.shape_cast %13 : vector<1x4x128xbf16> to vector<4x128xbf16>
    %cst_16 = arith.constant dense<0.000000e+00> : vector<256x128xf32>
    %15 = tpu.matmul %12, %14, %cst_16 {dimension_numbers = #tpu.dot_dimension_numbers<[1], [0], [0], [1], [0, 0, 1, 1], [], []>} : vector<256x4xbf16>, vector<4x128xbf16>, vector<256x128xf32> -> vector<256x128xf32>
    %16 = arith.addf %10, %15 : vector<256x128xf32>
    %c0_17 = arith.constant 0 : index
    %c3 = arith.constant 3 : index
    %c0_18 = arith.constant 0 : index
    %17 = vector.load %arg1[%c0_17, %c3, %c0_18] : memref<1x328x4xbf16, #tpu.memory_space<vmem>>, vector<1x256x4xbf16>
    %18 = vector.shape_cast %17 : vector<1x256x4xbf16> to vector<256x4xbf16>
    %c3_19 = arith.constant 3 : index
    %c0_20 = arith.constant 0 : index
    %c0_21 = arith.constant 0 : index
    %19 = vector.load %arg2[%c3_19, %c0_20, %c0_21] : memref<25x4x128xbf16, #tpu.memory_space<vmem>>, vector<1x4x128xbf16>
    %20 = vector.shape_cast %19 : vector<1x4x128xbf16> to vector<4x128xbf16>
    %cst_22 = arith.constant dense<0.000000e+00> : vector<256x128xf32>
    %21 = tpu.matmul %18, %20, %cst_22 {dimension_numbers = #tpu.dot_dimension_numbers<[1], [0], [0], [1], [0, 0, 1, 1], [], []>} : vector<256x4xbf16>, vector<4x128xbf16>, vector<256x128xf32> -> vector<256x128xf32>
    %22 = arith.addf %16, %21 : vector<256x128xf32>
    %c0_23 = arith.constant 0 : index
    %c4 = arith.constant 4 : index
    %c0_24 = arith.constant 0 : index
    %23 = vector.load %arg1[%c0_23, %c4, %c0_24] : memref<1x328x4xbf16, #tpu.memory_space<vmem>>, vector<1x256x4xbf16>
    %24 = vector.shape_cast %23 : vector<1x256x4xbf16> to vector<256x4xbf16>
    %c4_25 = arith.constant 4 : index
    %c0_26 = arith.constant 0 : index
    %c0_27 = arith.constant 0 : index
    %25 = vector.load %arg2[%c4_25, %c0_26, %c0_27] : memref<25x4x128xbf16, #tpu.memory_space<vmem>>, vector<1x4x128xbf16>
    %26 = vector.shape_cast %25 : vector<1x4x128xbf16> to vector<4x128xbf16>
    %cst_28 = arith.constant dense<0.000000e+00> : vector<256x128xf32>
    %27 = tpu.matmul %24, %26, %cst_28 {dimension_numbers = #tpu.dot_dimension_numbers<[1], [0], [0], [1], [0, 0, 1, 1], [], []>} : vector<256x4xbf16>, vector<4x128xbf16>, vector<256x128xf32> -> vector<256x128xf32>
    %28 = arith.addf %22, %27 : vector<256x128xf32>
    %c0_29 = arith.constant 0 : index
    %c16 = arith.constant 16 : index
    %c0_30 = arith.constant 0 : index
    %29 = vector.load %arg1[%c0_29, %c16, %c0_30] : memref<1x328x4xbf16, #tpu.memory_space<vmem>>, vector<1x256x4xbf16>
    %30 = vector.shape_cast %29 : vector<1x256x4xbf16> to vector<256x4xbf16>
    %c5 = arith.constant 5 : index
    %c0_31 = arith.constant 0 : index
    %c0_32 = arith.constant 0 : index
    %31 = vector.load %arg2[%c5, %c0_31, %c0_32] : memref<25x4x128xbf16, #tpu.memory_space<vmem>>, vector<1x4x128xbf16>
    %32 = vector.shape_cast %31 : vector<1x4x128xbf16> to vector<4x128xbf16>
    %cst_33 = arith.constant dense<0.000000e+00> : vector<256x128xf32>
    %33 = tpu.matmul %30, %32, %cst_33 {dimension_numbers = #tpu.dot_dimension_numbers<[1], [0], [0], [1], [0, 0, 1, 1], [], []>} : vector<256x4xbf16>, vector<4x128xbf16>, vector<256x128xf32> -> vector<256x128xf32>
    %34 = arith.addf %28, %33 : vector<256x128xf32>
    %c0_34 = arith.constant 0 : index
    %c17 = arith.constant 17 : index
    %c0_35 = arith.constant 0 : index
    %35 = vector.load %arg1[%c0_34, %c17, %c0_35] : memref<1x328x4xbf16, #tpu.memory_space<vmem>>, vector<1x256x4xbf16>
    %36 = vector.shape_cast %35 : vector<1x256x4xbf16> to vector<256x4xbf16>
    %c6 = arith.constant 6 : index
    %c0_36 = arith.constant 0 : index
    %c0_37 = arith.constant 0 : index
    %37 = vector.load %arg2[%c6, %c0_36, %c0_37] : memref<25x4x128xbf16, #tpu.memory_space<vmem>>, vector<1x4x128xbf16>
    %38 = vector.shape_cast %37 : vector<1x4x128xbf16> to vector<4x128xbf16>
    %cst_38 = arith.constant dense<0.000000e+00> : vector<256x128xf32>
    %39 = tpu.matmul %36, %38, %cst_38 {dimension_numbers = #tpu.dot_dimension_numbers<[1], [0], [0], [1], [0, 0, 1, 1], [], []>} : vector<256x4xbf16>, vector<4x128xbf16>, vector<256x128xf32> -> vector<256x128xf32>
    %40 = arith.addf %34, %39 : vector<256x128xf32>
    %c0_39 = arith.constant 0 : index
    %c18 = arith.constant 18 : index
    %c0_40 = arith.constant 0 : index
    %41 = vector.load %arg1[%c0_39, %c18, %c0_40] : memref<1x328x4xbf16, #tpu.memory_space<vmem>>, vector<1x256x4xbf16>
    %42 = vector.shape_cast %41 : vector<1x256x4xbf16> to vector<256x4xbf16>
    %c7 = arith.constant 7 : index
    %c0_41 = arith.constant 0 : index
    %c0_42 = arith.constant 0 : index
    %43 = vector.load %arg2[%c7, %c0_41, %c0_42] : memref<25x4x128xbf16, #tpu.memory_space<vmem>>, vector<1x4x128xbf16>
    %44 = vector.shape_cast %43 : vector<1x4x128xbf16> to vector<4x128xbf16>
    %cst_43 = arith.constant dense<0.000000e+00> : vector<256x128xf32>
    %45 = tpu.matmul %42, %44, %cst_43 {dimension_numbers = #tpu.dot_dimension_numbers<[1], [0], [0], [1], [0, 0, 1, 1], [], []>} : vector<256x4xbf16>, vector<4x128xbf16>, vector<256x128xf32> -> vector<256x128xf32>
    %46 = arith.addf %40, %45 : vector<256x128xf32>
    %c0_44 = arith.constant 0 : index
    %c19 = arith.constant 19 : index
    %c0_45 = arith.constant 0 : index
    %47 = vector.load %arg1[%c0_44, %c19, %c0_45] : memref<1x328x4xbf16, #tpu.memory_space<vmem>>, vector<1x256x4xbf16>
    %48 = vector.shape_cast %47 : vector<1x256x4xbf16> to vector<256x4xbf16>
    %c8 = arith.constant 8 : index
    %c0_46 = arith.constant 0 : index
    %c0_47 = arith.constant 0 : index
    %49 = vector.load %arg2[%c8, %c0_46, %c0_47] : memref<25x4x128xbf16, #tpu.memory_space<vmem>>, vector<1x4x128xbf16>
    %50 = vector.shape_cast %49 : vector<1x4x128xbf16> to vector<4x128xbf16>
    %cst_48 = arith.constant dense<0.000000e+00> : vector<256x128xf32>
    %51 = tpu.matmul %48, %50, %cst_48 {dimension_numbers = #tpu.dot_dimension_numbers<[1], [0], [0], [1], [0, 0, 1, 1], [], []>} : vector<256x4xbf16>, vector<4x128xbf16>, vector<256x128xf32> -> vector<256x128xf32>
    %52 = arith.addf %46, %51 : vector<256x128xf32>
    %c0_49 = arith.constant 0 : index
    %c20 = arith.constant 20 : index
    %c0_50 = arith.constant 0 : index
    %53 = vector.load %arg1[%c0_49, %c20, %c0_50] : memref<1x328x4xbf16, #tpu.memory_space<vmem>>, vector<1x256x4xbf16>
    %54 = vector.shape_cast %53 : vector<1x256x4xbf16> to vector<256x4xbf16>
    %c9 = arith.constant 9 : index
    %c0_51 = arith.constant 0 : index
    %c0_52 = arith.constant 0 : index
    %55 = vector.load %arg2[%c9, %c0_51, %c0_52] : memref<25x4x128xbf16, #tpu.memory_space<vmem>>, vector<1x4x128xbf16>
    %56 = vector.shape_cast %55 : vector<1x4x128xbf16> to vector<4x128xbf16>
    %cst_53 = arith.constant dense<0.000000e+00> : vector<256x128xf32>
    %57 = tpu.matmul %54, %56, %cst_53 {dimension_numbers = #tpu.dot_dimension_numbers<[1], [0], [0], [1], [0, 0, 1, 1], [], []>} : vector<256x4xbf16>, vector<4x128xbf16>, vector<256x128xf32> -> vector<256x128xf32>
    %58 = arith.addf %52, %57 : vector<256x128xf32>
    %c0_54 = arith.constant 0 : index
    %c32 = arith.constant 32 : index
    %c0_55 = arith.constant 0 : index
    %59 = vector.load %arg1[%c0_54, %c32, %c0_55] : memref<1x328x4xbf16, #tpu.memory_space<vmem>>, vector<1x256x4xbf16>
    %60 = vector.shape_cast %59 : vector<1x256x4xbf16> to vector<256x4xbf16>
    %c10 = arith.constant 10 : index
    %c0_56 = arith.constant 0 : index
    %c0_57 = arith.constant 0 : index
    %61 = vector.load %arg2[%c10, %c0_56, %c0_57] : memref<25x4x128xbf16, #tpu.memory_space<vmem>>, vector<1x4x128xbf16>
    %62 = vector.shape_cast %61 : vector<1x4x128xbf16> to vector<4x128xbf16>
    %cst_58 = arith.constant dense<0.000000e+00> : vector<256x128xf32>
    %63 = tpu.matmul %60, %62, %cst_58 {dimension_numbers = #tpu.dot_dimension_numbers<[1], [0], [0], [1], [0, 0, 1, 1], [], []>} : vector<256x4xbf16>, vector<4x128xbf16>, vector<256x128xf32> -> vector<256x128xf32>
    %64 = arith.addf %58, %63 : vector<256x128xf32>
    %c0_59 = arith.constant 0 : index
    %c33 = arith.constant 33 : index
    %c0_60 = arith.constant 0 : index
    %65 = vector.load %arg1[%c0_59, %c33, %c0_60] : memref<1x328x4xbf16, #tpu.memory_space<vmem>>, vector<1x256x4xbf16>
    %66 = vector.shape_cast %65 : vector<1x256x4xbf16> to vector<256x4xbf16>
    %c11 = arith.constant 11 : index
    %c0_61 = arith.constant 0 : index
    %c0_62 = arith.constant 0 : index
    %67 = vector.load %arg2[%c11, %c0_61, %c0_62] : memref<25x4x128xbf16, #tpu.memory_space<vmem>>, vector<1x4x128xbf16>
    %68 = vector.shape_cast %67 : vector<1x4x128xbf16> to vector<4x128xbf16>
    %cst_63 = arith.constant dense<0.000000e+00> : vector<256x128xf32>
    %69 = tpu.matmul %66, %68, %cst_63 {dimension_numbers = #tpu.dot_dimension_numbers<[1], [0], [0], [1], [0, 0, 1, 1], [], []>} : vector<256x4xbf16>, vector<4x128xbf16>, vector<256x128xf32> -> vector<256x128xf32>
    %70 = arith.addf %64, %69 : vector<256x128xf32>
    %c0_64 = arith.constant 0 : index
    %c34 = arith.constant 34 : index
    %c0_65 = arith.constant 0 : index
    %71 = vector.load %arg1[%c0_64, %c34, %c0_65] : memref<1x328x4xbf16, #tpu.memory_space<vmem>>, vector<1x256x4xbf16>
    %72 = vector.shape_cast %71 : vector<1x256x4xbf16> to vector<256x4xbf16>
    %c12 = arith.constant 12 : index
    %c0_66 = arith.constant 0 : index
    %c0_67 = arith.constant 0 : index
    %73 = vector.load %arg2[%c12, %c0_66, %c0_67] : memref<25x4x128xbf16, #tpu.memory_space<vmem>>, vector<1x4x128xbf16>
    %74 = vector.shape_cast %73 : vector<1x4x128xbf16> to vector<4x128xbf16>
    %cst_68 = arith.constant dense<0.000000e+00> : vector<256x128xf32>
    %75 = tpu.matmul %72, %74, %cst_68 {dimension_numbers = #tpu.dot_dimension_numbers<[1], [0], [0], [1], [0, 0, 1, 1], [], []>} : vector<256x4xbf16>, vector<4x128xbf16>, vector<256x128xf32> -> vector<256x128xf32>
    %76 = arith.addf %70, %75 : vector<256x128xf32>
    %c0_69 = arith.constant 0 : index
    %c35 = arith.constant 35 : index
    %c0_70 = arith.constant 0 : index
    %77 = vector.load %arg1[%c0_69, %c35, %c0_70] : memref<1x328x4xbf16, #tpu.memory_space<vmem>>, vector<1x256x4xbf16>
    %78 = vector.shape_cast %77 : vector<1x256x4xbf16> to vector<256x4xbf16>
    %c13 = arith.constant 13 : index
    %c0_71 = arith.constant 0 : index
    %c0_72 = arith.constant 0 : index
    %79 = vector.load %arg2[%c13, %c0_71, %c0_72] : memref<25x4x128xbf16, #tpu.memory_space<vmem>>, vector<1x4x128xbf16>
    %80 = vector.shape_cast %79 : vector<1x4x128xbf16> to vector<4x128xbf16>
    %cst_73 = arith.constant dense<0.000000e+00> : vector<256x128xf32>
    %81 = tpu.matmul %78, %80, %cst_73 {dimension_numbers = #tpu.dot_dimension_numbers<[1], [0], [0], [1], [0, 0, 1, 1], [], []>} : vector<256x4xbf16>, vector<4x128xbf16>, vector<256x128xf32> -> vector<256x128xf32>
    %82 = arith.addf %76, %81 : vector<256x128xf32>
    %c0_74 = arith.constant 0 : index
    %c36 = arith.constant 36 : index
    %c0_75 = arith.constant 0 : index
    %83 = vector.load %arg1[%c0_74, %c36, %c0_75] : memref<1x328x4xbf16, #tpu.memory_space<vmem>>, vector<1x256x4xbf16>
    %84 = vector.shape_cast %83 : vector<1x256x4xbf16> to vector<256x4xbf16>
    %c14 = arith.constant 14 : index
    %c0_76 = arith.constant 0 : index
    %c0_77 = arith.constant 0 : index
    %85 = vector.load %arg2[%c14, %c0_76, %c0_77] : memref<25x4x128xbf16, #tpu.memory_space<vmem>>, vector<1x4x128xbf16>
    %86 = vector.shape_cast %85 : vector<1x4x128xbf16> to vector<4x128xbf16>
    %cst_78 = arith.constant dense<0.000000e+00> : vector<256x128xf32>
    %87 = tpu.matmul %84, %86, %cst_78 {dimension_numbers = #tpu.dot_dimension_numbers<[1], [0], [0], [1], [0, 0, 1, 1], [], []>} : vector<256x4xbf16>, vector<4x128xbf16>, vector<256x128xf32> -> vector<256x128xf32>
    %88 = arith.addf %82, %87 : vector<256x128xf32>
    %c0_79 = arith.constant 0 : index
    %c48 = arith.constant 48 : index
    %c0_80 = arith.constant 0 : index
    %89 = vector.load %arg1[%c0_79, %c48, %c0_80] : memref<1x328x4xbf16, #tpu.memory_space<vmem>>, vector<1x256x4xbf16>
    %90 = vector.shape_cast %89 : vector<1x256x4xbf16> to vector<256x4xbf16>
    %c15 = arith.constant 15 : index
    %c0_81 = arith.constant 0 : index
    %c0_82 = arith.constant 0 : index
    %91 = vector.load %arg2[%c15, %c0_81, %c0_82] : memref<25x4x128xbf16, #tpu.memory_space<vmem>>, vector<1x4x128xbf16>
    %92 = vector.shape_cast %91 : vector<1x4x128xbf16> to vector<4x128xbf16>
    %cst_83 = arith.constant dense<0.000000e+00> : vector<256x128xf32>
    %93 = tpu.matmul %90, %92, %cst_83 {dimension_numbers = #tpu.dot_dimension_numbers<[1], [0], [0], [1], [0, 0, 1, 1], [], []>} : vector<256x4xbf16>, vector<4x128xbf16>, vector<256x128xf32> -> vector<256x128xf32>
    %94 = arith.addf %88, %93 : vector<256x128xf32>
    %c0_84 = arith.constant 0 : index
    %c49 = arith.constant 49 : index
    %c0_85 = arith.constant 0 : index
    %95 = vector.load %arg1[%c0_84, %c49, %c0_85] : memref<1x328x4xbf16, #tpu.memory_space<vmem>>, vector<1x256x4xbf16>
    %96 = vector.shape_cast %95 : vector<1x256x4xbf16> to vector<256x4xbf16>
    %c16_86 = arith.constant 16 : index
    %c0_87 = arith.constant 0 : index
    %c0_88 = arith.constant 0 : index
    %97 = vector.load %arg2[%c16_86, %c0_87, %c0_88] : memref<25x4x128xbf16, #tpu.memory_space<vmem>>, vector<1x4x128xbf16>
    %98 = vector.shape_cast %97 : vector<1x4x128xbf16> to vector<4x128xbf16>
    %cst_89 = arith.constant dense<0.000000e+00> : vector<256x128xf32>
    %99 = tpu.matmul %96, %98, %cst_89 {dimension_numbers = #tpu.dot_dimension_numbers<[1], [0], [0], [1], [0, 0, 1, 1], [], []>} : vector<256x4xbf16>, vector<4x128xbf16>, vector<256x128xf32> -> vector<256x128xf32>
    %100 = arith.addf %94, %99 : vector<256x128xf32>
    %c0_90 = arith.constant 0 : index
    %c50 = arith.constant 50 : index
    %c0_91 = arith.constant 0 : index
    %101 = vector.load %arg1[%c0_90, %c50, %c0_91] : memref<1x328x4xbf16, #tpu.memory_space<vmem>>, vector<1x256x4xbf16>
    %102 = vector.shape_cast %101 : vector<1x256x4xbf16> to vector<256x4xbf16>
    %c17_92 = arith.constant 17 : index
    %c0_93 = arith.constant 0 : index
    %c0_94 = arith.constant 0 : index
    %103 = vector.load %arg2[%c17_92, %c0_93, %c0_94] : memref<25x4x128xbf16, #tpu.memory_space<vmem>>, vector<1x4x128xbf16>
    %104 = vector.shape_cast %103 : vector<1x4x128xbf16> to vector<4x128xbf16>
    %cst_95 = arith.constant dense<0.000000e+00> : vector<256x128xf32>
    %105 = tpu.matmul %102, %104, %cst_95 {dimension_numbers = #tpu.dot_dimension_numbers<[1], [0], [0], [1], [0, 0, 1, 1], [], []>} : vector<256x4xbf16>, vector<4x128xbf16>, vector<256x128xf32> -> vector<256x128xf32>
    %106 = arith.addf %100, %105 : vector<256x128xf32>
    %c0_96 = arith.constant 0 : index
    %c51 = arith.constant 51 : index
    %c0_97 = arith.constant 0 : index
    %107 = vector.load %arg1[%c0_96, %c51, %c0_97] : memref<1x328x4xbf16, #tpu.memory_space<vmem>>, vector<1x256x4xbf16>
    %108 = vector.shape_cast %107 : vector<1x256x4xbf16> to vector<256x4xbf16>
    %c18_98 = arith.constant 18 : index
    %c0_99 = arith.constant 0 : index
    %c0_100 = arith.constant 0 : index
    %109 = vector.load %arg2[%c18_98, %c0_99, %c0_100] : memref<25x4x128xbf16, #tpu.memory_space<vmem>>, vector<1x4x128xbf16>
    %110 = vector.shape_cast %109 : vector<1x4x128xbf16> to vector<4x128xbf16>
    %cst_101 = arith.constant dense<0.000000e+00> : vector<256x128xf32>
    %111 = tpu.matmul %108, %110, %cst_101 {dimension_numbers = #tpu.dot_dimension_numbers<[1], [0], [0], [1], [0, 0, 1, 1], [], []>} : vector<256x4xbf16>, vector<4x128xbf16>, vector<256x128xf32> -> vector<256x128xf32>
    %112 = arith.addf %106, %111 : vector<256x128xf32>
    %c0_102 = arith.constant 0 : index
    %c52 = arith.constant 52 : index
    %c0_103 = arith.constant 0 : index
    %113 = vector.load %arg1[%c0_102, %c52, %c0_103] : memref<1x328x4xbf16, #tpu.memory_space<vmem>>, vector<1x256x4xbf16>
    %114 = vector.shape_cast %113 : vector<1x256x4xbf16> to vector<256x4xbf16>
    %c19_104 = arith.constant 19 : index
    %c0_105 = arith.constant 0 : index
    %c0_106 = arith.constant 0 : index
    %115 = vector.load %arg2[%c19_104, %c0_105, %c0_106] : memref<25x4x128xbf16, #tpu.memory_space<vmem>>, vector<1x4x128xbf16>
    %116 = vector.shape_cast %115 : vector<1x4x128xbf16> to vector<4x128xbf16>
    %cst_107 = arith.constant dense<0.000000e+00> : vector<256x128xf32>
    %117 = tpu.matmul %114, %116, %cst_107 {dimension_numbers = #tpu.dot_dimension_numbers<[1], [0], [0], [1], [0, 0, 1, 1], [], []>} : vector<256x4xbf16>, vector<4x128xbf16>, vector<256x128xf32> -> vector<256x128xf32>
    %118 = arith.addf %112, %117 : vector<256x128xf32>
    %c0_108 = arith.constant 0 : index
    %c64 = arith.constant 64 : index
    %c0_109 = arith.constant 0 : index
    %119 = vector.load %arg1[%c0_108, %c64, %c0_109] : memref<1x328x4xbf16, #tpu.memory_space<vmem>>, vector<1x256x4xbf16>
    %120 = vector.shape_cast %119 : vector<1x256x4xbf16> to vector<256x4xbf16>
    %c20_110 = arith.constant 20 : index
    %c0_111 = arith.constant 0 : index
    %c0_112 = arith.constant 0 : index
    %121 = vector.load %arg2[%c20_110, %c0_111, %c0_112] : memref<25x4x128xbf16, #tpu.memory_space<vmem>>, vector<1x4x128xbf16>
    %122 = vector.shape_cast %121 : vector<1x4x128xbf16> to vector<4x128xbf16>
    %cst_113 = arith.constant dense<0.000000e+00> : vector<256x128xf32>
    %123 = tpu.matmul %120, %122, %cst_113 {dimension_numbers = #tpu.dot_dimension_numbers<[1], [0], [0], [1], [0, 0, 1, 1], [], []>} : vector<256x4xbf16>, vector<4x128xbf16>, vector<256x128xf32> -> vector<256x128xf32>
    %124 = arith.addf %118, %123 : vector<256x128xf32>
    %c0_114 = arith.constant 0 : index
    %c65 = arith.constant 65 : index
    %c0_115 = arith.constant 0 : index
    %125 = vector.load %arg1[%c0_114, %c65, %c0_115] : memref<1x328x4xbf16, #tpu.memory_space<vmem>>, vector<1x256x4xbf16>
    %126 = vector.shape_cast %125 : vector<1x256x4xbf16> to vector<256x4xbf16>
    %c21 = arith.constant 21 : index
    %c0_116 = arith.constant 0 : index
    %c0_117 = arith.constant 0 : index
    %127 = vector.load %arg2[%c21, %c0_116, %c0_117] : memref<25x4x128xbf16, #tpu.memory_space<vmem>>, vector<1x4x128xbf16>
    %128 = vector.shape_cast %127 : vector<1x4x128xbf16> to vector<4x128xbf16>
    %cst_118 = arith.constant dense<0.000000e+00> : vector<256x128xf32>
    %129 = tpu.matmul %126, %128, %cst_118 {dimension_numbers = #tpu.dot_dimension_numbers<[1], [0], [0], [1], [0, 0, 1, 1], [], []>} : vector<256x4xbf16>, vector<4x128xbf16>, vector<256x128xf32> -> vector<256x128xf32>
    %130 = arith.addf %124, %129 : vector<256x128xf32>
    %c0_119 = arith.constant 0 : index
    %c66 = arith.constant 66 : index
    %c0_120 = arith.constant 0 : index
    %131 = vector.load %arg1[%c0_119, %c66, %c0_120] : memref<1x328x4xbf16, #tpu.memory_space<vmem>>, vector<1x256x4xbf16>
    %132 = vector.shape_cast %131 : vector<1x256x4xbf16> to vector<256x4xbf16>
    %c22 = arith.constant 22 : index
    %c0_121 = arith.constant 0 : index
    %c0_122 = arith.constant 0 : index
    %133 = vector.load %arg2[%c22, %c0_121, %c0_122] : memref<25x4x128xbf16, #tpu.memory_space<vmem>>, vector<1x4x128xbf16>
    %134 = vector.shape_cast %133 : vector<1x4x128xbf16> to vector<4x128xbf16>
    %cst_123 = arith.constant dense<0.000000e+00> : vector<256x128xf32>
    %135 = tpu.matmul %132, %134, %cst_123 {dimension_numbers = #tpu.dot_dimension_numbers<[1], [0], [0], [1], [0, 0, 1, 1], [], []>} : vector<256x4xbf16>, vector<4x128xbf16>, vector<256x128xf32> -> vector<256x128xf32>
    %136 = arith.addf %130, %135 : vector<256x128xf32>
    %c0_124 = arith.constant 0 : index
    %c67 = arith.constant 67 : index
    %c0_125 = arith.constant 0 : index
    %137 = vector.load %arg1[%c0_124, %c67, %c0_125] : memref<1x328x4xbf16, #tpu.memory_space<vmem>>, vector<1x256x4xbf16>
    %138 = vector.shape_cast %137 : vector<1x256x4xbf16> to vector<256x4xbf16>
    %c23 = arith.constant 23 : index
    %c0_126 = arith.constant 0 : index
    %c0_127 = arith.constant 0 : index
    %139 = vector.load %arg2[%c23, %c0_126, %c0_127] : memref<25x4x128xbf16, #tpu.memory_space<vmem>>, vector<1x4x128xbf16>
    %140 = vector.shape_cast %139 : vector<1x4x128xbf16> to vector<4x128xbf16>
    %cst_128 = arith.constant dense<0.000000e+00> : vector<256x128xf32>
    %141 = tpu.matmul %138, %140, %cst_128 {dimension_numbers = #tpu.dot_dimension_numbers<[1], [0], [0], [1], [0, 0, 1, 1], [], []>} : vector<256x4xbf16>, vector<4x128xbf16>, vector<256x128xf32> -> vector<256x128xf32>
    %142 = arith.addf %136, %141 : vector<256x128xf32>
    %c0_129 = arith.constant 0 : index
    %c68 = arith.constant 68 : index
    %c0_130 = arith.constant 0 : index
    %143 = vector.load %arg1[%c0_129, %c68, %c0_130] : memref<1x328x4xbf16, #tpu.memory_space<vmem>>, vector<1x256x4xbf16>
    %144 = vector.shape_cast %143 : vector<1x256x4xbf16> to vector<256x4xbf16>
    %c24 = arith.constant 24 : index
    %c0_131 = arith.constant 0 : index
    %c0_132 = arith.constant 0 : index
    %145 = vector.load %arg2[%c24, %c0_131, %c0_132] : memref<25x4x128xbf16, #tpu.memory_space<vmem>>, vector<1x4x128xbf16>
    %146 = vector.shape_cast %145 : vector<1x4x128xbf16> to vector<4x128xbf16>
    %cst_133 = arith.constant dense<0.000000e+00> : vector<256x128xf32>
    %147 = tpu.matmul %144, %146, %cst_133 {dimension_numbers = #tpu.dot_dimension_numbers<[1], [0], [0], [1], [0, 0, 1, 1], [], []>} : vector<256x4xbf16>, vector<4x128xbf16>, vector<256x128xf32> -> vector<256x128xf32>
    %148 = arith.addf %142, %147 : vector<256x128xf32>
    %c0_134 = arith.constant 0 : index
    %c0_135 = arith.constant 0 : index
    %149 = vector.load %arg3[%c0_134, %c0_135] : memref<256x1xf32, #tpu.memory_space<vmem>>, vector<256x1xf32>
    %150 = vector.broadcast %149 : vector<256x1xf32> to vector<256x128xf32>
    %151 = arith.mulf %148, %150 : vector<256x128xf32>
    %c0_136 = arith.constant 0 : index
    %c0_137 = arith.constant 0 : index
    %152 = vector.load %arg4[%c0_136, %c0_137] : memref<128x128xf32, #tpu.memory_space<vmem>>, vector<128x128xf32>
    %cst_138 = arith.constant dense<0.000000e+00> : vector<256x128xf32>
    %153 = tpu.matmul %151, %152, %cst_138 {dimension_numbers = #tpu.dot_dimension_numbers<[1], [0], [0], [1], [0, 0, 1, 1], [], []>} : vector<256x128xf32>, vector<128x128xf32>, vector<256x128xf32> -> vector<256x128xf32>
    %154 = arith.mulf %153, %153 : vector<256x128xf32>
    %cst_139 = arith.constant dense<0.000000e+00> : vector<128xf32>
    %155 = vector.multi_reduction <add>, %154, %cst_139 [0] : vector<256x128xf32> to vector<128xf32>
    %156 = vector.shape_cast %155 : vector<128xf32> to vector<1x128xf32>
    %c0_140 = arith.constant 0 : index
    %c0_141 = arith.constant 0 : index
    %c0_142 = arith.constant 0 : index
    %157 = vector.load %arg5[%c0_140, %c0_141, %c0_142] : memref<1x1x128xf32, #tpu.memory_space<vmem>>, vector<1x1x128xf32>
    %158 = vector.shape_cast %157 : vector<1x1x128xf32> to vector<1x128xf32>
    %159 = vector.shape_cast %156 : vector<1x128xf32> to vector<1x1x128xf32>
    tpu.vector_store %arg5[%c0_140, %c0_141, %c0_142], %159 {strides = array<i32>} : memref<1x1x128xf32, #tpu.memory_space<vmem>>, vector<1x1x128xf32>,
    return
  }
  func.func @transform_0(%arg0: i32) -> (i32, i32, i32) {
    %c0_i32 = arith.constant 0 : i32
    %c0_i32_0 = arith.constant 0 : i32
    %c0_i32_1 = arith.constant 0 : i32
    return %arg0, %c0_i32, %c0_i32_0 : i32, i32, i32
  }
  func.func @transform_1(%arg0: i32) -> (i32, i32, i32) {
    %c0_i32 = arith.constant 0 : i32
    %c0_i32_0 = arith.constant 0 : i32
    %c0_i32_1 = arith.constant 0 : i32
    %c0_i32_2 = arith.constant 0 : i32
    return %c0_i32, %c0_i32_0, %c0_i32_1 : i32, i32, i32
  }
  func.func @transform_2(%arg0: i32) -> (i32, i32) {
    %c0_i32 = arith.constant 0 : i32
    %c0_i32_0 = arith.constant 0 : i32
    %c0_i32_1 = arith.constant 0 : i32
    return %c0_i32, %c0_i32_0 : i32, i32
  }
  func.func @transform_3(%arg0: i32) -> (i32, i32) {
    %c0_i32 = arith.constant 0 : i32
    %c0_i32_0 = arith.constant 0 : i32
    %c0_i32_1 = arith.constant 0 : i32
    return %c0_i32, %c0_i32_0 : i32, i32
  }
  func.func @transform_4(%arg0: i32) -> (i32, i32, i32) {
    %c0_i32 = arith.constant 0 : i32
    %c0_i32_0 = arith.constant 0 : i32
    %c0_i32_1 = arith.constant 0 : i32
    return %arg0, %c0_i32, %c0_i32_0 : i32, i32, i32
  }
}

</mosaic_0001>

<bundles_post_ra>
// kernel: tpu_custom_call.1
= control target key start
LH: loop header
LB: loop body
LE: loop exit
PB: predicated region body
PF: predicated region fallthrough
CT: control target
= control target key end

     0   :  { %9 = vsyncpa [#allocation3], 0  ;;  %s15156_s0 = inlined_call_operand.vmem [shape: bf16[2,328,4], index: 0, kind: input, shape index: {}]   ;;  %s15157_s1 = inlined_call_operand.vmem [shape: bf16[25,4,128], index: 1, kind: input, shape index: {}]   ;;  %s15158_s2 = inlined_call_operand.vmem [shape: f32[256,1], index: 2, kind: input, shape index: {}]   ;;  %s15159_s3 = inlined_call_operand.vmem [shape: f32[128,128], index: 3, kind: input, shape index: {}]   ;;  %s15160_s4 = inlined_call_operand.hbm [shape: f32[2,1,128], index: 4, kind: output, shape index: {}]  }
   0x1   :  { %11 = vsyncpa [#allocation3 + $0x1], 0  ;;  %s12479_s15 = smov 0   ;;  %s12481_s16 = smov 0  }
   0x2   :  { %s12483_s17 = smov 0   ;;  %s12485_s18 = smov 0  }
   0x3 LB: > { %s12500_s19 = sadd.s32 4294967295, %s12450_s18   ;;  %s9337_s20 = sadd.s32 4294967294, %s12450_s18   ;;  %s12450_s18 = sphi %s12485_s18, %s15410_s18   ;;  %s12446_s17 = sphi %s12483_s17, %s15409_s17   ;;  %s12442_s16 = sphi %s12481_s16, %s15408_s16   ;;  %s12438_s15 = sphi %s12479_s15, %s15407_s15  }
   0x4   : > { %s12504_s21 = sadd.s32 1, %s12450_s18   ;;  %s113_s22 = sadd.s32 1, %s12446_s17 }
   0x5   : > { %s110_s23 = ssub.s32 %s12450_s18, %s12504_s21  ;;  %p123_p0 = scmp.ne.s32.totalorder %s12446_s17, %s12442_s16 }
   0x6   : > { %p111_p1 = scmp.eq.s32.totalorder %s110_s23, 0  ;;  %p124_p2 = scmp.eq.s32.totalorder %s12500_s19, 1 }
   0x7   : > { %p129_p3 = scmp.ne.s32.totalorder %s12442_s16, %s12438_s15  ;;  %p130_p4 = scmp.eq.s32.totalorder %s9337_s20, 1 }
   0x8   : > { %s12515_s24 = scalar_select %p111_p1, %s12446_s17, %s113_s22  }
   0x9   : > { %p12517_p5 = por %p124_p2, %p123_p0  ;;  %p12521_p6 = por %p130_p4, %p129_p3 }
   0xa   : > { %p9340_p7 = scmp.ge.s32.totalorder %s12450_s18, 1  ;;  %p165_p8 = scmp.lt.s32.totalorder %s12450_s18, 3 }
   0xc   : > { %p166_p9 = pnand %p9340_p7, %p165_p8 }
   0xe   : > { %169 = sbr.rel (%p166_p9) target bundleno = 1327 (0x52f), region = 36 }
  0x15   : > { %vm497_vm0 = vcmask 1041408   ;;  %v9634_v0 = vld [vmem:[%s15157_s1 + $0x18] sm:$0x3]  ;;  %p190_p10 = scmp.lt.s32.totalorder %s12500_s19, 1  ;;  %v9652_v2 = vld [vmem:[%s15157_s1 + $0x1a] sm:$0x3] }
  0x16   : > { %12148 = vmatprep.subr.msk.bf16.mxu0 %vm497_vm0, %v9634_v0  ;;  %v4439_v1 = vsel %vm497_vm0, %v9634_v0, 0  ;;  %v9342_v3 = vld [vmem:[%s15157_s1 + $0x2] sm:$0x3]  ;;  %v228_v5 = vld [vmem:[%s15157_s1] sm:$0x3]  ;;  %vm448_vm1 = vcmask 31744  }
  0x17   : > { %10815 = vmatpush3.bf16.msra.mxu0 %v4439_v1  ;;  %s191_s7 = scalar_select %p190_p10, %s12500_s19, 1  ;;  %12136 = vmatprep.subr.msk.bf16.mxu1 %vm497_vm0, %v9342_v3  ;;  %v499_v4 = vsel %vm497_vm0, %v9342_v3, 0  ;;  %vm315_vm2 = vsmask.f32 7424  ;;  %vm864_vm3 = vcmask 1046528   ;;  %v4766_v11 = vsel %vm497_vm0, %v9652_v2, 0 }
  0x18   : > { %12149 = vmatprep.subr.msk.bf16.mxu0 %vm497_vm0, %v9652_v2  ;;  %10407 = vmatpush3.bf16.msra.mxu1 %v499_v4  ;;  %v12584_v23 = vld [vmem:[%s15157_s1 + $0x1c] sm:$0x3]  ;;  %v695_v48 = vsel %vm497_vm0, %v228_v5, 0  ;;  %vm1148_vm4 = vsmask.f32 6400  ;;  %vm1476_vm5 = vcmask 1045504  }
  0x19   : > { %s12161_s10 = smul.u32 164, %s191_s7  ;;  %12137 = vmatprep.subr.msk.bf16.mxu1 %vm497_vm0, %v228_v5  ;;  %s188_s5 = sand.u32 1, %s12442_s16  }
  0x1a   : > { %s9930_s6 = sshll.u32 %s12500_s19, 4  ;;  %s9270_s11 = scalar_lea.sflag [#allocation3], %s188_s5 }
  0x1b   : > { %s12550_s13 = scalar_lea.vmem %s15156_s0, %s12161_s10  ;;  %s15114_s10 = scalar_lea.hbm %s15160_s4, %s9930_s6 }
  0x1c   : > { %v3858_v6 = vld [vmem:[%s12550_s13 + $0x14] sm:$0xf]  ;;  %v12554_v7 = vld [vmem:[%s12550_s13 + $0x18] sm:$0xff]   ;;  %v4351_v8 = vld [vmem:[%s12550_s13 + $0x10] sm:$0xe]  ;;  %s12453_s19 = smov [#allocation2]  }
  0x1d   : > { %v12557_v9 = vcombine.low %v4351_v8, %v3858_v6  ;;  %v12560_v10 = vld [vmem:[%s12550_s13 + $0x20] sm:$0xff]   ;;  %v4358_v13 = vrot.slane %v12554_v7, 1  ;;  %v12567_v15 = vld [vmem:[%s12550_s13 + $0x8] sm:$0xff]   ;;  %v12576_v21 = vld [vmem:[%s12550_s13 + $0x10] sm:$0xff]   ;;  %s12392_s14 = sshll.u32 %s12453_s19, 4  ;;  %s12393_s14 = int_to_ptr.vmem [resolvable:$false] %s12392_s14 }
  0x1e   : > { %v196_v12 = vld [vmem:[%s12550_s13] sm:$0xf]  ;;  %v197_v14 = vld [vmem:[%s12550_s13 + $0x4] sm:$0xf]  ;;  %v4360_v17 = vrot.slane %v12560_v10, 1  ;;  %v324_v19 = vshll.u32 %v12567_v15, 16 }
  0x1f   : > { %v4357_v16 = vrot.slane %v12557_v9, 1  ;;  %v12571_v18 = vcombine.low %v196_v12, %v197_v14  ;;  %v15202_v20 = vshrl.u32 %v12567_v15, 16  ;;  %v12579_v22 = vld [vmem:[%s12550_s13 + $0x28] sm:$0xff]   ;;  %v332_v29 = vshll.u32 %v12576_v21, 16  ;;  %v12597_v32 = vld [vmem:[%s12550_s13 + $0x30] sm:$0xff]   ;;  %v12605_v36 = vld [vmem:[%s12550_s13 + $0x18] sm:$0xff]  }
  0x20   : > { %v4361_v25 = vsel %vm864_vm3, %v4358_v13, %v4360_v17  ;;  %v326_v28 = vrot.slane %v324_v19, 1  ;;  %v4362_v30 = vrot.slane %v12579_v22, 1  ;;  %v12608_v37 = vld [vmem:[%s12550_s13 + $0x20] sm:$0xff]   ;;  %v4364_v39 = vrot.slane %v12597_v32, 1  ;;  %v12620_v45 = vld [vmem:[%s12550_s13 + $0x38] sm:$0xff]   ;;  %v12635_v53 = vld [vmem:[%s12550_s13 + $0x28] sm:$0xff]  }
  0x21   : > { %v4359_v24 = vsel %vm864_vm3, %v4357_v16, %v4358_v13  ;;  %v317_v26 = vshrl.u32 %v12571_v18, 16  ;;  %v319_v27 = vshll.u32 %v12571_v18, 16  ;;  %v334_v34 = vrot.slane %v332_v29, 1  ;;  %15278 = vst [vmem:[#allocation5_spill] sm:$0xff] %v12620_v45  ;;  %v12632_v52 = vld [vmem:[%s12550_s13 + $0x40] sm:$0xff]   ;;  %v12647_v60 = vld [vmem:[%s12550_s13 + $0x30] sm:$0xff]  }
  0x22   : > { %10816 = vmatprep.mubr.msk.bf16.mxu0 %vm448_vm1, %v4359_v24  ;;  %v330_v33 = vor.u32 %v15202_v20, %v326_v28  ;;  %v4363_v35 = vsel %vm864_vm3, %v4360_v17, %v4362_v30  ;;  %v336_v40 = vshrl.u32 %v12576_v21, 16  ;;  %v15198_v42 = vshll.u32 %v12605_v36, 16  ;;  %15279 = vst [vmem:[#allocation6_spill] sm:$0xff] %v12632_v52  ;;  %v12654_v62 = vld [vmem:[%s12550_s13 + $0x48] sm:$0xff]   ;;  %v12665_v5 = vld [vmem:[%s12550_s13 + $0x38] sm:$0xff]   ;;  %v12671_v12 = vld [vmem:[%s12550_s13 + $0x50] sm:$0xff]  }
  0x23   : > { %10817 = vmatmul.mubr.msk.bf16.vlgmr.msra.gmra.mrb[0].mxu0 %vm448_vm1, %v4361_v25  ;;  %v321_v31 = vrot.slane %v319_v27, 1  ;;  %v15200_v43 = vshrl.u32 %v12605_v36, 16  ;;  %v15193_v44 = vshll.u32 %v12608_v37, 16  ;;  %v4365_v49 = vsel %vm864_vm3, %v4362_v30, %v4364_v39  ;;  %15280 = vst [vmem:[#allocation7_spill] sm:$0xff] %v12654_v62  ;;  %15281 = vst [vmem:[#allocation8_spill] sm:$0xff] %v12671_v12  ;;  %v12679_v17 = vld [vmem:[%s12550_s13 + $0x40] sm:$0xff]  }
  0x24   : > { %10849 = vmatpush3.bf16.msra.mxu0 %v4766_v11  ;;  %10820 = vmatprep.mubr.msk.bf16.mxu0 %vm448_vm1, %v4363_v35  ;;  %v335_v41 = vsel %vm315_vm2, %v330_v33, %v334_v34  ;;  %v338_v47 = vor.u32 %v336_v40, %v334_v34  ;;  %v342_v50 = vrot.slane %v15198_v42, 1  ;;  %v4366_v51 = vrot.slane %v12620_v45, 1  ;;  %v12682_v24 = vld [vmem:[%s12550_s13 + $0x58] sm:$0xff]   ;;  %s12394_s20 = scalar_lea.vmem %s12393_s14, 32 }
  0x25   : > { %v322_v38 = vor.u32 %v321_v31, %v317_v26  ;;  %12150 = vmatprep.subr.msk.bf16.mxu0 %vm497_vm0, %v12584_v23  ;;  %v350_v54 = vrot.slane %v15193_v44, 1  ;;  %v15196_v55 = vshrl.u32 %v12608_v37, 16  ;;  %v15176_v59 = vshll.u32 %v12635_v53, 16 }
  0x26   : > { %v343_v56 = vsel %vm315_vm2, %v338_v47, %v342_v50  ;;  %v346_v57 = vor.u32 %v15200_v43, %v342_v50  ;;  %v4367_v58 = vsel %vm864_vm3, %v4364_v39, %v4366_v51  ;;  %v4368_v63 = vrot.slane %v12632_v52, 1  ;;  %v12703_v39 = vld [vmem:[%s12550_s13 + $0x60] sm:$0xff]  }
  0x27   : > { %v327_v46 = vsel %vm315_vm2, %v322_v38, %v326_v28  ;;  %v354_v61 = vor.u32 %v15196_v55, %v350_v54  ;;  %v358_v0 = vrot.slane %v15176_v59, 1  ;;  %v15174_v1 = vshll.u32 %v12647_v60, 16  ;;  %v12693_v28 = vld [vmem:[%s12550_s13 + $0x48] sm:$0xff]   ;;  %15282 = vst [vmem:[#allocation9_spill] sm:$0xff] %v12703_v39 }
  0x28   : > { %10408 = vmatprep.mubr.msk.bf16.mxu1 %vm448_vm1, %v327_v46  ;;  %v4370_v2 = vrot.slane %v12654_v62, 1  ;;  %v351_v3 = vsel %vm315_vm2, %v346_v57, %v350_v54  ;;  %v15177_v4 = vshrl.u32 %v12635_v53, 16  ;;  %v15175_v8 = vshrl.u32 %v12647_v60, 16 }
  0x29   : > { %10409 = vmatmul.mubr.msk.bf16.vlgmr.msra.gmra.mrb[0].mxu1 %vm448_vm1, %v335_v41  ;;  %v359_v6 = vsel %vm315_vm2, %v354_v61, %v358_v0  ;;  %v4369_v11 = vsel %vm864_vm3, %v4366_v51, %v4368_v63  ;;  %v15172_v13 = vshll.u32 %v12665_v5, 16  ;;  %v366_v14 = vrot.slane %v15174_v1, 1  ;;  %v12716_v51 = vld [vmem:[%s12550_s13 + $0x68] sm:$0xff]  }
  0x2a   : > { %10441 = vmatpush3.bf16.msra.mxu1 %v695_v48  ;;  %10412 = vmatprep.mubr.msk.bf16.mxu1 %vm448_vm1, %v343_v56  ;;  %v4371_v16 = vsel %vm864_vm3, %v4368_v63, %v4370_v2  ;;  %v362_v25 = vor.u32 %v15177_v4, %v358_v0  ;;  %v4372_v30 = vrot.slane %v12671_v12, 1  ;;  %v15166_v31 = vshll.u32 %v12679_v17, 16  ;;  %v12709_v48 = vld [vmem:[%s12550_s13 + $0x50] sm:$0xff]   ;;  %v12823_v4 = vld [vmem:[%s12550_s13 + $0x80] ss:$0 sps:$4 sm:$0x11]  }
  0x2b   : > { %10821 = vmatmul.mubr.msk.bf16.gmra.mrb[4].mxu0 %vm448_vm1, %v4365_v49  ;;  %v370_v26 = vor.u32 %v15175_v8, %v366_v14  ;;  %v374_v27 = vrot.slane %v15172_v13, 1  ;;  %v4374_v33 = vrot.slane %v12682_v24, 1  ;;  %v15173_v35 = vshrl.u32 %v12665_v5, 16 }
  0x2c   : > { %10824 = vmatprep.mubr.msk.bf16.mxu0 %vm448_vm1, %v4367_v58  ;;  %v367_v34 = vsel %vm315_vm2, %v362_v25, %v366_v14  ;;  %v15171_v41 = vshrl.u32 %v12679_v17, 16  ;;  %v15164_v46 = vshll.u32 %v12693_v28, 16  ;;  %v4373_v47 = vsel %vm864_vm3, %v4370_v2, %v4372_v30  ;;  %v12727_v58 = vld [vmem:[%s12550_s13 + $0x58] sm:$0xff]   ;;  %v12740_v25 = vld [vmem:[%s12550_s13 + $0x70] sm:$0xff]  }
  0x2d   : > { %v375_v38 = vsel %vm315_vm2, %v370_v26, %v374_v27  ;;  %v382_v49 = vrot.slane %v15166_v31, 1  ;;  %v4375_v50 = vsel %vm864_vm3, %v4372_v30, %v4374_v33  ;;  %v378_v54 = vor.u32 %v15173_v35, %v374_v27  ;;  %v12747_v30 = vld [vmem:[%s12550_s13 + $0x60] sm:$0xff]   ;;  %v12803_v31 = vld [vmem:[%s12550_s13 + $0x78] sm:$0xff]  }
  0x2e   : > { %v390_v57 = vrot.slane %v15164_v46, 1  ;;  %v4376_v61 = vrot.slane %v12703_v39, 1  ;;  %v15162_v63 = vshll.u32 %v12709_v48, 16  ;;  %v4378_v0 = vrot.slane %v12716_v51, 1  ;;  %v12787_v46 = vld [vmem:[%s12550_s13 + $0x88] sm:$0xff]  }
  0x2f   : > { %v386_v56 = vor.u32 %v15171_v41, %v382_v49  ;;  %v383_v2 = vsel %vm315_vm2, %v378_v54, %v382_v49  ;;  %v15161_v14 = vshll.u32 %v12727_v58, 16  ;;  %v12761_v49 = vld [vmem:[%s12550_s13 + $0x68] sm:$0xff]   ;;  %v4380_v54 = vrot.slane %v12740_v25, 1  ;;  %15284 = vst [vmem:[#allocation11_spill] sm:$0xff] %v12787_v46 }
  0x30   : > { %v398_v26 = vrot.slane %v15162_v63, 1  ;;  %v4379_v27 = vsel %vm864_vm3, %v4376_v61, %v4378_v0  ;;  %v12783_v63 = vld [vmem:[%s12550_s13 + $0x70] sm:$0xff]   ;;  %v15182_v35 = vshll.u32 %v12803_v31, 16  ;;  %v15199_v44 = vshrl.u32 %v12654_v62, 16 }
  0x31   : > { %10413 = vmatmul.mubr.msk.bf16.gmra.mrb[4].mxu1 %vm448_vm1, %v351_v3  ;;  %v15165_v3 = vshrl.u32 %v12693_v28, 16  ;;  %v12235_v41 = vld [vmem:[%s12550_s13 + $0x90] ss:$0 sps:$4 sm:$0x11]   ;;  %v15181_v13 = vshrl.u32 %v12783_v63, 16  ;;  %v1161_v42 = vrot.slane %v336_v40, 1 }
  0x32   : > { %10416 = vmatprep.mubr.msk.bf16.mxu1 %vm448_vm1, %v359_v6  ;;  %v391_v6 = vsel %vm315_vm2, %v386_v56, %v390_v57  ;;  %v15167_v56 = vshll.u32 %v12747_v30, 16 }
  0x33   : > { %10825 = vmatmul.mubr.msk.bf16.gmra.mrb[8].mxu0 %vm448_vm1, %v4369_v11  ;;  %v15163_v11 = vshrl.u32 %v12709_v48, 16 }
  0x34   : > { %10828 = vmatprep.mubr.msk.bf16.mxu0 %vm448_vm1, %v4371_v16  ;;  %v4377_v16 = vsel %vm864_vm3, %v4374_v33, %v4376_v61 }
  0x35   : > { %v402_v33 = vor.u32 %v15163_v11, %v398_v26  ;;  %v4381_v11 = vsel %vm864_vm3, %v4378_v0, %v4380_v54 }
  0x39   : > { %10417 = vmatmul.mubr.msk.bf16.gmra.mrb[8].mxu1 %vm448_vm1, %v367_v34  ;;  %v12750_v34 = vld [vmem:[%s12550_s13 + $0x78] sm:$0xff]  }
  0x3a   : > { %10420 = vmatprep.mubr.msk.bf16.mxu1 %vm448_vm1, %v375_v38  ;;  %v394_v38 = vor.u32 %v15165_v3, %v390_v57  ;;  %v4382_v57 = vrot.slane %v12750_v34, 1  ;;  %v4992_v43 = vrot.slane %v12750_v34, 2 }
  0x3b   : > { %10829 = vmatmul.mubr.msk.bf16.gmra.mrb[12].mxu0 %vm448_vm1, %v4373_v47  ;;  %v406_v47 = vrot.slane %v15161_v14, 1  ;;  %v15170_v14 = vshll.u32 %v12761_v49, 16 }
  0x3c   : > { %10832 = vmatprep.mubr.msk.bf16.mxu0 %vm448_vm1, %v4375_v50  ;;  %v12766_v50 = vld [vmem:[%s15157_s1 + $0x4] sm:$0x3]  ;;  %v399_v61 = vsel %vm315_vm2, %v394_v38, %v398_v26  ;;  %v414_v26 = vrot.slane %v15167_v56, 1  ;;  %v4383_v38 = vsel %vm864_vm3, %v4380_v54, %v4382_v57  ;;  %v15178_v54 = vshll.u32 %v12783_v63, 16 }
  0x3d   : > { %12138 = vmatprep.subr.msk.bf16.mxu1 %vm497_vm0, %v12766_v50  ;;  %v15179_v56 = vshrl.u32 %v12554_v7, 16 }
  0x3e   : > { %v430_v8 = vrot.slane %v15178_v54, 1 }
  0x40   : > { %v434_v54 = vor.u32 %v15181_v13, %v430_v8  ;;  %v444_v13 = vshll.u32 %v12823_v4, 16 }
  0x41   : > { %10421 = vmatmul.mubr.msk.bf16.gmra.mrb[12].mxu1 %vm448_vm1, %v383_v2  ;;  %v15169_v2 = vshrl.u32 %v12727_v58, 16 }
  0x42   : > { %10424 = vmatprep.mubr.msk.bf16.mxu1 %vm448_vm1, %v391_v6  ;;  %v12777_v6 = vld [vmem:[%s12550_s13 + $0x80] sm:$0xff]  }
  0x43   : > { %10833 = vmatmul.mubr.msk.bf16.gmra.mrb[16].mxu0 %vm448_vm1, %v4377_v16  ;;  %15283 = vst [vmem:[#allocation10_spill] sm:$0xff] %v12777_v6  ;;  %v407_v16 = vsel %vm315_vm2, %v402_v33, %v406_v47  ;;  %v410_v33 = vor.u32 %v15169_v2, %v406_v47  ;;  %v4384_v3 = vrot.slane %v12777_v6, 1  ;;  %v15180_v47 = vshll.u32 %v12554_v7, 16 }
  0x44   : > { %10836 = vmatprep.mubr.msk.bf16.mxu0 %vm448_vm1, %v4379_v27  ;;  %v15168_v27 = vshrl.u32 %v12747_v30, 16  ;;  %v4994_v40 = vrot.slane %v12777_v6, 2 }
  0x45   : > { %v415_v2 = vsel %vm315_vm2, %v410_v33, %v414_v26  ;;  %v4385_v1 = vsel %vm864_vm3, %v4382_v57, %v4384_v3  ;;  %v4648_v33 = vrot.slane %v15179_v56, 1 }
  0x46   : > { %v418_v0 = vor.u32 %v15168_v27, %v414_v26  ;;  %v4644_v27 = vshll.u32 %v12557_v9, 16 }
  0x48   : > { %v4646_v26 = vrot.slane %v4644_v27, 2  ;;  %v15191_v27 = vshll.u32 %v12560_v10, 16 }
  0x49   : > { %10425 = vmatmul.mubr.msk.bf16.gmra.mrb[16].mxu1 %vm448_vm1, %v399_v61  ;;  %v422_v61 = vrot.slane %v15170_v14, 1  ;;  %v15183_v14 = vshrl.u32 %v12761_v49, 16 }
  0x4a   : > { %10428 = vmatprep.mubr.msk.bf16.mxu1 %vm448_vm1, %v407_v16  ;;  %v4386_v16 = vrot.slane %v12787_v46, 1 }
  0x4b   : > { %10837 = vmatmul.mubr.msk.bf16.gmra.mrb[20].mxu0 %vm448_vm1, %v4381_v11  ;;  %v4641_v11 = vshrl.u32 %v12557_v9, 16  ;;  %v426_v57 = vor.u32 %v15183_v14, %v422_v61 }
  0x4c   : > { %10840 = vmatprep.mubr.msk.bf16.mxu0 %vm448_vm1, %v4383_v38  ;;  %v423_v38 = vsel %vm315_vm2, %v418_v0, %v422_v61  ;;  %v4387_v59 = vsel %vm864_vm3, %v4384_v3, %v4386_v16  ;;  %v4649_v0 = vrot.slane %v15180_v47, 2  ;;  %v4388_v3 = vrot.slane %v12235_v41, 1 }
  0x4d   : > { %v4643_v9 = vrot.slane %v4641_v11, 1  ;;  %v15190_v11 = vshrl.u32 %v12560_v10, 16  ;;  %v15185_v61 = vshll.u32 %v12579_v22, 16  ;;  %v431_v41 = vsel %vm315_vm2, %v426_v57, %v430_v8 }
  0x4e   : > { %v4650_v56 = vor.u32 %v4649_v0, %v4648_v33  ;;  %v15192_v47 = vshrl.u32 %v12803_v31, 16  ;;  %v15189_v0 = vshll.u32 %v12597_v32, 16  ;;  %v15188_v57 = vshrl.u32 %v12597_v32, 16 }
  0x4f   : > { %v4652_v14 = vrot.slane %v15190_v11, 1  ;;  %v4657_v33 = vrot.slane %v15185_v61, 2 }
  0x50   : > { %v4661_v61 = vrot.slane %v15189_v0, 2  ;;  %v4978_v0 = vrot.slane %v12632_v52, 2 }
  0x51   : > { %10429 = vmatmul.mubr.msk.bf16.gmra.mrb[20].mxu1 %vm448_vm1, %v415_v2  ;;  %v438_v2 = vrot.slane %v15182_v35, 1 }
  0x52   : > { %10432 = vmatprep.mubr.msk.bf16.mxu1 %vm448_vm1, %v423_v38  ;;  %v4647_v38 = vor.u32 %v4646_v26, %v4643_v9  ;;  %v4653_v9 = vrot.slane %v15191_v27, 2 }
  0x53   : > { %10841 = vmatmul.mubr.msk.bf16.gmra.mrb[24].mxu0 %vm448_vm1, %v4385_v1  ;;  %v15184_v1 = vshrl.u32 %v12579_v22, 16  ;;  %v439_v35 = vsel %vm315_vm2, %v434_v54, %v438_v2  ;;  %v442_v54 = vor.u32 %v15192_v47, %v438_v2 }
  0x54   : > { %10844 = vmatprep.mubr.msk.bf16.mxu0 %vm448_vm1, %v4387_v59  ;;  %v4389_v59 = vsel %vm864_vm3, %v4386_v16, %v4388_v3  ;;  %v4651_v26 = vsel %vm1148_vm4, %v4647_v38, %v4650_v56  ;;  %v446_v16 = vrot.slane %v444_v13, 1  ;;  %v4654_v3 = vor.u32 %v4653_v9, %v4652_v14 }
  0x55   : > { %v4656_v8 = vrot.slane %v15184_v1, 1  ;;  %v15187_v38 = vshll.u32 %v12620_v45, 16  ;;  %v4970_v13 = vrot.slane %v12560_v10, 2 }
  0x56   : > { %v447_v2 = vsel %vm315_vm2, %v442_v54, %v446_v16  ;;  %v4655_v14 = vsel %vm1148_vm4, %v4650_v56, %v4654_v3  ;;  %v4972_v56 = vrot.slane %v12579_v22, 2  ;;  %v4974_v16 = vrot.slane %v12597_v32, 2 }
  0x57   : > { %v4658_v1 = vor.u32 %v4657_v33, %v4656_v8  ;;  %v5049_v33 = vsel %vm497_vm0, %v12584_v23, 0  ;;  %v4976_v23 = vrot.slane %v12620_v45, 2 }
  0x59   : > { %10433 = vmatmul.mubr.msk.bf16.gmra.mrb[24].mxu1 %vm448_vm1, %v431_v41  ;;  %v15186_v41 = vshrl.u32 %v12620_v45, 16  ;;  %v4659_v54 = vsel %vm1148_vm4, %v4654_v3, %v4658_v1  ;;  %v12903_v3 = vsel %vm1476_vm5, %v4970_v13, %v4972_v56  ;;  %v12911_v47 = vsel %vm1476_vm5, %v4974_v16, %v4976_v23 }
  0x5a   : > { %10436 = vmatprep.mubr.msk.bf16.mxu1 %vm448_vm1, %v439_v35  ;;  %v15201_v35 = vrot.slane %v12554_v7, 2  ;;  %v15216_v45 = vshll.u32 %v12716_v51, 16 }
  0x5b   : > { %10845 = vmatmul.mubr.msk.bf16.gmra.mrb[28].mxu0 %vm448_vm1, %v4389_v59  ;;  %v4660_v59 = vrot.slane %v15188_v57, 1  ;;  %v4664_v9 = vrot.slane %v15186_v41, 1  ;;  %v15195_v41 = vshll.u32 %v12632_v52, 16  ;;  %v15197_v57 = vshll.u32 %v12654_v62, 16 }
  0x5c   : > { %10850 = vmatprep.mubr.msk.bf16.mxu0 %vm448_vm1, %v4651_v26  ;;  %v4665_v26 = vrot.slane %v15187_v38, 2  ;;  %v12882_v8 = vsel %vm1476_vm5, %v15201_v35, %v4970_v13  ;;  %v15194_v38 = vshrl.u32 %v12632_v52, 16  ;;  %v12917_v13 = vsel %vm1476_vm5, %v4976_v23, %v4978_v0 }
  0x5d   : > { %v4662_v11 = vor.u32 %v4661_v61, %v4660_v59  ;;  %v4669_v59 = vrot.slane %v15195_v41, 2  ;;  %v4986_v23 = vrot.slane %v12703_v39, 2 }
  0x5e   : > { %v4666_v27 = vor.u32 %v4665_v26, %v4664_v9  ;;  %v4668_v61 = vrot.slane %v15194_v38, 1  ;;  %v4673_v9 = vrot.slane %v15197_v57, 2  ;;  %v4984_v26 = vrot.slane %v12682_v24, 2  ;;  %v12945_v57 = vld [vmem:[%s15157_s1 + $0x6] sm:$0x3] }
  0x5f   : > { %v4663_v38 = vsel %vm1148_vm4, %v4658_v1, %v4662_v11 }
  0x60   : > { %v4667_v41 = vsel %vm1148_vm4, %v4662_v11, %v4666_v27  ;;  %v12955_v1 = vsel %vm1476_vm5, %v4984_v26, %v4986_v23  ;;  %v4988_v11 = vrot.slane %v12716_v51, 2 }
  0x61   : > { %10437 = vmatmul.mubr.msk.bf16.gmra.mrb[28].mxu1 %vm448_vm1, %v447_v2  ;;  %v12898_v2 = vld [vmem:[%s15157_s1 + $0x1e] sm:$0x3] }
  0x62   : > { %10442 = vmatprep.mubr.msk.bf16.mxu1 %vm448_vm1, %v12571_v18  ;;  %v12906_v18 = vsel %vm1476_vm5, %v4972_v56, %v4974_v16  ;;  %v12970_v35 = vsel %vm1476_vm5, %v4986_v23, %v4988_v11 }
  0x63   : > { %10851 = vmatmul.mubr.msk.bf16.vlgmr.msra.gmra.mrb[0].mxu0 %vm448_vm1, %v4655_v14  ;;  %v4980_v14 = vrot.slane %v12654_v62, 2  ;;  %v1158_v62 = vrot.slane %v324_v19, 2 }
  0x64   : > { %10883 = vmatpush3.bf16.msra.mxu0 %v5049_v33  ;;  %10854 = vmatprep.mubr.msk.bf16.mxu0 %vm448_vm1, %v4659_v54  ;;  %v4982_v33 = vrot.slane %v12671_v12, 2  ;;  %v947_v54 = vsel %vm497_vm0, %v12766_v50, 0  ;;  %v4672_v50 = vrot.slane %v15199_v44, 1  ;;  %v12985_v44 = vsel %vm1476_vm5, %v4992_v43, %v4994_v40 }
  0x65   : > { %12151 = vmatprep.subr.msk.bf16.mxu0 %vm497_vm0, %v12898_v2  ;;  %v12931_v56 = vsel %vm1476_vm5, %v4978_v0, %v4980_v14  ;;  %v12952_v0 = vld [vmem:[%s12550_s13 + $0x90] ss:$0 sps:$4 sm:$0x33]  }
  0x66   : > { %v12934_v16 = vsel %vm1476_vm5, %v4980_v14, %v4982_v33  ;;  %v12940_v55 = vsel %vm1476_vm5, %v4982_v33, %v4984_v26  ;;  %v4990_v14 = vrot.slane %v12740_v25, 2  ;;  %v1162_v33 = vrot.slane %v332_v29, 2 }
  0x67   : > { %v4674_v23 = vor.u32 %v4673_v9, %v4672_v50  ;;  %v4998_v26 = vrot.slane %v12952_v0, 2 }
  0x68   : > { %v12973_v29 = vsel %vm1476_vm5, %v4988_v11, %v4990_v14  ;;  %v12982_v20 = vsel %vm1476_vm5, %v4990_v14, %v4992_v43  ;;  %v4996_v11 = vrot.slane %v12787_v46, 2  ;;  %v15288_v14 = vshrl.u32 %v12682_v24, 16 }
  0x69   : > { %10443 = vmatmul.mubr.msk.bf16.vlgmr.msra.gmra.mrb[0].mxu1 %vm448_vm1, %v12567_v15 }
  0x6a   : > { %10446 = vmatprep.mubr.msk.bf16.mxu1 %vm448_vm1, %v12576_v21  ;;  %10475 = vmatpush3.bf16.msra.mxu1 %v947_v54  ;;  %v4670_v21 = vor.u32 %v4669_v59, %v4668_v61  ;;  %v15285_v59 = vshrl.u32 %v12671_v12, 16  ;;  %v12997_v9 = vsel %vm1476_vm5, %v4994_v40, %v4996_v11  ;;  %v13000_v43 = vsel %vm1476_vm5, %v4996_v11, %v4998_v26 }
  0x6b   : > { %10855 = vmatmul.mubr.msk.bf16.gmra.mrb[4].mxu0 %vm448_vm1, %v4663_v38  ;;  %12139 = vmatprep.subr.msk.bf16.mxu1 %vm497_vm0, %v12945_v57  ;;  %v15286_v54 = vshll.u32 %v12671_v12, 16  ;;  %v4680_v40 = vrot.slane %v15288_v14, 1  ;;  %v15289_v61 = vshrl.u32 %v12567_v15, 16  ;;  %v13014_v11 = vor.u32 %v1162_v33, %v1161_v42 }
  0x6c   : > { %10858 = vmatprep.mubr.msk.bf16.mxu0 %vm448_vm1, %v4667_v41  ;;  %v4676_v38 = vrot.slane %v15285_v59, 1  ;;  %v4671_v50 = vsel %vm1148_vm4, %v4666_v27, %v4670_v21  ;;  %v15287_v41 = vshll.u32 %v12682_v24, 16  ;;  %v4675_v59 = vsel %vm1148_vm4, %v4670_v21, %v4674_v23 }
  0x6d   : > { %v4677_v19 = vrot.slane %v15286_v54, 2  ;;  %v1157_v26 = vrot.slane %v15289_v61, 1  ;;  %v15290_v27 = vshrl.u32 %v12703_v39, 16  ;;  %v15292_v21 = vshrl.u32 %v12716_v51, 16 }
  0x6e   : > { %v4681_v52 = vrot.slane %v15287_v41, 2  ;;  %v15291_v41 = vshll.u32 %v12703_v39, 16  ;;  %v15214_v15 = vshll.u32 %v12740_v25, 16  ;;  %v15213_v61 = vshrl.u32 %v12740_v25, 16 }
  0x6f   : > { %v4684_v54 = vrot.slane %v15290_v27, 1  ;;  %v4688_v14 = vrot.slane %v15292_v21, 1  ;;  %v13027_v42 = vor.u32 %v1158_v62, %v1157_v26  ;;  %v4678_v33 = vor.u32 %v4677_v19, %v4676_v38 }
  0x70   : > { %v4685_v12 = vrot.slane %v15291_v41, 2  ;;  %v15215_v27 = vshll.u32 %v12750_v34, 16  ;;  %v4682_v39 = vor.u32 %v4681_v52, %v4680_v40  ;;  %v4689_v38 = vrot.slane %v15216_v45, 2 }
  0x71   : > { %10447 = vmatmul.mubr.msk.bf16.gmra.mrb[4].mxu1 %vm448_vm1, %v12605_v36  ;;  %v13035_v41 = vsel %vm1148_vm4, %v13027_v42, %v13014_v11  ;;  %v4692_v19 = vrot.slane %v15213_v61, 1  ;;  %v4693_v52 = vrot.slane %v15214_v15, 2  ;;  %v15221_v40 = vshll.u32 %v12777_v6, 16 }
  0x72   : > { %10450 = vmatprep.mubr.msk.bf16.mxu1 %vm448_vm1, %v12608_v37  ;;  %v4683_v62 = vsel %vm1148_vm4, %v4678_v33, %v4682_v39  ;;  %v15217_v26 = vshrl.u32 %v12777_v6, 16  ;;  %v4686_v21 = vor.u32 %v4685_v12, %v4684_v54  ;;  %v15220_v45 = vshll.u32 %v12787_v46, 16 }
  0x73   : > { %10859 = vmatmul.mubr.msk.bf16.gmra.mrb[8].mxu0 %vm448_vm1, %v4671_v50  ;;  %v4679_v50 = vsel %vm1148_vm4, %v4674_v23, %v4678_v33  ;;  %v15218_v23 = vshrl.u32 %v12750_v34, 16  ;;  %v4690_v33 = vor.u32 %v4689_v38, %v4688_v14  ;;  %v4709_v54 = vshrl.u32 %v12952_v0, 16 }
  0x74   : > { %10862 = vmatprep.mubr.msk.bf16.mxu0 %vm448_vm1, %v4675_v59  ;;  %v4697_v59 = vrot.slane %v15215_v27, 2  ;;  %v4687_v61 = vsel %vm1148_vm4, %v4682_v39, %v4686_v21  ;;  %v4701_v27 = vrot.slane %v15221_v40, 2  ;;  %v4700_v12 = vrot.slane %v15217_v26, 1 }
  0x75   : > { %v4696_v15 = vrot.slane %v15218_v23, 1  ;;  %v15219_v39 = vshrl.u32 %v12787_v46, 16  ;;  %v4712_v14 = vshll.u32 %v12952_v0, 16  ;;  %v4705_v23 = vrot.slane %v15220_v45, 2 }
  0x76   : > { %v4711_v0 = vrot.slane %v4709_v54, 1 }
  0x77   : > { %v4698_v38 = vor.u32 %v4697_v59, %v4696_v15  ;;  %v4704_v26 = vrot.slane %v15219_v39, 1  ;;  %v4714_v15 = vrot.slane %v4712_v14, 2  ;;  %v858_v14 = vld [vmem:[%s12550_s13] sm:$0xe] }
  0x79   : > { %10451 = vmatmul.mubr.msk.bf16.gmra.mrb[8].mxu1 %vm448_vm1, %v12635_v53  ;;  %v4706_v59 = vor.u32 %v4705_v23, %v4704_v26  ;;  %v13098_v23 = vld [vmem:[%s12550_s13 + $0x4] sm:$0xf] }
  0x7a   : > { %10454 = vmatprep.mubr.msk.bf16.mxu1 %vm448_vm1, %v12647_v60  ;;  %v13101_v26 = vcombine.low %v858_v14, %v13098_v23  ;;  %v1275_v14 = vsel %vm497_vm0, %v12945_v57, 0  ;;  %v13161_v57 = vld [vmem:[%s12550_s13 + $0x28] sm:$0xff]  }
  0x7b   : > { %10863 = vmatmul.mubr.msk.bf16.gmra.mrb[12].mxu0 %vm448_vm1, %v4679_v50  ;;  %v4691_v50 = vsel %vm1148_vm4, %v4686_v21, %v4690_v33 }
  0x7c   : > { %10866 = vmatprep.mubr.msk.bf16.mxu0 %vm448_vm1, %v4683_v62  ;;  %v4694_v62 = vor.u32 %v4693_v52, %v4692_v19  ;;  %v4961_v19 = vld [vmem:[%s12550_s13 + $0x10] sm:$0xc]  ;;  %v4702_v52 = vor.u32 %v4701_v27, %v4700_v12  ;;  %v4715_v27 = vor.u32 %v4714_v15, %v4711_v0 }
  0x7e   : > { %v4695_v21 = vsel %vm1148_vm4, %v4690_v33, %v4694_v62  ;;  %v12368_v33 = vld [vmem:[%s12550_s13 + $0x14] sm:$0xf]  ;;  %v4707_v39 = vsel %vm1148_vm4, %v4702_v52, %v4706_v59  ;;  %v4716_v12 = vsel %vm1148_vm4, %v4706_v59, %v4715_v27 }
  0x81   : > { %10455 = vmatmul.mubr.msk.bf16.gmra.mrb[12].mxu1 %vm448_vm1, %v12665_v5 }
  0x82   : > { %10458 = vmatprep.mubr.msk.bf16.mxu1 %vm448_vm1, %v12679_v17 }
  0x83   : > { %10867 = vmatmul.mubr.msk.bf16.gmra.mrb[16].mxu0 %vm448_vm1, %v4687_v61  ;;  %v4699_v61 = vsel %vm1148_vm4, %v4694_v62, %v4698_v38  ;;  %v4703_v62 = vsel %vm1148_vm4, %v4698_v38, %v4702_v52  ;;  %v15293_v38 = vrot.slane %v12554_v7, 2  ;;  %v13125_v52 = vld [vmem:[%s12550_s13 + $0x10] sm:$0xff]  }
  0x84   : > { %10870 = vmatprep.mubr.msk.bf16.mxu0 %vm448_vm1, %v4691_v50  ;;  %v9671_v50 = vcombine.low %v4961_v19, %v12368_v33  ;;  %v5407_v19 = vsel %vm497_vm0, %v12898_v2, 0  ;;  %v868_v59 = vrot.slane %v13125_v52, 1  ;;  %v13131_v33 = vld [vmem:[%s15157_s1 + $0x20] sm:$0x3] }
  0x86   : > { %v4967_v54 = vrot.slane %v9671_v50, 2  ;;  %v13136_v50 = vld [vmem:[%s12550_s13 + $0x18] sm:$0xff]  }
  0x87   : > { %v870_v2 = vrot.slane %v13136_v50, 1 }
  0x89   : > { %10459 = vmatmul.mubr.msk.bf16.gmra.mrb[16].mxu1 %vm448_vm1, %v12693_v28 }
  0x8a   : > { %10462 = vmatprep.mubr.msk.bf16.mxu1 %vm448_vm1, %v12709_v48 }
  0x8b   : > { %10871 = vmatmul.mubr.msk.bf16.gmra.mrb[20].mxu0 %vm448_vm1, %v4695_v21  ;;  %v4969_v21 = vsel %vm1476_vm5, %v4967_v54, %v15293_v38  ;;  %v871_v54 = vsel %vm864_vm3, %v868_v59, %v870_v2 }
  0x8c   : > { %10874 = vmatprep.mubr.msk.bf16.mxu0 %vm448_vm1, %v4699_v61  ;;  %v13114_v61 = vld [vmem:[%s12550_s13 + $0x8] sm:$0xff]  }
  0x8d   : > { %v866_v0 = vrot.slane %v13114_v61, 1 }
  0x91   : > { %10463 = vmatmul.mubr.msk.bf16.gmra.mrb[20].mxu1 %vm448_vm1, %v12727_v58 }
  0x92   : > { %10466 = vmatprep.mubr.msk.bf16.mxu1 %vm448_vm1, %v12747_v30 }
  0x93   : > { %10875 = vmatmul.mubr.msk.bf16.gmra.mrb[24].mxu0 %vm448_vm1, %v4703_v62  ;;  %v869_v62 = vsel %vm864_vm3, %v866_v0, %v868_v59  ;;  %v13189_v59 = vld [vmem:[%s12550_s13 + $0x40] sm:$0xff]  }
  0x94   : > { %10878 = vmatprep.mubr.msk.bf16.mxu0 %vm448_vm1, %v4707_v39  ;;  %v865_v39 = vrot.slane %v13101_v26, 1 }
  0x96   : > { %v867_v15 = vsel %vm864_vm3, %v865_v39, %v866_v0  ;;  %v13179_v0 = vld [vmem:[%s12550_s13 + $0x38] sm:$0xff]  }
  0x99   : > { %10467 = vmatmul.mubr.msk.bf16.gmra.mrb[24].mxu1 %vm448_vm1, %v12761_v49 }
  0x9a   : > { %10470 = vmatprep.mubr.msk.bf16.mxu1 %vm448_vm1, %v12783_v63 }
  0x9b   : > { %10879 = vmatmul.mubr.msk.bf16.gmra.mrb[28].mxu0 %vm448_vm1, %v4716_v12  ;;  %v874_v12 = vrot.slane %v13161_v57, 1 }
  0x9c   : > { %10884 = vmatprep.mubr.msk.bf16.mxu0 %vm448_vm1, %v4969_v21 }
  0xa1   : > { %10471 = vmatmul.mubr.msk.bf16.gmra.mrb[28].mxu1 %vm448_vm1, %v12803_v31 }
  0xa2   : > { %10476 = vmatprep.mubr.msk.bf16.mxu1 %vm448_vm1, %v867_v15 }
  0xa3   : > { %10885 = vmatmul.mubr.msk.bf16.vlgmr.msra.gmra.mrb[0].mxu0 %vm448_vm1, %v12882_v8  ;;  %v13150_v8 = vld [vmem:[%s15157_s1 + $0x8] sm:$0x3] }
  0xa4   : > { %10917 = vmatpush3.bf16.msra.mxu0 %v5407_v19  ;;  %10888 = vmatprep.mubr.msk.bf16.mxu0 %vm448_vm1, %v12903_v3  ;;  %v13155_v3 = vld [vmem:[%s12550_s13 + $0x20] sm:$0xff]  }
  0xa5   : > { %12152 = vmatprep.subr.msk.bf16.mxu0 %vm497_vm0, %v13131_v33  ;;  %v872_v27 = vrot.slane %v13155_v3, 1 }
  0xa7   : > { %v873_v38 = vsel %vm864_vm3, %v870_v2, %v872_v27  ;;  %v875_v21 = vsel %vm864_vm3, %v872_v27, %v874_v12  ;;  %v13195_v2 = vld [vmem:[%s12550_s13 + $0x48] sm:$0xff]   ;;  %v13211_v27 = vld [vmem:[%s12550_s13 + $0x58] sm:$0xff]  }
  0xa9   : > { %10477 = vmatmul.mubr.msk.bf16.vlgmr.msra.gmra.mrb[0].mxu1 %vm448_vm1, %v869_v62 }
  0xaa   : > { %10480 = vmatprep.mubr.msk.bf16.mxu1 %vm448_vm1, %v871_v54  ;;  %10509 = vmatpush3.bf16.msra.mxu1 %v1275_v14  ;;  %v13205_v14 = vld [vmem:[%s12550_s13 + $0x50] sm:$0xff]  }
  0xab   : > { %10889 = vmatmul.mubr.msk.bf16.gmra.mrb[4].mxu0 %vm448_vm1, %v12906_v18  ;;  %12140 = vmatprep.subr.msk.bf16.mxu1 %vm497_vm0, %v13150_v8  ;;  %v13173_v18 = vld [vmem:[%s12550_s13 + $0x30] sm:$0xff]  }
  0xac   : > { %10892 = vmatprep.mubr.msk.bf16.mxu0 %vm448_vm1, %v12911_v47  ;;  %v876_v39 = vrot.slane %v13173_v18, 1  ;;  %v878_v47 = vrot.slane %v13179_v0, 1 }
  0xae   : > { %v877_v15 = vsel %vm864_vm3, %v874_v12, %v876_v39  ;;  %v879_v19 = vsel %vm864_vm3, %v876_v39, %v878_v47  ;;  %v13227_v39 = vld [vmem:[%s12550_s13 + $0x68] sm:$0xff]  }
  0xb1   : > { %10481 = vmatmul.mubr.msk.bf16.gmra.mrb[4].mxu1 %vm448_vm1, %v873_v38 }
  0xb2   : > { %10484 = vmatprep.mubr.msk.bf16.mxu1 %vm448_vm1, %v875_v21  ;;  %v13221_v21 = vld [vmem:[%s12550_s13 + $0x60] sm:$0xff]  }
  0xb3   : > { %10893 = vmatmul.mubr.msk.bf16.gmra.mrb[8].mxu0 %vm448_vm1, %v12917_v13  ;;  %v880_v13 = vrot.slane %v13189_v59, 1 }
  0xb4   : > { %10896 = vmatprep.mubr.msk.bf16.mxu0 %vm448_vm1, %v12931_v56  ;;  %v882_v56 = vrot.slane %v13195_v2, 1 }
  0xb5   : > { %v881_v62 = vsel %vm864_vm3, %v878_v47, %v880_v13  ;;  %v890_v47 = vrot.slane %v13227_v39, 1 }
  0xb6   : > { %v883_v54 = vsel %vm864_vm3, %v880_v13, %v882_v56  ;;  %v894_v13 = vrot.slane %v12803_v31, 1 }
  0xb9   : > { %10485 = vmatmul.mubr.msk.bf16.gmra.mrb[8].mxu1 %vm448_vm1, %v877_v15 }
  0xba   : > { %10488 = vmatprep.mubr.msk.bf16.mxu1 %vm448_vm1, %v879_v19  ;;  %v13237_v19 = vld [vmem:[%s12550_s13 + $0x70] sm:$0xff]  }
  0xbb   : > { %10897 = vmatmul.mubr.msk.bf16.gmra.mrb[12].mxu0 %vm448_vm1, %v12934_v16  ;;  %v884_v16 = vrot.slane %v13205_v14, 1 }
  0xbc   : > { %10900 = vmatprep.mubr.msk.bf16.mxu0 %vm448_vm1, %v12940_v55  ;;  %v886_v55 = vrot.slane %v13211_v27, 1 }
  0xbd   : > { %v885_v12 = vsel %vm864_vm3, %v882_v56, %v884_v16  ;;  %v1153_v56 = vshll.u32 %v13101_v26, 16 }
  0xbe   : > { %v887_v38 = vsel %vm864_vm3, %v884_v16, %v886_v55 }
  0xc1   : > { %10489 = vmatmul.mubr.msk.bf16.gmra.mrb[12].mxu1 %vm448_vm1, %v881_v62 }
  0xc2   : > { %10492 = vmatprep.mubr.msk.bf16.mxu1 %vm448_vm1, %v883_v54 }
  0xc3   : > { %10901 = vmatmul.mubr.msk.bf16.gmra.mrb[16].mxu0 %vm448_vm1, %v12955_v1  ;;  %v888_v1 = vrot.slane %v13221_v21, 1 }
  0xc4   : > { %10904 = vmatprep.mubr.msk.bf16.mxu0 %vm448_vm1, %v12970_v35 }
  0xc5   : > { %v889_v35 = vsel %vm864_vm3, %v886_v55, %v888_v1  ;;  %v891_v15 = vsel %vm864_vm3, %v888_v1, %v890_v47  ;;  %v1155_v55 = vrot.slane %v1153_v56, 2 }
  0xc9   : > { %10493 = vmatmul.mubr.msk.bf16.gmra.mrb[16].mxu1 %vm448_vm1, %v885_v12  ;;  %v12241_v12 = vld [vmem:[%s12550_s13 + $0x18] sm:$0xff]  }
  0xca   : > { %10496 = vmatprep.mubr.msk.bf16.mxu1 %vm448_vm1, %v887_v38  ;;  %v12242_v38 = vld [vmem:[%s12550_s13 + $0x20] sm:$0xff]  }
  0xcb   : > { %10905 = vmatmul.mubr.msk.bf16.gmra.mrb[20].mxu0 %vm448_vm1, %v12973_v29  ;;  %v892_v29 = vrot.slane %v13237_v19, 1 }
  0xcc   : > { %10908 = vmatprep.mubr.msk.bf16.mxu0 %vm448_vm1, %v12982_v20  ;;  %v1150_v20 = vshrl.u32 %v13101_v26, 16 }
  0xcd   : > { %v893_v62 = vsel %vm864_vm3, %v890_v47, %v892_v29  ;;  %v895_v54 = vsel %vm864_vm3, %v892_v29, %v894_v13  ;;  %v15294_v47 = vshrl.u32 %v12605_v36, 16 }
  0xce   : > { %v1152_v16 = vrot.slane %v1150_v20, 1 }
  0xd0   : > { %v1156_v26 = vor.u32 %v1155_v55, %v1152_v16  ;;  %v15298_v16 = vshrl.u32 %v12635_v53, 16 }
  0xd1   : > { %10497 = vmatmul.mubr.msk.bf16.gmra.mrb[20].mxu1 %vm448_vm1, %v889_v35  ;;  %v1165_v35 = vrot.slane %v15294_v47, 1  ;;  %v15301_v47 = vshll.u32 %v12647_v60, 16 }
  0xd2   : > { %10500 = vmatprep.mubr.msk.bf16.mxu1 %vm448_vm1, %v891_v15  ;;  %v1160_v1 = vsel %vm1148_vm4, %v1156_v26, %v13027_v42  ;;  %v15295_v15 = vshll.u32 %v12605_v36, 16  ;;  %v15296_v36 = vshrl.u32 %v12608_v37, 16  ;;  %v1173_v55 = vrot.slane %v15298_v16, 1  ;;  %v12248_v16 = vld [vmem:[%s12550_s13 + $0x50] sm:$0xff]  }
  0xd3   : > { %10909 = vmatmul.mubr.msk.bf16.gmra.mrb[24].mxu0 %vm448_vm1, %v12985_v44  ;;  %v896_v44 = vrot.slane %v12823_v4, 1  ;;  %v12243_v4 = vld [vmem:[%s12550_s13 + $0x28] sm:$0xff]   ;;  %v1559_v26 = vsel %vm497_vm0, %v13150_v8, 0 }
  0xd4   : > { %10912 = vmatprep.mubr.msk.bf16.mxu0 %vm448_vm1, %v12997_v9  ;;  %v1166_v29 = vrot.slane %v15295_v15, 2  ;;  %v1169_v20 = vrot.slane %v15296_v36, 1 }
  0xd5   : > { %v897_v9 = vsel %vm864_vm3, %v894_v13, %v896_v44  ;;  %v13272_v13 = vld [vmem:[%s15157_s1 + $0x22] sm:$0x3] }
  0xd6   : > { %v1167_v42 = vor.u32 %v1166_v29, %v1165_v35  ;;  %v12246_v35 = vld [vmem:[%s12550_s13 + $0x40] sm:$0xff]   ;;  %v15302_v29 = vshrl.u32 %v12665_v5, 16 }
  0xd9   : > { %10501 = vmatmul.mubr.msk.bf16.gmra.mrb[24].mxu1 %vm448_vm1, %v893_v62  ;;  %v12244_v62 = vld [vmem:[%s12550_s13 + $0x30] sm:$0xff]  }
  0xda   : > { %10504 = vmatprep.mubr.msk.bf16.mxu1 %vm448_vm1, %v895_v54  ;;  %v1168_v54 = vsel %vm1148_vm4, %v13014_v11, %v1167_v42 }
  0xdb   : > { %10913 = vmatmul.mubr.msk.bf16.gmra.mrb[28].mxu0 %vm448_vm1, %v13000_v43  ;;  %v5901_v43 = vsel %vm497_vm0, %v13131_v33, 0  ;;  %v15297_v33 = vshll.u32 %v12608_v37, 16  ;;  %v13295_v37 = vld [vmem:[%s15157_s1 + $0xa] sm:$0x3] }
  0xdc   : > { %10918 = vmatprep.mubr.msk.bf16.mxu0 %vm448_vm1, %v12241_v12  ;;  %v15299_v12 = vshll.u32 %v12635_v53, 16 }
  0xdd   : > { %v1170_v56 = vrot.slane %v15297_v33, 2 }
  0xde   : > { %v1174_v44 = vrot.slane %v15299_v12, 2  ;;  %v15306_v12 = vshrl.u32 %v12693_v28, 16 }
  0xdf   : > { %v1171_v11 = vor.u32 %v1170_v56, %v1169_v20  ;;  %v12247_v20 = vld [vmem:[%s12550_s13 + $0x48] sm:$0xff]   ;;  %v15304_v56 = vshrl.u32 %v12679_v17, 16 }
  0xe0   : > { %v1175_v53 = vor.u32 %v1174_v44, %v1173_v55  ;;  %v1189_v44 = vrot.slane %v15306_v12, 1 }
  0xe1   : > { %10505 = vmatmul.mubr.msk.bf16.gmra.mrb[28].mxu1 %vm448_vm1, %v897_v9  ;;  %v12245_v9 = vld [vmem:[%s12550_s13 + $0x38] sm:$0xff]   ;;  %v1172_v8 = vsel %vm1148_vm4, %v1167_v42, %v1171_v11 }
  0xe2   : > { %10510 = vmatprep.mubr.msk.bf16.mxu1 %vm448_vm1, %v1160_v1  ;;  %v1176_v15 = vsel %vm1148_vm4, %v1171_v11, %v1175_v53  ;;  %v12249_v11 = vld [vmem:[%s12550_s13 + $0x58] sm:$0xff]  }
  0xe3   : > { %10919 = vmatmul.mubr.msk.bf16.vlgmr.msra.gmra.mrb[0].mxu0 %vm448_vm1, %v12242_v38  ;;  %v15300_v38 = vshrl.u32 %v12647_v60, 16 }
  0xe4   : > { %10951 = vmatpush3.bf16.msra.mxu0 %v5901_v43  ;;  %10922 = vmatprep.mubr.msk.bf16.mxu0 %vm448_vm1, %v12243_v4  ;;  %v1181_v4 = vrot.slane %v15302_v29, 1  ;;  %v15303_v43 = vshll.u32 %v12665_v5, 16  ;;  %v15305_v5 = vshll.u32 %v12679_v17, 16 }
  0xe5   : > { %12153 = vmatprep.subr.msk.bf16.mxu0 %vm497_vm0, %v13272_v13  ;;  %v1177_v1 = vrot.slane %v15300_v38, 1  ;;  %v15308_v38 = vshrl.u32 %v12709_v48, 16 }
  0xe6   : > { %v1182_v36 = vrot.slane %v15303_v43, 2 }
  0xe8   : > { %v1183_v60 = vor.u32 %v1182_v36, %v1181_v4  ;;  %v15311_v4 = vshll.u32 %v12727_v58, 16  ;;  %v12251_v36 = vld [vmem:[%s12550_s13 + $0x68] sm:$0xff]  }
  0xe9   : > { %10511 = vmatmul.mubr.msk.bf16.vlgmr.msra.gmra.mrb[0].mxu1 %vm448_vm1, %v13035_v41  ;;  %v1178_v41 = vrot.slane %v15301_v47, 2 }
  0xea   : > { %10514 = vmatprep.mubr.msk.bf16.mxu1 %vm448_vm1, %v1168_v54  ;;  %10543 = vmatpush3.bf16.msra.mxu1 %v1559_v26  ;;  %v1186_v54 = vrot.slane %v15305_v5, 2  ;;  %v15307_v26 = vshll.u32 %v12693_v28, 16  ;;  %v15309_v28 = vshll.u32 %v12709_v48, 16  ;;  %v1198_v43 = vrot.slane %v15311_v4, 2  ;;  %v13359_v5 = vld [vmem:[%s12550_s13 + $0x1c] sm:$0xf] }
  0xeb   : > { %10923 = vmatmul.mubr.msk.bf16.gmra.mrb[4].mxu0 %vm448_vm1, %v12244_v62  ;;  %12141 = vmatprep.subr.msk.bf16.mxu1 %vm497_vm0, %v13295_v37  ;;  %v1179_v42 = vor.u32 %v1178_v41, %v1177_v1  ;;  %v1185_v62 = vrot.slane %v15304_v56, 1  ;;  %v1193_v1 = vrot.slane %v15308_v38, 1  ;;  %v12250_v41 = vld [vmem:[%s12550_s13 + $0x60] sm:$0xff]   ;;  %v15316_v38 = vshrl.u32 %v12783_v63, 16 }
  0xec   : > { %10926 = vmatprep.mubr.msk.bf16.mxu0 %vm448_vm1, %v12245_v9  ;;  %v1190_v9 = vrot.slane %v15307_v26, 2  ;;  %v1194_v47 = vrot.slane %v15309_v28, 2  ;;  %v15317_v28 = vshll.u32 %v12783_v63, 16 }
  0xed   : > { %v1180_v33 = vsel %vm1148_vm4, %v1175_v53, %v1179_v42  ;;  %v1184_v55 = vsel %vm1148_vm4, %v1179_v42, %v1183_v60  ;;  %v1187_v53 = vor.u32 %v1186_v54, %v1185_v62  ;;  %v5602_v62 = vld [vmem:[%s12550_s13 + $0x18] sm:$0xf]  ;;  %v12252_v54 = vld [vmem:[%s12550_s13 + $0x70] sm:$0xff]  }
  0xee   : > { %v1191_v17 = vor.u32 %v1190_v9, %v1189_v44  ;;  %v1195_v48 = vor.u32 %v1194_v47, %v1193_v1  ;;  %v15315_v44 = vshll.u32 %v12761_v49, 16  ;;  %v12253_v9 = vld [vmem:[%s12550_s13 + $0x78] sm:$0xff]   ;;  %v1209_v1 = vrot.slane %v15316_v38, 1 }
  0xef   : > { %v1210_v47 = vrot.slane %v15317_v28, 2 }
  0xf0   : > { %v1196_v42 = vsel %vm1148_vm4, %v1191_v17, %v1195_v48  ;;  %v1206_v26 = vrot.slane %v15315_v44, 2 }
  0xf1   : > { %10515 = vmatmul.mubr.msk.bf16.gmra.mrb[4].mxu1 %vm448_vm1, %v1172_v8  ;;  %v1188_v8 = vsel %vm1148_vm4, %v1183_v60, %v1187_v53  ;;  %v15312_v60 = vshrl.u32 %v12747_v30, 16 }
  0xf2   : > { %10518 = vmatprep.mubr.msk.bf16.mxu1 %vm448_vm1, %v1176_v15  ;;  %v15310_v15 = vshrl.u32 %v12727_v58, 16  ;;  %v15313_v58 = vshll.u32 %v12747_v30, 16  ;;  %v9722_v30 = vcombine.low %v5602_v62, %v13359_v5  ;;  %v1470_v62 = vld [vmem:[%s12550_s13] sm:$0xc] }
  0xf3   : > { %10927 = vmatmul.mubr.msk.bf16.gmra.mrb[8].mxu0 %vm448_vm1, %v12246_v35  ;;  %v1192_v35 = vsel %vm1148_vm4, %v1187_v53, %v1191_v17  ;;  %v13374_v17 = vld [vmem:[%s12550_s13 + $0x20] sm:$0xff]  }
  0xf4   : > { %10930 = vmatprep.mubr.msk.bf16.mxu0 %vm448_vm1, %v12247_v20  ;;  %v1197_v29 = vrot.slane %v15310_v15, 1  ;;  %v1202_v56 = vrot.slane %v15313_v58, 2 }
  0xf6   : > { %v1199_v20 = vor.u32 %v1198_v43, %v1197_v29  ;;  %v15318_v29 = vshrl.u32 %v12803_v31, 16  ;;  %v15319_v43 = vshll.u32 %v12803_v31, 16 }
  0xf8   : > { %v1213_v4 = vrot.slane %v15318_v29, 1 }
  0xf9   : > { %10519 = vmatmul.mubr.msk.bf16.gmra.mrb[8].mxu1 %vm448_vm1, %v1180_v33  ;;  %v1201_v33 = vrot.slane %v15312_v60, 1  ;;  %v1211_v60 = vor.u32 %v1210_v47, %v1209_v1 }
  0xfa   : > { %10522 = vmatprep.mubr.msk.bf16.mxu1 %vm448_vm1, %v1184_v55  ;;  %v15314_v55 = vshrl.u32 %v12761_v49, 16 }
  0xfb   : > { %10931 = vmatmul.mubr.msk.bf16.gmra.mrb[12].mxu0 %vm448_vm1, %v12248_v16  ;;  %v1200_v16 = vsel %vm1148_vm4, %v1195_v48, %v1199_v20  ;;  %v12255_v48 = vld [vmem:[%s12550_s13 + $0x88] sm:$0xff]  }
  0xfc   : > { %10934 = vmatprep.mubr.msk.bf16.mxu0 %vm448_vm1, %v12249_v11  ;;  %v1205_v12 = vrot.slane %v15314_v55, 1  ;;  %v1203_v11 = vor.u32 %v1202_v56, %v1201_v33  ;;  %v13398_v56 = vld [vmem:[%s12550_s13 + $0x28] sm:$0xff]   ;;  %v13405_v55 = vld [vmem:[%s12550_s13 + $0x30] sm:$0xff]  }
  0xfd   : > { %v5740_v1 = vshrl.u32 %v13398_v56, 16 }
  0xfe   : > { %v1207_v53 = vor.u32 %v1206_v26, %v1205_v12  ;;  %v1204_v49 = vsel %vm1148_vm4, %v1199_v20, %v1203_v11  ;;  %v5721_v20 = vshrl.u32 %v9722_v30, 16 }
 0x100   : > { %v1208_v15 = vsel %vm1148_vm4, %v1203_v11, %v1207_v53  ;;  %v1212_v12 = vsel %vm1148_vm4, %v1207_v53, %v1211_v60  ;;  %v5736_v11 = vshll.u32 %v13398_v56, 16  ;;  %v5744_v53 = vshll.u32 %v13405_v55, 16 }
 0x101   : > { %10523 = vmatmul.mubr.msk.bf16.gmra.mrb[12].mxu1 %vm448_vm1, %v1188_v8  ;;  %v5723_v8 = vshll.u32 %v9722_v30, 16 }
 0x102   : > { %10526 = vmatprep.mubr.msk.bf16.mxu1 %vm448_vm1, %v1192_v35  ;;  %v12254_v35 = vld [vmem:[%s12550_s13 + $0x80] sm:$0xff]   ;;  %v5738_v47 = vrot.slane %v5736_v11, 1 }
 0x103   : > { %10935 = vmatmul.mubr.msk.bf16.gmra.mrb[16].mxu0 %vm448_vm1, %v12250_v41  ;;  %v13382_v41 = vld [vmem:[%s12550_s13 + $0x80] ss:$0 sps:$4 sm:$0x33]   ;;  %v5725_v63 = vrot.slane %v5723_v8, 1  ;;  %v9429_v8 = vcombine.low %v1470_v62, %v13098_v23 }
 0x104   : > { %10938 = vmatprep.mubr.msk.bf16.mxu0 %vm448_vm1, %v12251_v36  ;;  %v1214_v36 = vrot.slane %v15319_v43, 2  ;;  %v1218_v33 = vshrl.u32 %v13382_v41, 16  ;;  %v1221_v58 = vshll.u32 %v13382_v41, 16  ;;  %v5746_v43 = vrot.slane %v5744_v53, 1 }
 0x105   : > { %v1477_v23 = vrot.slane %v9429_v8, 2 }
 0x106   : > { %v1215_v31 = vor.u32 %v1214_v36, %v1213_v4  ;;  %v1220_v44 = vrot.slane %v1218_v33, 1  ;;  %v1223_v26 = vrot.slane %v1221_v58, 2  ;;  %v5742_v4 = vor.u32 %v5740_v1, %v5738_v47  ;;  %v13433_v36 = vld [vmem:[%s12550_s13 + $0x40] sm:$0xff]  }
 0x107   : > { %v6184_v33 = vsel %vm497_vm0, %v13272_v13, 0 }
 0x108   : > { %v1216_v30 = vsel %vm1148_vm4, %v1211_v60, %v1215_v31  ;;  %v1224_v28 = vor.u32 %v1223_v26, %v1220_v44  ;;  %v5748_v60 = vshrl.u32 %v13405_v55, 16  ;;  %v5747_v58 = vsel %vm315_vm2, %v5742_v4, %v5746_v43  ;;  %v13458_v44 = vld [vmem:[%s12550_s13 + $0x48] sm:$0xff]  }
 0x109   : > { %10527 = vmatmul.mubr.msk.bf16.gmra.mrb[16].mxu1 %vm448_vm1, %v1196_v42  ;;  %v5728_v42 = vshll.u32 %v13374_v17, 16  ;;  %v5772_v4 = vshrl.u32 %v13458_v44, 16 }
 0x10a   : > { %10530 = vmatprep.mubr.msk.bf16.mxu1 %vm448_vm1, %v1200_v16 }
 0x10b   : > { %10939 = vmatmul.mubr.msk.bf16.gmra.mrb[20].mxu0 %vm448_vm1, %v12252_v54  ;;  %v5726_v54 = vor.u32 %v5725_v63, %v5721_v20  ;;  %v5730_v16 = vrot.slane %v5728_v42, 1 }
 0x10c   : > { %10942 = vmatprep.mubr.msk.bf16.mxu0 %vm448_vm1, %v12253_v9  ;;  %v12256_v9 = vld [vmem:[%s12550_s13 + $0x90] sm:$0xff]  }
 0x10d   : > { %v5731_v38 = vsel %vm315_vm2, %v5726_v54, %v5730_v16  ;;  %v1480_v54 = vrot.slane %v13125_v52, 2  ;;  %v5750_v52 = vor.u32 %v5748_v60, %v5746_v43 }
 0x111   : > { %10531 = vmatmul.mubr.msk.bf16.gmra.mrb[20].mxu1 %vm448_vm1, %v1204_v49  ;;  %v5732_v49 = vshrl.u32 %v13374_v17, 16 }
 0x112   : > { %10534 = vmatprep.mubr.msk.bf16.mxu1 %vm448_vm1, %v1208_v15  ;;  %v13423_v15 = vld [vmem:[%s12550_s13 + $0x38] sm:$0xff]  }
 0x113   : > { %10943 = vmatmul.mubr.msk.bf16.gmra.mrb[24].mxu0 %vm448_vm1, %v12254_v35  ;;  %v1478_v35 = vrot.slane %v13114_v61, 2  ;;  %v5734_v29 = vor.u32 %v5732_v49, %v5730_v16  ;;  %v5752_v20 = vshll.u32 %v13423_v15, 16  ;;  %v5756_v62 = vshrl.u32 %v13423_v15, 16  ;;  %v13451_v16 = vld [vmem:[%s15157_s1 + $0x24] sm:$0x3] }
 0x114   : > { %10946 = vmatprep.mubr.msk.bf16.mxu0 %vm448_vm1, %v12255_v48  ;;  %v1225_v48 = vsel %vm1148_vm4, %v1215_v31, %v1224_v28  ;;  %v5760_v31 = vshll.u32 %v13433_v36, 16  ;;  %v1917_v28 = vsel %vm497_vm0, %v13295_v37, 0  ;;  %v1484_v37 = vrot.slane %v13155_v3, 2 }
 0x115   : > { %v1479_v61 = vsel %vm1476_vm5, %v1477_v23, %v1478_v35  ;;  %v5739_v63 = vsel %vm315_vm2, %v5734_v29, %v5738_v47  ;;  %v5754_v13 = vrot.slane %v5752_v20, 1  ;;  %v5764_v23 = vshrl.u32 %v13433_v36, 16  ;;  %v13482_v29 = vld [vmem:[%s15157_s1 + $0xc] sm:$0x3] }
 0x117   : > { %v5758_v26 = vor.u32 %v5756_v62, %v5754_v13  ;;  %v5755_v47 = vsel %vm315_vm2, %v5750_v52, %v5754_v13 }
 0x119   : > { %10535 = vmatmul.mubr.msk.bf16.gmra.mrb[24].mxu1 %vm448_vm1, %v1212_v12  ;;  %v1482_v12 = vrot.slane %v13136_v50, 2  ;;  %v1481_v50 = vsel %vm1476_vm5, %v1478_v35, %v1480_v54 }
 0x11a   : > { %10538 = vmatprep.mubr.msk.bf16.mxu1 %vm448_vm1, %v1216_v30  ;;  %v13468_v30 = vld [vmem:[%s12550_s13 + $0x50] sm:$0xff]  }
 0x11b   : > { %10947 = vmatmul.mubr.msk.bf16.gmra.mrb[28].mxu0 %vm448_vm1, %v12256_v9  ;;  %v5762_v9 = vrot.slane %v5760_v31, 1  ;;  %v1483_v8 = vsel %vm1476_vm5, %v1480_v54, %v1482_v12  ;;  %v5776_v43 = vshll.u32 %v13468_v30, 16  ;;  %v13507_v54 = vld [vmem:[%s12550_s13 + $0x60] sm:$0xff]  }
 0x11c   : > { %10952 = vmatprep.mubr.msk.bf16.mxu0 %vm448_vm1, %v5731_v38  ;;  %v5768_v38 = vshll.u32 %v13458_v44, 16 }
 0x11d   : > { %v5763_v35 = vsel %vm315_vm2, %v5758_v26, %v5762_v9 }
 0x121   : > { %10539 = vmatmul.mubr.msk.bf16.gmra.mrb[28].mxu1 %vm448_vm1, %v1225_v48  ;;  %v5770_v48 = vrot.slane %v5768_v38, 1 }
 0x122   : > { %10544 = vmatprep.mubr.msk.bf16.mxu1 %vm448_vm1, %v1479_v61  ;;  %v1486_v61 = vrot.slane %v13161_v57, 2  ;;  %v1485_v57 = vsel %vm1476_vm5, %v1482_v12, %v1484_v37  ;;  %v1488_v12 = vrot.slane %v13173_v18, 2 }
 0x123   : > { %10953 = vmatmul.mubr.msk.bf16.vlgmr.msra.gmra.mrb[0].mxu0 %vm448_vm1, %v5739_v63  ;;  %v13495_v63 = vld [vmem:[%s12550_s13 + $0x58] sm:$0xff]   ;;  %v5774_v3 = vor.u32 %v5772_v4, %v5770_v48 }
 0x124   : > { %10985 = vmatpush3.bf16.msra.mxu0 %v6184_v33  ;;  %10956 = vmatprep.mubr.msk.bf16.mxu0 %vm448_vm1, %v5747_v58  ;;  %v5766_v33 = vor.u32 %v5764_v23, %v5762_v9  ;;  %v5778_v58 = vrot.slane %v5776_v43, 1  ;;  %v1487_v13 = vsel %vm1476_vm5, %v1484_v37, %v1486_v61  ;;  %v5784_v52 = vshll.u32 %v13495_v63, 16  ;;  %v13525_v37 = vld [vmem:[%s12550_s13 + $0x68] sm:$0xff]  }
 0x125   : > { %12154 = vmatprep.subr.msk.bf16.mxu0 %vm497_vm0, %v13451_v16  ;;  %v5780_v9 = vshrl.u32 %v13468_v30, 16  ;;  %v15223_v45 = vshrl.u32 %v13525_v37, 16 }
 0x126   : > { %v5771_v26 = vsel %vm315_vm2, %v5766_v33, %v5770_v48 }
 0x127   : > { %v5782_v48 = vor.u32 %v5780_v9, %v5778_v58 }
 0x129   : > { %10545 = vmatmul.mubr.msk.bf16.vlgmr.msra.gmra.mrb[0].mxu1 %vm448_vm1, %v1481_v50  ;;  %v5779_v50 = vsel %vm315_vm2, %v5774_v3, %v5778_v58  ;;  %v13535_v3 = vld [vmem:[%s12550_s13 + $0x70] sm:$0xff]   ;;  %v15227_v58 = vshrl.u32 %v13507_v54, 16 }
 0x12a   : > { %10548 = vmatprep.mubr.msk.bf16.mxu1 %vm448_vm1, %v1483_v8  ;;  %10577 = vmatpush3.bf16.msra.mxu1 %v1917_v28  ;;  %v5788_v8 = vshrl.u32 %v13495_v63, 16  ;;  %v15225_v28 = vshll.u32 %v13507_v54, 16  ;;  %v15224_v40 = vshll.u32 %v13535_v3, 16 }
 0x12b   : > { %10957 = vmatmul.mubr.msk.bf16.gmra.mrb[4].mxu0 %vm448_vm1, %v5755_v47  ;;  %12142 = vmatprep.subr.msk.bf16.mxu1 %vm497_vm0, %v13482_v29  ;;  %v5786_v47 = vrot.slane %v5784_v52, 1 }
 0x12c   : > { %10960 = vmatprep.mubr.msk.bf16.mxu0 %vm448_vm1, %v5763_v35  ;;  %v1490_v35 = vrot.slane %v13179_v0, 2  ;;  %v5794_v18 = vrot.slane %v15225_v28, 1 }
 0x12d   : > { %v5790_v33 = vor.u32 %v5788_v8, %v5786_v47 }
 0x12e   : > { %v1491_v0 = vsel %vm1476_vm5, %v1488_v12, %v1490_v35 }
 0x131   : > { %10549 = vmatmul.mubr.msk.bf16.gmra.mrb[4].mxu1 %vm448_vm1, %v1485_v57  ;;  %v1489_v57 = vsel %vm1476_vm5, %v1486_v61, %v1488_v12  ;;  %v1492_v61 = vrot.slane %v13189_v59, 2  ;;  %v5810_v59 = vrot.slane %v15224_v40, 1 }
 0x132   : > { %10552 = vmatprep.mubr.msk.bf16.mxu1 %vm448_vm1, %v1487_v13  ;;  %v15222_v13 = vshll.u32 %v13525_v37, 16 }
 0x133   : > { %10961 = vmatmul.mubr.msk.bf16.gmra.mrb[8].mxu0 %vm448_vm1, %v5771_v26  ;;  %v5787_v26 = vsel %vm315_vm2, %v5782_v48, %v5786_v47  ;;  %v1494_v47 = vrot.slane %v13195_v2, 2  ;;  %v13553_v48 = vld [vmem:[%s12550_s13 + $0x78] sm:$0xff]  }
 0x134   : > { %10964 = vmatprep.mubr.msk.bf16.mxu0 %vm448_vm1, %v5779_v50  ;;  %v5795_v50 = vsel %vm315_vm2, %v5790_v33, %v5794_v18  ;;  %v5802_v12 = vrot.slane %v15222_v13, 1  ;;  %v5798_v33 = vor.u32 %v15227_v58, %v5794_v18  ;;  %v15226_v13 = vshll.u32 %v13553_v48, 16 }
 0x135   : > { %v1495_v2 = vsel %vm1476_vm5, %v1492_v61, %v1494_v47  ;;  %v5812_v18 = vshrl.u32 %v13535_v3, 16  ;;  %v15229_v40 = vshrl.u32 %v13553_v48, 16 }
 0x139   : > { %10553 = vmatmul.mubr.msk.bf16.gmra.mrb[8].mxu1 %vm448_vm1, %v1489_v57  ;;  %v5806_v57 = vor.u32 %v15223_v45, %v5802_v12 }
 0x13a   : > { %10556 = vmatprep.mubr.msk.bf16.mxu1 %vm448_vm1, %v1491_v0  ;;  %v13563_v0 = vld [vmem:[%s12550_s13 + $0x80] sm:$0xff]  }
 0x13b   : > { %10965 = vmatmul.mubr.msk.bf16.gmra.mrb[12].mxu0 %vm448_vm1, %v5787_v26  ;;  %v1493_v26 = vsel %vm1476_vm5, %v1490_v35, %v1492_v61  ;;  %v5811_v45 = vsel %vm315_vm2, %v5806_v57, %v5810_v59  ;;  %v15228_v28 = vshll.u32 %v13563_v0, 16  ;;  %v1496_v35 = vrot.slane %v13205_v14, 2 }
 0x13c   : > { %10968 = vmatprep.mubr.msk.bf16.mxu0 %vm448_vm1, %v5795_v50  ;;  %v5803_v50 = vsel %vm315_vm2, %v5798_v33, %v5802_v12  ;;  %v5818_v61 = vrot.slane %v15226_v13, 1  ;;  %v1498_v12 = vrot.slane %v13211_v27, 2  ;;  %v13581_v33 = vld [vmem:[%s12550_s13 + $0x88] sm:$0xff]   ;;  %v5814_v57 = vor.u32 %v5812_v18, %v5810_v59 }
 0x13d   : > { %v5826_v14 = vrot.slane %v15228_v28, 1  ;;  %v15230_v13 = vshll.u32 %v13581_v33, 16  ;;  %v15231_v58 = vshrl.u32 %v13563_v0, 16  ;;  %v15232_v28 = vshrl.u32 %v13581_v33, 16 }
 0x13e   : > { %v1499_v27 = vsel %vm1476_vm5, %v1496_v35, %v1498_v12 }
 0x141   : > { %10557 = vmatmul.mubr.msk.bf16.gmra.mrb[12].mxu1 %vm448_vm1, %v1493_v26  ;;  %v5822_v26 = vor.u32 %v15229_v40, %v5818_v61 }
 0x142   : > { %10560 = vmatprep.mubr.msk.bf16.mxu1 %vm448_vm1, %v1495_v2  ;;  %v13591_v2 = vld [vmem:[%s12550_s13 + $0x90] sm:$0xff]  }
 0x143   : > { %10969 = vmatmul.mubr.msk.bf16.gmra.mrb[16].mxu0 %vm448_vm1, %v5803_v50  ;;  %v1497_v50 = vsel %vm1476_vm5, %v1494_v47, %v1496_v35  ;;  %v5827_v59 = vsel %vm315_vm2, %v5822_v26, %v5826_v14  ;;  %v15233_v40 = vshll.u32 %v13591_v2, 16  ;;  %v1500_v47 = vrot.slane %v13221_v21, 2  ;;  %v13612_v26 = vld [vmem:[%s12550_s13 + $0x98] ss:$0 sps:$4 sm:$0x11]  }
 0x144   : > { %10972 = vmatprep.mubr.msk.bf16.mxu0 %vm448_vm1, %v5811_v45  ;;  %v5819_v45 = vsel %vm315_vm2, %v5814_v57, %v5818_v61  ;;  %v5834_v35 = vrot.slane %v15230_v13, 1  ;;  %v1502_v61 = vrot.slane %v13227_v39, 2  ;;  %v5830_v57 = vor.u32 %v15231_v58, %v5826_v14 }
 0x145   : > { %v5842_v21 = vrot.slane %v15233_v40, 1  ;;  %v5848_v14 = vshll.u32 %v13612_v26, 16 }
 0x146   : > { %v1503_v13 = vsel %vm1476_vm5, %v1500_v47, %v1502_v61  ;;  %v5835_v39 = vsel %vm315_vm2, %v5830_v57, %v5834_v35 }
 0x147   : > { %v5850_v57 = vrot.slane %v5848_v14, 1 }
 0x149   : > { %10561 = vmatmul.mubr.msk.bf16.gmra.mrb[16].mxu1 %vm448_vm1, %v1497_v50  ;;  %v5838_v50 = vor.u32 %v15232_v28, %v5834_v35 }
 0x14a   : > { %10564 = vmatprep.mubr.msk.bf16.mxu1 %vm448_vm1, %v1499_v27  ;;  %v1501_v27 = vsel %vm1476_vm5, %v1498_v12, %v1500_v47  ;;  %v1504_v12 = vrot.slane %v13237_v19, 2  ;;  %v12384_v47 = vld [vmem:[%s12550_s13 + $0x78] sm:$0xff]  }
 0x14b   : > { %10973 = vmatmul.mubr.msk.bf16.gmra.mrb[20].mxu0 %vm448_vm1, %v5819_v45  ;;  %v6096_v45 = vld [vmem:[%s12550_s13 + $0x18] sm:$0xe]  ;;  %v5843_v58 = vsel %vm315_vm2, %v5838_v50, %v5842_v21  ;;  %v1506_v40 = vrot.slane %v12384_v47, 2 }
 0x14c   : > { %10976 = vmatprep.mubr.msk.bf16.mxu0 %vm448_vm1, %v5827_v59  ;;  %v15234_v59 = vshrl.u32 %v13591_v2, 16  ;;  %v13627_v28 = vcombine.low %v6096_v45, %v13359_v5  ;;  %v1505_v45 = vsel %vm1476_vm5, %v1502_v61, %v1504_v12  ;;  %v6107_v61 = vrot.slane %v13405_v55, 1 }
 0x14e   : > { %v5846_v35 = vor.u32 %v15234_v59, %v5842_v21  ;;  %v6102_v50 = vrot.slane %v13627_v28, 1  ;;  %v6105_v21 = vrot.slane %v13398_v56, 1 }
 0x150   : > { %v5851_v19 = vsel %vm315_vm2, %v5846_v35, %v5850_v57  ;;  %v6108_v35 = vsel %vm864_vm3, %v6105_v21, %v6107_v61  ;;  %v13660_v57 = vld [vmem:[%s15157_s1 + $0x26] sm:$0x3] }
 0x151   : > { %10565 = vmatmul.mubr.msk.bf16.gmra.mrb[20].mxu1 %vm448_vm1, %v1501_v27  ;;  %v6103_v27 = vrot.slane %v13374_v17, 1 }
 0x152   : > { %10568 = vmatprep.mubr.msk.bf16.mxu1 %vm448_vm1, %v1503_v13  ;;  %v1507_v13 = vsel %vm1476_vm5, %v1504_v12, %v1506_v40  ;;  %v12277_v12 = vld [vmem:[%s12550_s13 + $0x8] sm:$0xff]  }
 0x153   : > { %10977 = vmatmul.mubr.msk.bf16.gmra.mrb[24].mxu0 %vm448_vm1, %v5835_v39  ;;  %v6104_v39 = vsel %vm864_vm3, %v6102_v50, %v6103_v27  ;;  %v6106_v47 = vsel %vm864_vm3, %v6103_v27, %v6105_v21  ;;  %v12278_v50 = vld [vmem:[%s12550_s13 + $0x10] sm:$0xff]   ;;  %v12279_v27 = vld [vmem:[%s12550_s13 + $0x18] sm:$0xff]   ;;  %v6115_v21 = vrot.slane %v13468_v30, 1 }
 0x154   : > { %10980 = vmatprep.mubr.msk.bf16.mxu0 %vm448_vm1, %v5843_v58  ;;  %v1508_v58 = vrot.slane %v13382_v41, 2  ;;  %v6511_v41 = vsel %vm497_vm0, %v13451_v16, 0  ;;  %v6111_v16 = vrot.slane %v13433_v36, 1 }
 0x156   : > { %v1509_v14 = vsel %vm1476_vm5, %v1506_v40, %v1508_v58  ;;  %v6109_v40 = vrot.slane %v13423_v15, 1  ;;  %v12280_v58 = vld [vmem:[%s12550_s13 + $0x20] sm:$0xff]  }
 0x159   : > { %10569 = vmatmul.mubr.msk.bf16.gmra.mrb[24].mxu1 %vm448_vm1, %v1505_v45  ;;  %v2411_v45 = vsel %vm497_vm0, %v13482_v29, 0  ;;  %v6113_v29 = vrot.slane %v13458_v44, 1 }
 0x15a   : > { %10572 = vmatprep.mubr.msk.bf16.mxu1 %vm448_vm1, %v1507_v13  ;;  %v6110_v13 = vsel %vm864_vm3, %v6107_v61, %v6109_v40  ;;  %v12281_v61 = vld [vmem:[%s12550_s13 + $0x28] sm:$0xff]  }
 0x15b   : > { %10981 = vmatmul.mubr.msk.bf16.gmra.mrb[28].mxu0 %vm448_vm1, %v5851_v19  ;;  %v13676_v19 = vld [vmem:[%s15157_s1 + $0xe] sm:$0x3] }
 0x15c   : > { %10986 = vmatprep.mubr.msk.bf16.mxu0 %vm448_vm1, %v6104_v39  ;;  %v6112_v39 = vsel %vm864_vm3, %v6109_v40, %v6111_v16  ;;  %v12283_v40 = vld [vmem:[%s12550_s13 + $0x38] sm:$0xff]  }
 0x161   : > { %10573 = vmatmul.mubr.msk.bf16.gmra.mrb[28].mxu1 %vm448_vm1, %v1509_v14  ;;  %v6114_v14 = vsel %vm864_vm3, %v6111_v16, %v6113_v29 }
 0x162   : > { %10578 = vmatprep.mubr.msk.bf16.mxu1 %vm448_vm1, %v12277_v12  ;;  %v6116_v12 = vsel %vm864_vm3, %v6113_v29, %v6115_v21 }
 0x163   : > { %10987 = vmatmul.mubr.msk.bf16.vlgmr.msra.gmra.mrb[0].mxu0 %vm448_vm1, %v6106_v47  ;;  %v6117_v47 = vrot.slane %v13495_v63, 1 }
 0x164   : > { %11019 = vmatpush3.bf16.msra.mxu0 %v6511_v41  ;;  %10990 = vmatprep.mubr.msk.bf16.mxu0 %vm448_vm1, %v6108_v35  ;;  %v12282_v41 = vld [vmem:[%s12550_s13 + $0x30] sm:$0xff]   ;;  %v6119_v35 = vrot.slane %v13507_v54, 1 }
 0x165   : > { %12155 = vmatprep.subr.msk.bf16.mxu0 %vm497_vm0, %v13660_v57 }
 0x166   : > { %v6120_v16 = vsel %vm864_vm3, %v6117_v47, %v6119_v35 }
 0x169   : > { %10579 = vmatmul.mubr.msk.bf16.vlgmr.msra.gmra.mrb[0].mxu1 %vm448_vm1, %v12278_v50  ;;  %v6118_v50 = vsel %vm864_vm3, %v6115_v21, %v6117_v47  ;;  %v6125_v21 = vrot.slane %v13553_v48, 1 }
 0x16a   : > { %10582 = vmatprep.mubr.msk.bf16.mxu1 %vm448_vm1, %v12279_v27  ;;  %10611 = vmatpush3.bf16.msra.mxu1 %v2411_v45  ;;  %v6121_v27 = vrot.slane %v13525_v37, 1  ;;  %v12284_v45 = vld [vmem:[%s12550_s13 + $0x40] sm:$0xff]  }
 0x16b   : > { %10991 = vmatmul.mubr.msk.bf16.gmra.mrb[4].mxu0 %vm448_vm1, %v6110_v13  ;;  %12143 = vmatprep.subr.msk.bf16.mxu1 %vm497_vm0, %v13676_v19  ;;  %v6123_v13 = vrot.slane %v13535_v3, 1 }
 0x16c   : > { %10994 = vmatprep.mubr.msk.bf16.mxu0 %vm448_vm1, %v6112_v39  ;;  %v12285_v39 = vld [vmem:[%s12550_s13 + $0x48] sm:$0xff]   ;;  %v6122_v29 = vsel %vm864_vm3, %v6119_v35, %v6121_v27  ;;  %v6129_v35 = vrot.slane %v13581_v33, 1 }
 0x16d   : > { %v6126_v47 = vsel %vm864_vm3, %v6123_v13, %v6125_v21 }
 0x171   : > { %10583 = vmatmul.mubr.msk.bf16.gmra.mrb[4].mxu1 %vm448_vm1, %v12280_v58  ;;  %v6124_v58 = vsel %vm864_vm3, %v6121_v27, %v6123_v13  ;;  %v12288_v27 = vld [vmem:[%s12550_s13 + $0x60] sm:$0xff]   ;;  %v6389_v13 = vshll.u32 %v13627_v28, 16 }
 0x172   : > { %10586 = vmatprep.mubr.msk.bf16.mxu1 %vm448_vm1, %v12281_v61  ;;  %v12286_v61 = vld [vmem:[%s12550_s13 + $0x50] sm:$0xff]  }
 0x173   : > { %10995 = vmatmul.mubr.msk.bf16.gmra.mrb[8].mxu0 %vm448_vm1, %v6114_v14  ;;  %v6127_v14 = vrot.slane %v13563_v0, 1 }
 0x174   : > { %10998 = vmatprep.mubr.msk.bf16.mxu0 %vm448_vm1, %v6116_v12  ;;  %v12287_v12 = vld [vmem:[%s12550_s13 + $0x58] sm:$0xff]  }
 0x179   : > { %10587 = vmatmul.mubr.msk.bf16.gmra.mrb[8].mxu1 %vm448_vm1, %v12282_v41  ;;  %v6128_v41 = vsel %vm864_vm3, %v6125_v21, %v6127_v14 }
 0x17a   : > { %10590 = vmatprep.mubr.msk.bf16.mxu1 %vm448_vm1, %v12283_v40  ;;  %v6131_v40 = vrot.slane %v13591_v2, 1 }
 0x17b   : > { %10999 = vmatmul.mubr.msk.bf16.gmra.mrb[12].mxu0 %vm448_vm1, %v6118_v50  ;;  %v2112_v50 = vld [vmem:[%s12550_s13 + $0x8] sm:$0xf] }
 0x17c   : > { %11002 = vmatprep.mubr.msk.bf16.mxu0 %vm448_vm1, %v6120_v16  ;;  %v13729_v16 = vld [vmem:[%s12550_s13 + $0xc] sm:$0xf]  ;;  %v6132_v21 = vsel %vm864_vm3, %v6129_v35, %v6131_v40 }
 0x181   : > { %10591 = vmatmul.mubr.msk.bf16.gmra.mrb[12].mxu1 %vm448_vm1, %v12284_v45  ;;  %v6386_v45 = vshrl.u32 %v13627_v28, 16  ;;  %v13746_v28 = vld [vmem:[%s12550_s13 + $0x10] sm:$0xff]  }
 0x182   : > { %10594 = vmatprep.mubr.msk.bf16.mxu1 %vm448_vm1, %v12285_v39  ;;  %v12289_v39 = vld [vmem:[%s12550_s13 + $0x68] sm:$0xff]  }
 0x183   : > { %11003 = vmatmul.mubr.msk.bf16.gmra.mrb[16].mxu0 %vm448_vm1, %v6122_v29  ;;  %v9480_v29 = vcombine.low %v2112_v50, %v13729_v16  ;;  %v12290_v50 = vld [vmem:[%s12550_s13 + $0x70] sm:$0xff]  }
 0x184   : > { %11006 = vmatprep.mubr.msk.bf16.mxu0 %vm448_vm1, %v6124_v58  ;;  %v6130_v58 = vsel %vm864_vm3, %v6127_v14, %v6129_v35  ;;  %v6133_v35 = vrot.slane %v13612_v26, 1 }
 0x185   : > { %v2233_v14 = vshll.u32 %v9480_v29, 16 }
 0x187   : > { %v2235_v59 = vrot.slane %v2233_v14, 1 }
 0x189   : > { %10595 = vmatmul.mubr.msk.bf16.gmra.mrb[16].mxu1 %vm448_vm1, %v12286_v61  ;;  %v6388_v61 = vrot.slane %v6386_v45, 1 }
 0x18a   : > { %10598 = vmatprep.mubr.msk.bf16.mxu1 %vm448_vm1, %v12287_v12  ;;  %v6391_v12 = vrot.slane %v6389_v13, 2  ;;  %v12291_v13 = vld [vmem:[%s12550_s13 + $0x78] sm:$0xff]  }
 0x18b   : > { %11007 = vmatmul.mubr.msk.bf16.gmra.mrb[20].mxu0 %vm448_vm1, %v6126_v47  ;;  %v6393_v47 = vrot.slane %v5732_v49, 1  ;;  %v2231_v49 = vshrl.u32 %v9480_v29, 16  ;;  %v6401_v29 = vrot.slane %v5748_v60, 1 }
 0x18c   : > { %11010 = vmatprep.mubr.msk.bf16.mxu0 %vm448_vm1, %v6128_v41  ;;  %v6394_v41 = vrot.slane %v5728_v42, 2  ;;  %v15254_v42 = vshll.u32 %v13746_v28, 16 }
 0x18e   : > { %v6395_v45 = vor.u32 %v6394_v41, %v6393_v47  ;;  %v12292_v41 = vld [vmem:[%s12550_s13 + $0x80] sm:$0xff]  }
 0x191   : > { %10599 = vmatmul.mubr.msk.bf16.gmra.mrb[20].mxu1 %vm448_vm1, %v12288_v27  ;;  %v6392_v27 = vor.u32 %v6391_v12, %v6388_v61  ;;  %v13761_v61 = vld [vmem:[%s12550_s13 + $0x18] sm:$0xff]   ;;  %v6402_v12 = vrot.slane %v5744_v53, 2  ;;  %v15256_v53 = vshrl.u32 %v13746_v28, 16 }
 0x192   : > { %10602 = vmatprep.mubr.msk.bf16.mxu1 %vm448_vm1, %v12289_v39  ;;  %v6397_v39 = vrot.slane %v5740_v1, 1  ;;  %v2236_v1 = vor.u32 %v2235_v59, %v2231_v49  ;;  %v15248_v60 = vshll.u32 %v13761_v61, 16  ;;  %v6405_v49 = vrot.slane %v5756_v62, 1 }
 0x193   : > { %11011 = vmatmul.mubr.msk.bf16.gmra.mrb[24].mxu0 %vm448_vm1, %v6130_v58  ;;  %v6134_v58 = vsel %vm864_vm3, %v6131_v40, %v6133_v35  ;;  %v6396_v26 = vsel %vm1148_vm4, %v6392_v27, %v6395_v45  ;;  %v13772_v40 = vld [vmem:[%s12550_s13 + $0x20] sm:$0xff]   ;;  %v6403_v14 = vor.u32 %v6402_v12, %v6401_v29  ;;  %v13813_v12 = vld [vmem:[%s12550_s13 + $0x30] sm:$0xff]  }
 0x194   : > { %11014 = vmatprep.mubr.msk.bf16.mxu0 %vm448_vm1, %v6132_v21  ;;  %v6398_v21 = vrot.slane %v5736_v11, 2  ;;  %v2240_v11 = vrot.slane %v15254_v42, 1  ;;  %v15242_v59 = vshll.u32 %v13772_v40, 16  ;;  %v15332_v42 = vshll.u32 %v13591_v2, 16 }
 0x196   : > { %v6399_v47 = vor.u32 %v6398_v21, %v6397_v39  ;;  %v2241_v35 = vsel %vm315_vm2, %v2236_v1, %v2240_v11  ;;  %v6406_v39 = vrot.slane %v5752_v20, 2  ;;  %v2244_v62 = vor.u32 %v15256_v53, %v2240_v11  ;;  %v13805_v20 = vld [vmem:[%s15157_s1 + $0x28] sm:$0x3] }
 0x198   : > { %v6400_v27 = vsel %vm1148_vm4, %v6395_v45, %v6399_v47  ;;  %v6404_v21 = vsel %vm1148_vm4, %v6399_v47, %v6403_v14  ;;  %v6409_v45 = vrot.slane %v5764_v23, 1  ;;  %v2256_v23 = vrot.slane %v15242_v59, 1 }
 0x199   : > { %10603 = vmatmul.mubr.msk.bf16.gmra.mrb[24].mxu1 %vm448_vm1, %v12290_v50  ;;  %v15253_v50 = vshrl.u32 %v13761_v61, 16  ;;  %v15322_v59 = vshrl.u32 %v13525_v37, 16 }
 0x19a   : > { %10606 = vmatprep.mubr.msk.bf16.mxu1 %vm448_vm1, %v12291_v13  ;;  %v6794_v13 = vsel %vm497_vm0, %v13660_v57, 0  ;;  %v6410_v57 = vrot.slane %v5760_v31, 2  ;;  %v6407_v31 = vor.u32 %v6406_v39, %v6405_v49  ;;  %v2694_v49 = vsel %vm497_vm0, %v13676_v19, 0 }
 0x19b   : > { %11015 = vmatmul.mubr.msk.bf16.gmra.mrb[28].mxu0 %vm448_vm1, %v6134_v58  ;;  %v2248_v58 = vrot.slane %v15248_v60, 1 }
 0x19c   : > { %11020 = vmatprep.mubr.msk.bf16.mxu0 %vm448_vm1, %v6396_v26  ;;  %v13793_v26 = vld [vmem:[%s12550_s13 + $0x28] sm:$0xff]   ;;  %v6411_v11 = vor.u32 %v6410_v57, %v6409_v45  ;;  %v6408_v39 = vsel %vm1148_vm4, %v6403_v14, %v6407_v31  ;;  %v13834_v45 = vld [vmem:[%s15157_s1 + $0x10] sm:$0x3]  ;;  %v13841_v14 = vld [vmem:[%s12550_s13 + $0x38] sm:$0xff]  }
 0x19d   : > { %v2252_v29 = vor.u32 %v15253_v50, %v2248_v58  ;;  %v15236_v1 = vshll.u32 %v13793_v26, 16  ;;  %v2249_v47 = vsel %vm315_vm2, %v2244_v62, %v2248_v58  ;;  %v6414_v58 = vrot.slane %v5768_v38, 2 }
 0x19e   : > { %v6412_v19 = vsel %vm1148_vm4, %v6407_v31, %v6411_v11  ;;  %v6418_v38 = vrot.slane %v5776_v43, 2 }
 0x19f   : > { %v2264_v57 = vrot.slane %v15236_v1, 1 }
 0x1a1   : > { %10607 = vmatmul.mubr.msk.bf16.gmra.mrb[28].mxu1 %vm448_vm1, %v12292_v41  ;;  %v15247_v41 = vshrl.u32 %v13772_v40, 16 }
 0x1a2   : > { %10612 = vmatprep.mubr.msk.bf16.mxu1 %vm448_vm1, %v2241_v35  ;;  %v2257_v35 = vsel %vm315_vm2, %v2252_v29, %v2256_v23 }
 0x1a3   : > { %11021 = vmatmul.mubr.msk.bf16.vlgmr.msra.gmra.mrb[0].mxu0 %vm448_vm1, %v6400_v27  ;;  %v15237_v27 = vshrl.u32 %v13793_v26, 16  ;;  %v2260_v62 = vor.u32 %v15247_v41, %v2256_v23  ;;  %v15325_v41 = vshrl.u32 %v13553_v48, 16 }
 0x1a4   : > { %11053 = vmatpush3.bf16.msra.mxu0 %v6794_v13  ;;  %11024 = vmatprep.mubr.msk.bf16.mxu0 %vm448_vm1, %v6404_v21  ;;  %v15235_v13 = vshll.u32 %v13813_v12, 16  ;;  %v6413_v21 = vrot.slane %v5772_v4, 1  ;;  %v6417_v4 = vrot.slane %v5780_v9, 1  ;;  %v15238_v9 = vshll.u32 %v13841_v14, 16 }
 0x1a5   : > { %12156 = vmatprep.subr.msk.bf16.mxu0 %vm497_vm0, %v13805_v20  ;;  %v2268_v29 = vor.u32 %v15237_v27, %v2264_v57 }
 0x1a6   : > { %v2272_v31 = vrot.slane %v15235_v13, 1  ;;  %v6415_v43 = vor.u32 %v6414_v58, %v6413_v21  ;;  %v6419_v23 = vor.u32 %v6418_v38, %v6417_v4  ;;  %v15239_v13 = vshrl.u32 %v13841_v14, 16  ;;  %v13877_v4 = vld [vmem:[%s12550_s13 + $0x48] sm:$0xff]  }
 0x1a7   : > { %v6422_v21 = vrot.slane %v5784_v52, 2  ;;  %v2280_v58 = vrot.slane %v15238_v9, 1  ;;  %v15320_v38 = vshrl.u32 %v13507_v54, 16 }
 0x1a8   : > { %v6416_v27 = vsel %vm1148_vm4, %v6411_v11, %v6415_v43  ;;  %v15321_v11 = vshll.u32 %v13507_v54, 16 }
 0x1a9   : > { %10613 = vmatmul.mubr.msk.bf16.vlgmr.msra.gmra.mrb[0].mxu1 %vm448_vm1, %v2249_v47  ;;  %v13856_v47 = vld [vmem:[%s12550_s13 + $0x40] sm:$0xff]  }
 0x1aa   : > { %10616 = vmatprep.mubr.msk.bf16.mxu1 %vm448_vm1, %v2257_v35  ;;  %10645 = vmatpush3.bf16.msra.mxu1 %v2694_v49  ;;  %v2265_v35 = vsel %vm315_vm2, %v2260_v62, %v2264_v57  ;;  %v15241_v49 = vshrl.u32 %v13813_v12, 16  ;;  %v15240_v1 = vshll.u32 %v13856_v47, 16  ;;  %v6420_v57 = vsel %vm1148_vm4, %v6415_v43, %v6419_v23 }
 0x1ab   : > { %11025 = vmatmul.mubr.msk.bf16.gmra.mrb[4].mxu0 %vm448_vm1, %v6408_v39  ;;  %12144 = vmatprep.subr.msk.bf16.mxu1 %vm497_vm0, %v13834_v45  ;;  %v2273_v39 = vsel %vm315_vm2, %v2268_v29, %v2272_v31  ;;  %v6425_v62 = vrot.slane %v15320_v38, 1  ;;  %v6426_v29 = vrot.slane %v15321_v11, 2  ;;  %v15243_v11 = vshll.u32 %v13877_v4, 16 }
 0x1ac   : > { %11028 = vmatprep.mubr.msk.bf16.mxu0 %vm448_vm1, %v6412_v19  ;;  %v6421_v19 = vrot.slane %v5788_v8, 1  ;;  %v2276_v52 = vor.u32 %v15241_v49, %v2272_v31  ;;  %v2284_v8 = vor.u32 %v15239_v13, %v2280_v58  ;;  %v2288_v43 = vrot.slane %v15240_v1, 1 }
 0x1ad   : > { %v15246_v31 = vshrl.u32 %v13856_v47, 16  ;;  %v15244_v13 = vshrl.u32 %v13877_v4, 16 }
 0x1ae   : > { %v6423_v38 = vor.u32 %v6422_v21, %v6421_v19  ;;  %v2281_v9 = vsel %vm315_vm2, %v2276_v52, %v2280_v58  ;;  %v15323_v19 = vshll.u32 %v13525_v37, 16  ;;  %v2296_v58 = vrot.slane %v15243_v11, 1 }
 0x1af   : > { %v6433_v52 = vrot.slane %v5812_v18, 1 }
 0x1b0   : > { %v6424_v49 = vsel %vm1148_vm4, %v6419_v23, %v6423_v38  ;;  %v6430_v21 = vrot.slane %v15323_v19, 2  ;;  %v15324_v23 = vshll.u32 %v13535_v3, 16  ;;  %v13926_v19 = vld [vmem:[%s12550_s13 + $0x60] sm:$0xff]  }
 0x1b1   : > { %10617 = vmatmul.mubr.msk.bf16.gmra.mrb[4].mxu1 %vm448_vm1, %v2265_v35  ;;  %v13892_v35 = vld [vmem:[%s12550_s13 + $0x50] sm:$0xff]  }
 0x1b2   : > { %10620 = vmatprep.mubr.msk.bf16.mxu1 %vm448_vm1, %v2273_v39  ;;  %v6427_v39 = vor.u32 %v6426_v29, %v6425_v62  ;;  %v15245_v1 = vshll.u32 %v13892_v35, 16  ;;  %v13911_v29 = vld [vmem:[%s12550_s13 + $0x58] sm:$0xff]  }
 0x1b3   : > { %11029 = vmatmul.mubr.msk.bf16.gmra.mrb[8].mxu0 %vm448_vm1, %v6416_v27  ;;  %v2289_v27 = vsel %vm315_vm2, %v2284_v8, %v2288_v43  ;;  %v6434_v8 = vrot.slane %v15324_v23, 2  ;;  %v15249_v23 = vshll.u32 %v13911_v29, 16 }
 0x1b4   : > { %11032 = vmatprep.mubr.msk.bf16.mxu0 %vm448_vm1, %v6420_v57  ;;  %v6429_v57 = vrot.slane %v15322_v59, 1  ;;  %v6428_v62 = vsel %vm1148_vm4, %v6423_v38, %v6427_v39  ;;  %v2292_v59 = vor.u32 %v15246_v31, %v2288_v43  ;;  %v2304_v38 = vrot.slane %v15245_v1, 1 }
 0x1b5   : > { %v15251_v43 = vshrl.u32 %v13892_v35, 16  ;;  %v15252_v1 = vshll.u32 %v13926_v19, 16 }
 0x1b6   : > { %v6431_v18 = vor.u32 %v6430_v21, %v6429_v57  ;;  %v2297_v11 = vsel %vm315_vm2, %v2292_v59, %v2296_v58  ;;  %v15326_v57 = vshll.u32 %v13553_v48, 16  ;;  %v15327_v59 = vshrl.u32 %v13563_v0, 16 }
 0x1b8   : > { %v6432_v31 = vsel %vm1148_vm4, %v6427_v39, %v6431_v18  ;;  %v6438_v21 = vrot.slane %v15326_v57, 2  ;;  %v15328_v39 = vshll.u32 %v13563_v0, 16  ;;  %v13960_v57 = vld [vmem:[%s12550_s13 + $0x70] sm:$0xff]  }
 0x1b9   : > { %10621 = vmatmul.mubr.msk.bf16.gmra.mrb[8].mxu1 %vm448_vm1, %v2281_v9  ;;  %v2300_v9 = vor.u32 %v15244_v13, %v2296_v58  ;;  %v15250_v13 = vshrl.u32 %v13911_v29, 16  ;;  %v2312_v58 = vrot.slane %v15249_v23, 1 }
 0x1ba   : > { %10624 = vmatprep.mubr.msk.bf16.mxu1 %vm448_vm1, %v2289_v27  ;;  %v6435_v27 = vor.u32 %v6434_v8, %v6433_v52  ;;  %v13945_v8 = vld [vmem:[%s12550_s13 + $0x68] sm:$0xff]   ;;  %v6442_v60 = vrot.slane %v15328_v39, 2 }
 0x1bb   : > { %11033 = vmatmul.mubr.msk.bf16.gmra.mrb[12].mxu0 %vm448_vm1, %v6424_v49  ;;  %v2305_v49 = vsel %vm315_vm2, %v2300_v9, %v2304_v38  ;;  %v6441_v9 = vrot.slane %v15327_v59, 1 }
 0x1bc   : > { %11036 = vmatprep.mubr.msk.bf16.mxu0 %vm448_vm1, %v6428_v62  ;;  %v6437_v62 = vrot.slane %v15325_v41, 1  ;;  %v6436_v52 = vsel %vm1148_vm4, %v6431_v18, %v6435_v27  ;;  %v2308_v41 = vor.u32 %v15251_v43, %v2304_v38  ;;  %v2320_v18 = vrot.slane %v15252_v1, 1 }
 0x1bd   : > { %v6443_v39 = vor.u32 %v6442_v60, %v6441_v9  ;;  %v15259_v43 = vshll.u32 %v13960_v57, 16  ;;  %v13975_v60 = vld [vmem:[%s12550_s13 + $0x98] ss:$0 sps:$4 sm:$0x33]  }
 0x1be   : > { %v6439_v59 = vor.u32 %v6438_v21, %v6437_v62  ;;  %v2313_v38 = vsel %vm315_vm2, %v2308_v41, %v2312_v58  ;;  %v15330_v62 = vshll.u32 %v13581_v33, 16  ;;  %v13982_v41 = vld [vmem:[%s12550_s13 + $0x78] sm:$0xff]  }
 0x1bf   : > { %v15264_v53 = vshll.u32 %v13982_v41, 16  ;;  %v2346_v46 = vshrl.u32 %v13982_v41, 16 }
 0x1c0   : > { %v6440_v1 = vsel %vm1148_vm4, %v6435_v27, %v6439_v59  ;;  %v6446_v21 = vrot.slane %v15330_v62, 2  ;;  %v6444_v9 = vsel %vm1148_vm4, %v6439_v59, %v6443_v39  ;;  %v2336_v59 = vrot.slane %v15259_v43, 1 }
 0x1c1   : > { %10625 = vmatmul.mubr.msk.bf16.gmra.mrb[12].mxu1 %vm448_vm1, %v2297_v11  ;;  %v2316_v11 = vor.u32 %v15250_v13, %v2312_v58  ;;  %v15257_v13 = vshrl.u32 %v13945_v8, 16 }
 0x1c2   : > { %10628 = vmatprep.mubr.msk.bf16.mxu1 %vm448_vm1, %v2305_v49  ;;  %v15255_v49 = vshll.u32 %v13945_v8, 16 }
 0x1c3   : > { %11037 = vmatmul.mubr.msk.bf16.gmra.mrb[16].mxu0 %vm448_vm1, %v6432_v31  ;;  %v15258_v31 = vshrl.u32 %v13926_v19, 16  ;;  %v2321_v23 = vsel %vm315_vm2, %v2316_v11, %v2320_v18  ;;  %v15331_v11 = vshrl.u32 %v13591_v2, 16 }
 0x1c4   : > { %11040 = vmatprep.mubr.msk.bf16.mxu0 %vm448_vm1, %v6436_v52  ;;  %v15329_v52 = vshrl.u32 %v13581_v33, 16  ;;  %v2328_v58 = vrot.slane %v15255_v49, 1  ;;  %v13997_v49 = vld [vmem:[%s12550_s13 + $0x80] sm:$0xff]  }
 0x1c5   : > { %v6449_v27 = vrot.slane %v15331_v11, 1  ;;  %v2324_v62 = vor.u32 %v15258_v31, %v2320_v18  ;;  %v6706_v31 = vld [vmem:[%s12550_s13 + $0x18] sm:$0xc] }
 0x1c6   : > { %v6445_v50 = vrot.slane %v15329_v52, 1  ;;  %v6450_v52 = vrot.slane %v15332_v42, 2  ;;  %v6454_v42 = vshrl.u32 %v13975_v60, 16 }
 0x1c8   : > { %v6447_v11 = vor.u32 %v6446_v21, %v6445_v50  ;;  %v6451_v18 = vor.u32 %v6450_v52, %v6449_v27  ;;  %v6456_v21 = vrot.slane %v6454_v42, 1  ;;  %v2344_v27 = vrot.slane %v15264_v53, 1 }
 0x1c9   : > { %10629 = vmatmul.mubr.msk.bf16.gmra.mrb[16].mxu1 %vm448_vm1, %v2313_v38  ;;  %v2332_v38 = vor.u32 %v15257_v13, %v2328_v58  ;;  %v2338_v13 = vshrl.u32 %v13960_v57, 16  ;;  %v9792_v52 = vcombine.low %v6706_v31, %v13359_v5 }
 0x1ca   : > { %10632 = vmatprep.mubr.msk.bf16.mxu1 %vm448_vm1, %v2321_v23  ;;  %v6457_v23 = vshll.u32 %v13975_v60, 16  ;;  %v6448_v50 = vsel %vm1148_vm4, %v6443_v39, %v6447_v11  ;;  %v2348_v39 = vor.u32 %v2346_v46, %v2344_v27 }
 0x1cb   : > { %11041 = vmatmul.mubr.msk.bf16.gmra.mrb[20].mxu0 %vm448_vm1, %v6440_v1  ;;  %v2329_v1 = vsel %vm315_vm2, %v2324_v62, %v2328_v58  ;;  %v2337_v43 = vsel %vm315_vm2, %v2332_v38, %v2336_v59  ;;  %v6452_v58 = vsel %vm1148_vm4, %v6447_v11, %v6451_v18  ;;  %v2340_v62 = vor.u32 %v2338_v13, %v2336_v59  ;;  %v14019_v38 = vld [vmem:[%s12550_s13 + $0x88] ss:$0 sps:$4 sm:$0x11]  }
 0x1cc   : > { %11044 = vmatprep.mubr.msk.bf16.mxu0 %vm448_vm1, %v6444_v9  ;;  %v15265_v9 = vshll.u32 %v13997_v49, 16  ;;  %v6459_v6 = vrot.slane %v6457_v23, 2  ;;  %v2606_v23 = vld [vmem:[%s12550_s13 + $0x8] sm:$0xe]  ;;  %v6712_v5 = vrot.slane %v9792_v52, 2  ;;  %v2354_v59 = vshrl.u32 %v13997_v49, 16 }
 0x1cd   : > { %v2345_v31 = vsel %vm315_vm2, %v2340_v62, %v2344_v27  ;;  %v14034_v53 = vcombine.low %v2606_v23, %v13729_v16  ;;  %v6717_v52 = vrot.slane %v13405_v55, 2  ;;  %v2615_v23 = vrot.slane %v13761_v61, 1 }
 0x1ce   : > { %v2352_v42 = vrot.slane %v15265_v9, 1  ;;  %v6460_v11 = vor.u32 %v6459_v6, %v6456_v21  ;;  %v2617_v55 = vrot.slane %v13772_v40, 1 }
 0x1cf   : > { %v2612_v27 = vrot.slane %v14034_v53, 1 }
 0x1d0   : > { %v6461_v9 = vsel %vm1148_vm4, %v6451_v18, %v6460_v11  ;;  %v6715_v18 = vrot.slane %v13398_v56, 2  ;;  %v14060_v56 = vld [vmem:[%s15157_s1 + $0x2a] sm:$0x3] }
 0x1d1   : > { %10633 = vmatmul.mubr.msk.bf16.gmra.mrb[20].mxu1 %vm448_vm1, %v2329_v1  ;;  %v2358_v1 = vshll.u32 %v14019_v38, 16 }
 0x1d2   : > { %10636 = vmatprep.mubr.msk.bf16.mxu1 %vm448_vm1, %v2337_v43  ;;  %v6713_v43 = vrot.slane %v13374_v17, 2  ;;  %v2356_v17 = vor.u32 %v2354_v59, %v2352_v42 }
 0x1d3   : > { %11045 = vmatmul.mubr.msk.bf16.gmra.mrb[24].mxu0 %vm448_vm1, %v6448_v50  ;;  %v2353_v50 = vsel %vm315_vm2, %v2348_v39, %v2352_v42  ;;  %v2360_v21 = vrot.slane %v2358_v1, 1  ;;  %v6718_v42 = vsel %vm1476_vm5, %v6715_v18, %v6717_v52  ;;  %v3021_v1 = vsel %vm497_vm0, %v13834_v45, 0 }
 0x1d4   : > { %11048 = vmatprep.mubr.msk.bf16.mxu0 %vm448_vm1, %v6452_v58  ;;  %v6714_v6 = vsel %vm1476_vm5, %v6712_v5, %v6713_v43  ;;  %v2613_v58 = vrot.slane %v13746_v28, 1  ;;  %v6716_v11 = vsel %vm1476_vm5, %v6713_v43, %v6715_v18  ;;  %v6721_v5 = vrot.slane %v13433_v36, 2 }
 0x1d5   : > { %v2361_v62 = vsel %vm315_vm2, %v2356_v17, %v2360_v21  ;;  %v2619_v36 = vrot.slane %v13793_v26, 1  ;;  %v2621_v45 = vrot.slane %v13813_v12, 1  ;;  %v6723_v17 = vrot.slane %v13458_v44, 2 }
 0x1d6   : > { %v2614_v39 = vsel %vm864_vm3, %v2612_v27, %v2613_v58  ;;  %v2616_v43 = vsel %vm864_vm3, %v2613_v58, %v2615_v23  ;;  %v6725_v21 = vrot.slane %v13468_v30, 2  ;;  %v2625_v44 = vrot.slane %v13856_v47, 1 }
 0x1d7   : > { %v2620_v27 = vsel %vm864_vm3, %v2617_v55, %v2619_v36  ;;  %v2622_v58 = vsel %vm864_vm3, %v2619_v36, %v2621_v45  ;;  %v6724_v18 = vsel %vm1476_vm5, %v6721_v5, %v6723_v17  ;;  %v6727_v30 = vrot.slane %v13495_v63, 2 }
 0x1d8   : > { %v2629_v63 = vrot.slane %v13892_v35, 1 }
 0x1d9   : > { %10637 = vmatmul.mubr.msk.bf16.gmra.mrb[24].mxu1 %vm448_vm1, %v2345_v31  ;;  %v2618_v31 = vsel %vm864_vm3, %v2615_v23, %v2617_v55  ;;  %v2627_v55 = vrot.slane %v13877_v4, 1 }
 0x1da   : > { %10640 = vmatprep.mubr.msk.bf16.mxu1 %vm448_vm1, %v2353_v50 }
 0x1db   : > { %11049 = vmatmul.mubr.msk.bf16.gmra.mrb[28].mxu0 %vm448_vm1, %v6461_v9  ;;  %v7152_v9 = vsel %vm497_vm0, %v13805_v20, 0  ;;  %v6719_v20 = vrot.slane %v13423_v15, 2 }
 0x1dc   : > { %11054 = vmatprep.mubr.msk.bf16.mxu0 %vm448_vm1, %v6714_v6  ;;  %v14077_v6 = vld [vmem:[%s15157_s1 + $0x12] sm:$0x3] }
 0x1dd   : > { %v6720_v50 = vsel %vm1476_vm5, %v6717_v52, %v6719_v20  ;;  %v6722_v15 = vsel %vm1476_vm5, %v6719_v20, %v6721_v5  ;;  %v6726_v52 = vsel %vm1476_vm5, %v6723_v17, %v6725_v21  ;;  %v6733_v20 = vrot.slane %v13535_v3, 2 }
 0x1de   : > { %v2628_v5 = vsel %vm864_vm3, %v2625_v44, %v2627_v55  ;;  %v6735_v3 = vrot.slane %v13553_v48, 2  ;;  %v2637_v48 = vrot.slane %v13960_v57, 1 }
 0x1e0   : > { %v6736_v17 = vsel %vm1476_vm5, %v6733_v20, %v6735_v3 }
 0x1e1   : > { %10641 = vmatmul.mubr.msk.bf16.gmra.mrb[28].mxu1 %vm448_vm1, %v2361_v62  ;;  %v2623_v62 = vrot.slane %v13841_v14, 1 }
 0x1e2   : > { %10646 = vmatprep.mubr.msk.bf16.mxu1 %vm448_vm1, %v2614_v39  ;;  %v6729_v39 = vrot.slane %v13507_v54, 2  ;;  %v6731_v54 = vrot.slane %v13525_v37, 2  ;;  %v2633_v37 = vrot.slane %v13926_v19, 1 }
 0x1e3   : > { %11055 = vmatmul.mubr.msk.bf16.vlgmr.msra.gmra.mrb[0].mxu0 %vm448_vm1, %v6716_v11  ;;  %v2624_v11 = vsel %vm864_vm3, %v2621_v45, %v2623_v62 }
 0x1e4   : > { %11087 = vmatpush3.bf16.msra.mxu0 %v7152_v9  ;;  %11058 = vmatprep.mubr.msk.bf16.mxu0 %vm448_vm1, %v6718_v42  ;;  %v2626_v9 = vsel %vm864_vm3, %v2623_v62, %v2625_v44  ;;  %v6728_v42 = vsel %vm1476_vm5, %v6725_v21, %v6727_v30  ;;  %v6730_v23 = vsel %vm1476_vm5, %v6727_v30, %v6729_v39  ;;  %v2639_v30 = vrot.slane %v13982_v41, 1 }
 0x1e5   : > { %12157 = vmatprep.subr.msk.bf16.mxu0 %vm497_vm0, %v14060_v56 }
 0x1e9   : > { %10647 = vmatmul.mubr.msk.bf16.vlgmr.msra.gmra.mrb[0].mxu1 %vm448_vm1, %v2616_v43  ;;  %v2630_v43 = vsel %vm864_vm3, %v2627_v55, %v2629_v63 }
 0x1ea   : > { %10650 = vmatprep.mubr.msk.bf16.mxu1 %vm448_vm1, %v2618_v31  ;;  %10679 = vmatpush3.bf16.msra.mxu1 %v3021_v1  ;;  %v6732_v31 = vsel %vm1476_vm5, %v6729_v39, %v6731_v54  ;;  %v6734_v1 = vsel %vm1476_vm5, %v6731_v54, %v6733_v20  ;;  %v2641_v39 = vrot.slane %v13997_v49, 1  ;;  %v15334_v20 = vshll.u32 %v13746_v28, 16 }
 0x1eb   : > { %11059 = vmatmul.mubr.msk.bf16.gmra.mrb[4].mxu0 %vm448_vm1, %v6720_v50  ;;  %12145 = vmatprep.subr.msk.bf16.mxu1 %vm497_vm0, %v14077_v6  ;;  %v2631_v50 = vrot.slane %v13911_v29, 1 }
 0x1ec   : > { %11062 = vmatprep.mubr.msk.bf16.mxu0 %vm448_vm1, %v6722_v15  ;;  %v6737_v15 = vrot.slane %v13563_v0, 2  ;;  %v6739_v0 = vrot.slane %v13581_v33, 2  ;;  %v2896_v33 = vshrl.u32 %v14034_v53, 16 }
 0x1ed   : > { %v2632_v36 = vsel %vm864_vm3, %v2629_v63, %v2631_v50  ;;  %v2634_v45 = vsel %vm864_vm3, %v2631_v50, %v2633_v37  ;;  %v15333_v63 = vshrl.u32 %v13746_v28, 16  ;;  %v15335_v50 = vshrl.u32 %v13761_v61, 16 }
 0x1ee   : > { %v6738_v21 = vsel %vm1476_vm5, %v6735_v3, %v6737_v15  ;;  %v6740_v62 = vsel %vm1476_vm5, %v6737_v15, %v6739_v0  ;;  %v15336_v15 = vshll.u32 %v13761_v61, 16 }
 0x1ef   : > { %v2903_v54 = vrot.slane %v15333_v63, 1  ;;  %v3304_v63 = vsel %vm497_vm0, %v14077_v6, 0 }
 0x1f1   : > { %10651 = vmatmul.mubr.msk.bf16.gmra.mrb[4].mxu1 %vm448_vm1, %v2620_v27  ;;  %v2635_v27 = vrot.slane %v13945_v8, 1 }
 0x1f2   : > { %10654 = vmatprep.mubr.msk.bf16.mxu1 %vm448_vm1, %v2622_v58  ;;  %v6741_v58 = vrot.slane %v13591_v2, 2  ;;  %v2899_v2 = vshll.u32 %v14034_v53, 16  ;;  %v12313_v53 = vld [vmem:[%s12550_s13 + $0x20] sm:$0xff]  }
 0x1f3   : > { %11063 = vmatmul.mubr.msk.bf16.gmra.mrb[8].mxu0 %vm448_vm1, %v6724_v18  ;;  %v2636_v18 = vsel %vm864_vm3, %v2633_v37, %v2635_v27  ;;  %v2907_v37 = vrot.slane %v15335_v50, 1  ;;  %v12318_v50 = vld [vmem:[%s12550_s13 + $0x48] sm:$0xff]  }
 0x1f4   : > { %11066 = vmatprep.mubr.msk.bf16.mxu0 %vm448_vm1, %v6726_v52  ;;  %v2638_v52 = vsel %vm864_vm3, %v2635_v27, %v2637_v48  ;;  %v6742_v44 = vsel %vm1476_vm5, %v6739_v0, %v6741_v58  ;;  %v2901_v55 = vrot.slane %v2899_v2, 2  ;;  %v15338_v27 = vshll.u32 %v13772_v40, 16  ;;  %v12315_v0 = vld [vmem:[%s12550_s13 + $0x30] sm:$0xff]   ;;  %v12316_v2 = vld [vmem:[%s12550_s13 + $0x38] sm:$0xff]  }
 0x1f9   : > { %10655 = vmatmul.mubr.msk.bf16.gmra.mrb[8].mxu1 %vm448_vm1, %v2624_v11  ;;  %v6743_v11 = vrot.slane %v13975_v60, 2  ;;  %v2643_v60 = vrot.slane %v14019_v38, 1 }
 0x1fa   : > { %10658 = vmatprep.mubr.msk.bf16.mxu1 %vm448_vm1, %v2626_v9  ;;  %v2640_v9 = vsel %vm864_vm3, %v2637_v48, %v2639_v30  ;;  %v2912_v48 = vrot.slane %v15338_v27, 2 }
 0x1fb   : > { %11067 = vmatmul.mubr.msk.bf16.gmra.mrb[12].mxu0 %vm448_vm1, %v6728_v42  ;;  %v2642_v42 = vsel %vm864_vm3, %v2639_v30, %v2641_v39  ;;  %v2644_v3 = vsel %vm864_vm3, %v2641_v39, %v2643_v60  ;;  %v15340_v39 = vshll.u32 %v13793_v26, 16 }
 0x1fc   : > { %11070 = vmatprep.mubr.msk.bf16.mxu0 %vm448_vm1, %v6730_v23  ;;  %v2898_v23 = vrot.slane %v2896_v33, 1 }
 0x1fd   : > { %v2916_v33 = vrot.slane %v15340_v39, 2  ;;  %v15350_v39 = vshll.u32 %v13892_v35, 16 }
 0x201   : > { %10659 = vmatmul.mubr.msk.bf16.gmra.mrb[12].mxu1 %vm448_vm1, %v2628_v5  ;;  %v2904_v5 = vrot.slane %v15334_v20, 2  ;;  %v14206_v20 = vld [vmem:[%s15157_s1 + $0x14] sm:$0x3] }
 0x202   : > { %10662 = vmatprep.mubr.msk.bf16.mxu1 %vm448_vm1, %v2630_v43  ;;  %v6744_v43 = vsel %vm1476_vm5, %v6741_v58, %v6743_v11  ;;  %v7646_v58 = vsel %vm497_vm0, %v14060_v56, 0 }
 0x203   : > { %11071 = vmatmul.mubr.msk.bf16.gmra.mrb[16].mxu0 %vm448_vm1, %v6732_v31  ;;  %v2902_v31 = vor.u32 %v2901_v55, %v2898_v23  ;;  %v15342_v23 = vshll.u32 %v13813_v12, 16 }
 0x204   : > { %11074 = vmatprep.mubr.msk.bf16.mxu0 %vm448_vm1, %v6734_v1  ;;  %v2905_v1 = vor.u32 %v2904_v5, %v2903_v54  ;;  %v12317_v54 = vld [vmem:[%s12550_s13 + $0x40] sm:$0xff]  }
 0x205   : > { %v2920_v55 = vrot.slane %v15342_v23, 2  ;;  %v15351_v23 = vshrl.u32 %v13911_v29, 16 }
 0x209   : > { %10663 = vmatmul.mubr.msk.bf16.gmra.mrb[16].mxu1 %vm448_vm1, %v2632_v36  ;;  %v2908_v36 = vrot.slane %v15336_v15, 2 }
 0x20a   : > { %10666 = vmatprep.mubr.msk.bf16.mxu1 %vm448_vm1, %v2634_v45  ;;  %v12314_v45 = vld [vmem:[%s12550_s13 + $0x28] sm:$0xff]  }
 0x20b   : > { %11075 = vmatmul.mubr.msk.bf16.gmra.mrb[20].mxu0 %vm448_vm1, %v6736_v17  ;;  %v2906_v17 = vsel %vm1148_vm4, %v2902_v31, %v2905_v1  ;;  %v15344_v31 = vshll.u32 %v13841_v14, 16 }
 0x20c   : > { %11078 = vmatprep.mubr.msk.bf16.mxu0 %vm448_vm1, %v6738_v21  ;;  %v15337_v21 = vshrl.u32 %v13772_v40, 16 }
 0x20e   : > { %v2911_v38 = vrot.slane %v15337_v21, 1 }
 0x211   : > { %10667 = vmatmul.mubr.msk.bf16.gmra.mrb[20].mxu1 %vm448_vm1, %v2636_v18  ;;  %v2909_v18 = vor.u32 %v2908_v36, %v2907_v37  ;;  %v15346_v36 = vshll.u32 %v13856_v47, 16 }
 0x212   : > { %10670 = vmatprep.mubr.msk.bf16.mxu1 %vm448_vm1, %v2638_v52  ;;  %v14183_v52 = vld [vmem:[%s15157_s1 + $0x2c] sm:$0x3] }
 0x213   : > { %11079 = vmatmul.mubr.msk.bf16.gmra.mrb[24].mxu0 %vm448_vm1, %v6740_v62  ;;  %v2913_v62 = vor.u32 %v2912_v48, %v2911_v38  ;;  %v2910_v56 = vsel %vm1148_vm4, %v2905_v1, %v2909_v18  ;;  %v2924_v1 = vrot.slane %v15344_v31, 2  ;;  %v15347_v48 = vshrl.u32 %v13877_v4, 16 }
 0x214   : > { %11082 = vmatprep.mubr.msk.bf16.mxu0 %vm448_vm1, %v6742_v44  ;;  %v15339_v44 = vshrl.u32 %v13793_v26, 16 }
 0x215   : > { %v2914_v11 = vsel %vm1148_vm4, %v2909_v18, %v2913_v62 }
 0x216   : > { %v2915_v30 = vrot.slane %v15339_v44, 1  ;;  %v15349_v44 = vshrl.u32 %v13892_v35, 16 }
 0x218   : > { %v2917_v5 = vor.u32 %v2916_v33, %v2915_v30  ;;  %v2935_v30 = vrot.slane %v15349_v44, 1  ;;  %v2936_v33 = vrot.slane %v15350_v39, 2  ;;  %v14284_v39 = vld [vmem:[%s12550_s13 + $0x28] sm:$0xff]  }
 0x219   : > { %10671 = vmatmul.mubr.msk.bf16.gmra.mrb[24].mxu1 %vm448_vm1, %v2640_v9  ;;  %v15341_v9 = vshrl.u32 %v13813_v12, 16 }
 0x21a   : > { %10674 = vmatprep.mubr.msk.bf16.mxu1 %vm448_vm1, %v2642_v42  ;;  %v2918_v6 = vsel %vm1148_vm4, %v2913_v62, %v2917_v5  ;;  %v12320_v62 = vld [vmem:[%s12550_s13 + $0x58] sm:$0xff]  }
 0x21b   : > { %11083 = vmatmul.mubr.msk.bf16.gmra.mrb[28].mxu0 %vm448_vm1, %v6744_v43  ;;  %v2919_v42 = vrot.slane %v15341_v9, 1  ;;  %v2937_v9 = vor.u32 %v2936_v33, %v2935_v30 }
 0x21c   : > { %11088 = vmatprep.mubr.msk.bf16.mxu0 %vm448_vm1, %v12313_v53  ;;  %v15343_v53 = vshrl.u32 %v13841_v14, 16 }
 0x21d   : > { %v2921_v43 = vor.u32 %v2920_v55, %v2919_v42  ;;  %v2939_v55 = vrot.slane %v15351_v23, 1  ;;  %v12326_v23 = vld [vmem:[%s12550_s13 + $0x88] sm:$0xff]  }
 0x21e   : > { %v2923_v60 = vrot.slane %v15343_v53, 1 }
 0x21f   : > { %v2922_v37 = vsel %vm1148_vm4, %v2917_v5, %v2921_v43  ;;  %v12322_v5 = vld [vmem:[%s12550_s13 + $0x68] sm:$0xff]  }
 0x220   : > { %v2925_v21 = vor.u32 %v2924_v1, %v2923_v60  ;;  %v15354_v60 = vshll.u32 %v13926_v19, 16  ;;  %v12323_v1 = vld [vmem:[%s12550_s13 + $0x70] sm:$0xff]  }
 0x221   : > { %10675 = vmatmul.mubr.msk.bf16.gmra.mrb[28].mxu1 %vm448_vm1, %v2644_v3  ;;  %v15345_v3 = vshrl.u32 %v13856_v47, 16 }
 0x222   : > { %10680 = vmatprep.mubr.msk.bf16.mxu1 %vm448_vm1, %v2906_v17  ;;  %v12319_v17 = vld [vmem:[%s12550_s13 + $0x50] sm:$0xff]   ;;  %v2926_v27 = vsel %vm1148_vm4, %v2921_v43, %v2925_v21  ;;  %v2944_v31 = vrot.slane %v15354_v60, 2 }
 0x223   : > { %11089 = vmatmul.mubr.msk.bf16.vlgmr.msra.gmra.mrb[0].mxu0 %vm448_vm1, %v12314_v45  ;;  %v2927_v15 = vrot.slane %v15345_v3, 1  ;;  %v2928_v45 = vrot.slane %v15346_v36, 2 }
 0x224   : > { %11121 = vmatpush3.bf16.msra.mxu0 %v7646_v58  ;;  %11092 = vmatprep.mubr.msk.bf16.mxu0 %vm448_vm1, %v12315_v0  ;;  %v2931_v0 = vrot.slane %v15347_v48, 1  ;;  %v15348_v58 = vshll.u32 %v13877_v4, 16 }
 0x225   : > { %12158 = vmatprep.subr.msk.bf16.mxu0 %vm497_vm0, %v14183_v52  ;;  %v2929_v38 = vor.u32 %v2928_v45, %v2927_v15  ;;  %v15355_v15 = vshrl.u32 %v13945_v8, 16  ;;  %v15356_v45 = vshll.u32 %v13945_v8, 16 }
 0x226   : > { %v2932_v18 = vrot.slane %v15348_v58, 2  ;;  %v15357_v58 = vshll.u32 %v13960_v57, 16 }
 0x227   : > { %v2947_v36 = vrot.slane %v15355_v15, 1 }
 0x229   : > { %10681 = vmatmul.mubr.msk.bf16.vlgmr.msra.gmra.mrb[0].mxu1 %vm448_vm1, %v2910_v56  ;;  %v2930_v56 = vsel %vm1148_vm4, %v2925_v21, %v2929_v38  ;;  %v7347_v21 = vld [vmem:[%s12550_s13 + $0x20] sm:$0xf] }
 0x22a   : > { %10684 = vmatprep.mubr.msk.bf16.mxu1 %vm448_vm1, %v2914_v11  ;;  %10713 = vmatpush3.bf16.msra.mxu1 %v3304_v63  ;;  %v2933_v11 = vor.u32 %v2932_v18, %v2931_v0  ;;  %v15352_v63 = vshll.u32 %v13911_v29, 16  ;;  %v2951_v0 = vrot.slane %v2338_v13, 1  ;;  %v2952_v18 = vrot.slane %v15357_v58, 2 }
 0x22b   : > { %11093 = vmatmul.mubr.msk.bf16.gmra.mrb[4].mxu0 %vm448_vm1, %v12316_v2  ;;  %12146 = vmatprep.subr.msk.bf16.mxu1 %vm497_vm0, %v14206_v20  ;;  %v12321_v2 = vld [vmem:[%s12550_s13 + $0x60] sm:$0xff]  }
 0x22c   : > { %11096 = vmatprep.mubr.msk.bf16.mxu0 %vm448_vm1, %v12317_v54  ;;  %v2934_v42 = vsel %vm1148_vm4, %v2929_v38, %v2933_v11  ;;  %v2940_v54 = vrot.slane %v15352_v63, 2  ;;  %v2938_v43 = vsel %vm1148_vm4, %v2933_v11, %v2937_v9  ;;  %v14269_v38 = vld [vmem:[%s12550_s13 + $0x24] sm:$0xf]  ;;  %v2953_v30 = vor.u32 %v2952_v18, %v2951_v0 }
 0x22d   : > { %v15358_v11 = vshll.u32 %v13982_v41, 16  ;;  %v2959_v63 = vrot.slane %v2354_v59, 1  ;;  %v7477_v18 = vshrl.u32 %v14284_v39, 16 }
 0x231   : > { %10685 = vmatmul.mubr.msk.bf16.gmra.mrb[4].mxu1 %vm448_vm1, %v2918_v6  ;;  %v15353_v6 = vshrl.u32 %v13926_v19, 16 }
 0x232   : > { %10688 = vmatprep.mubr.msk.bf16.mxu1 %vm448_vm1, %v2922_v37 }
 0x233   : > { %11097 = vmatmul.mubr.msk.bf16.gmra.mrb[8].mxu0 %vm448_vm1, %v12318_v50  ;;  %v2943_v53 = vrot.slane %v15353_v6, 1  ;;  %v2941_v50 = vor.u32 %v2940_v54, %v2939_v55  ;;  %v15359_v54 = vshll.u32 %v13997_v49, 16 }
 0x234   : > { %11100 = vmatprep.mubr.msk.bf16.mxu0 %vm448_vm1, %v12319_v17  ;;  %v2948_v17 = vrot.slane %v15356_v45, 2 }
 0x235   : > { %v2945_v37 = vor.u32 %v2944_v31, %v2943_v53  ;;  %v2942_v3 = vsel %vm1148_vm4, %v2937_v9, %v2941_v50  ;;  %v2956_v9 = vrot.slane %v15358_v11, 2  ;;  %v7473_v53 = vshll.u32 %v14284_v39, 16 }
 0x236   : > { %v2949_v44 = vor.u32 %v2948_v17, %v2947_v36  ;;  %v14315_v36 = vld [vmem:[%s12550_s13 + $0x38] sm:$0xff]  }
 0x237   : > { %v2946_v48 = vsel %vm1148_vm4, %v2941_v50, %v2945_v37  ;;  %v14308_v50 = vld [vmem:[%s12550_s13 + $0x30] sm:$0xff]   ;;  %v7475_v15 = vrot.slane %v7473_v53, 1 }
 0x238   : > { %v2950_v33 = vsel %vm1148_vm4, %v2945_v37, %v2949_v44  ;;  %v2954_v55 = vsel %vm1148_vm4, %v2949_v44, %v2953_v30  ;;  %v3216_v37 = vld [vmem:[%s12550_s13 + $0x8] sm:$0xc]  ;;  %v7481_v0 = vshll.u32 %v14308_v50, 16  ;;  %v7489_v44 = vshll.u32 %v14315_v36, 16 }
 0x239   : > { %10689 = vmatmul.mubr.msk.bf16.gmra.mrb[8].mxu1 %vm448_vm1, %v2926_v27  ;;  %v12324_v27 = vld [vmem:[%s12550_s13 + $0x78] sm:$0xff]   ;;  %v9550_v58 = vcombine.low %v3216_v37, %v13729_v16  ;;  %v7479_v11 = vor.u32 %v7477_v18, %v7475_v15  ;;  %v3227_v37 = vrot.slane %v13772_v40, 2 }
 0x23a   : > { %10692 = vmatprep.mubr.msk.bf16.mxu1 %vm448_vm1, %v2930_v56  ;;  %v9843_v56 = vcombine.low %v7347_v21, %v14269_v38 }
 0x23b   : > { %11101 = vmatmul.mubr.msk.bf16.gmra.mrb[12].mxu0 %vm448_vm1, %v12320_v62  ;;  %v12325_v62 = vld [vmem:[%s12550_s13 + $0x80] sm:$0xff]   ;;  %v3222_v16 = vrot.slane %v9550_v58, 2 }
 0x23c   : > { %11104 = vmatprep.mubr.msk.bf16.mxu0 %vm448_vm1, %v12321_v2  ;;  %v7468_v13 = vshll.u32 %v9843_v56, 16  ;;  %v2955_v2 = vrot.slane %v2346_v46, 1  ;;  %v7466_v46 = vshrl.u32 %v9843_v56, 16  ;;  %v7485_v56 = vshrl.u32 %v14308_v50, 16 }
 0x23e   : > { %v7470_v6 = vrot.slane %v7468_v13, 1  ;;  %v2957_v60 = vor.u32 %v2956_v9, %v2955_v2  ;;  %v7483_v13 = vrot.slane %v7481_v0, 1  ;;  %v14333_v2 = vld [vmem:[%s12550_s13 + $0x40] sm:$0xff]  }
 0x240   : > { %v2958_v45 = vsel %vm1148_vm4, %v2953_v30, %v2957_v60  ;;  %v7487_v9 = vor.u32 %v7485_v56, %v7483_v13 }
 0x241   : > { %10693 = vmatmul.mubr.msk.bf16.gmra.mrb[12].mxu1 %vm448_vm1, %v2934_v42  ;;  %v14292_v42 = vld [vmem:[%s12550_s13 + $0x88] ss:$0 sps:$4 sm:$0x33]  }
 0x242   : > { %10696 = vmatprep.mubr.msk.bf16.mxu1 %vm448_vm1, %v2938_v43  ;;  %v12327_v43 = vld [vmem:[%s12550_s13 + $0x90] sm:$0xff]   ;;  %v2964_v31 = vshrl.u32 %v14292_v42, 16 }
 0x243   : > { %11105 = vmatmul.mubr.msk.bf16.gmra.mrb[16].mxu0 %vm448_vm1, %v12322_v5  ;;  %v2960_v5 = vrot.slane %v15359_v54, 2  ;;  %v7497_v54 = vshll.u32 %v14333_v2, 16 }
 0x244   : > { %11108 = vmatprep.mubr.msk.bf16.mxu0 %vm448_vm1, %v12323_v1  ;;  %v2967_v1 = vshll.u32 %v14292_v42, 16  ;;  %v2966_v17 = vrot.slane %v2964_v31, 1 }
 0x245   : > { %v2961_v59 = vor.u32 %v2960_v5, %v2959_v63  ;;  %v7484_v5 = vsel %vm315_vm2, %v7479_v11, %v7483_v13 }
 0x246   : > { %v2969_v21 = vrot.slane %v2967_v1, 2  ;;  %v3225_v1 = vrot.slane %v13761_v61, 2 }
 0x248   : > { %v2970_v30 = vor.u32 %v2969_v21, %v2966_v17  ;;  %v14378_v17 = vld [vmem:[%s12550_s13 + $0x58] sm:$0xff]   ;;  %v3228_v21 = vsel %vm1476_vm5, %v3225_v1, %v3227_v37 }
 0x249   : > { %10697 = vmatmul.mubr.msk.bf16.gmra.mrb[16].mxu1 %vm448_vm1, %v2942_v3  ;;  %v7471_v3 = vor.u32 %v7470_v6, %v7466_v46  ;;  %v7929_v46 = vsel %vm497_vm0, %v14183_v52, 0  ;;  %v7499_v52 = vrot.slane %v7497_v54, 1 }
 0x24a   : > { %10700 = vmatprep.mubr.msk.bf16.mxu1 %vm448_vm1, %v2946_v48  ;;  %v2962_v48 = vsel %vm1148_vm4, %v2957_v60, %v2961_v59  ;;  %v2971_v63 = vsel %vm1148_vm4, %v2961_v59, %v2970_v30  ;;  %v7501_v60 = vshrl.u32 %v14333_v2, 16  ;;  %v14361_v59 = vld [vmem:[%s15157_s1 + $0x2e] sm:$0x3]  ;;  %v14392_v30 = vld [vmem:[%s15157_s1 + $0x16] sm:$0x3] }
 0x24b   : > { %11109 = vmatmul.mubr.msk.bf16.gmra.mrb[20].mxu0 %vm448_vm1, %v12324_v27  ;;  %v12328_v27 = vld [vmem:[%s12550_s13 + $0x98] sm:$0xff]  }
 0x24c   : > { %11112 = vmatprep.mubr.msk.bf16.mxu0 %vm448_vm1, %v12325_v62  ;;  %v7476_v62 = vsel %vm315_vm2, %v7471_v3, %v7475_v15  ;;  %v14368_v3 = vld [vmem:[%s12550_s13 + $0x50] sm:$0xff]   ;;  %v7503_v15 = vor.u32 %v7501_v60, %v7499_v52 }
 0x251   : > { %10701 = vmatmul.mubr.msk.bf16.gmra.mrb[20].mxu1 %vm448_vm1, %v2950_v33  ;;  %v3223_v33 = vrot.slane %v13746_v28, 2 }
 0x252   : > { %10704 = vmatprep.mubr.msk.bf16.mxu1 %vm448_vm1, %v2954_v55  ;;  %v14343_v55 = vld [vmem:[%s12550_s13 + $0x48] sm:$0xff]  }
 0x253   : > { %11113 = vmatmul.mubr.msk.bf16.gmra.mrb[24].mxu0 %vm448_vm1, %v12326_v23  ;;  %v7491_v23 = vrot.slane %v7489_v44, 1  ;;  %v3224_v28 = vsel %vm1476_vm5, %v3222_v16, %v3223_v33  ;;  %v7505_v31 = vshll.u32 %v14343_v55, 16  ;;  %v3226_v40 = vsel %vm1476_vm5, %v3223_v33, %v3225_v1 }
 0x254   : > { %11116 = vmatprep.mubr.msk.bf16.mxu0 %vm448_vm1, %v12327_v43  ;;  %v7493_v43 = vshrl.u32 %v14315_v36, 16  ;;  %v7517_v16 = vshrl.u32 %v14368_v3, 16  ;;  %v7521_v33 = vshll.u32 %v14378_v17, 16 }
 0x255   : > { %v7492_v6 = vsel %vm315_vm2, %v7487_v9, %v7491_v23  ;;  %v3231_v9 = vrot.slane %v13813_v12, 2 }
 0x256   : > { %v7495_v61 = vor.u32 %v7493_v43, %v7491_v23  ;;  %v14405_v23 = vld [vmem:[%s12550_s13 + $0x60] sm:$0xff]  }
 0x258   : > { %v7500_v58 = vsel %vm315_vm2, %v7495_v61, %v7499_v52  ;;  %v7525_v52 = vshrl.u32 %v14378_v17, 16 }
 0x259   : > { %10705 = vmatmul.mubr.msk.bf16.gmra.mrb[24].mxu1 %vm448_vm1, %v2958_v45  ;;  %v7507_v45 = vrot.slane %v7505_v31, 1 }
 0x25a   : > { %10708 = vmatprep.mubr.msk.bf16.mxu1 %vm448_vm1, %v2962_v48  ;;  %v3662_v48 = vsel %vm497_vm0, %v14206_v20, 0  ;;  %v3229_v20 = vrot.slane %v13793_v26, 2 }
 0x25b   : > { %11117 = vmatmul.mubr.msk.bf16.gmra.mrb[28].mxu0 %vm448_vm1, %v12328_v27  ;;  %v7513_v27 = vshll.u32 %v14368_v3, 16  ;;  %v7508_v13 = vsel %vm315_vm2, %v7503_v15, %v7507_v45  ;;  %v7533_v15 = vshrl.u32 %v14405_v23, 16 }
 0x25c   : > { %11122 = vmatprep.mubr.msk.bf16.mxu0 %vm448_vm1, %v7476_v62  ;;  %v7509_v62 = vshrl.u32 %v14343_v55, 16  ;;  %v3230_v12 = vsel %vm1476_vm5, %v3227_v37, %v3229_v20  ;;  %v3233_v37 = vrot.slane %v13841_v14, 2 }
 0x25d   : > { %v7515_v11 = vrot.slane %v7513_v27, 1 }
 0x25f   : > { %v7519_v26 = vor.u32 %v7517_v16, %v7515_v11 }
 0x261   : > { %10709 = vmatmul.mubr.msk.bf16.gmra.mrb[28].mxu1 %vm448_vm1, %v2971_v63  ;;  %v7511_v63 = vor.u32 %v7509_v62, %v7507_v45 }
 0x262   : > { %10714 = vmatprep.mubr.msk.bf16.mxu1 %vm448_vm1, %v3224_v28  ;;  %v7523_v28 = vrot.slane %v7521_v33, 1 }
 0x263   : > { %11123 = vmatmul.mubr.msk.bf16.vlgmr.msra.gmra.mrb[0].mxu0 %vm448_vm1, %v7484_v5  ;;  %v14417_v5 = vld [vmem:[%s12550_s13 + $0x68] sm:$0xff]   ;;  %v7516_v1 = vsel %vm315_vm2, %v7511_v63, %v7515_v11  ;;  %v3234_v11 = vsel %vm1476_vm5, %v3231_v9, %v3233_v37 }
 0x264   : > { %11155 = vmatpush3.bf16.msra.mxu0 %v7929_v46  ;;  %11126 = vmatprep.mubr.msk.bf16.mxu0 %vm448_vm1, %v7492_v6  ;;  %v3232_v46 = vsel %vm1476_vm5, %v3229_v20, %v3231_v9  ;;  %v7529_v6 = vshll.u32 %v14405_v23, 16  ;;  %v7524_v61 = vsel %vm315_vm2, %v7519_v26, %v7523_v28  ;;  %v15270_v45 = vshll.u32 %v14417_v5, 16  ;;  %v14445_v20 = vld [vmem:[%s12550_s13 + $0x78] sm:$0xff]  }
 0x265   : > { %12159 = vmatprep.subr.msk.bf16.mxu0 %vm497_vm0, %v14361_v59  ;;  %v3237_v9 = vrot.slane %v13877_v4, 2 }
 0x266   : > { %v7539_v14 = vrot.slane %v15270_v45, 1 }
 0x269   : > { %10715 = vmatmul.mubr.msk.bf16.vlgmr.msra.gmra.mrb[0].mxu1 %vm448_vm1, %v3226_v40  ;;  %v7531_v40 = vrot.slane %v7529_v6, 1 }
 0x26a   : > { %10718 = vmatprep.mubr.msk.bf16.mxu1 %vm448_vm1, %v3228_v21  ;;  %10747 = vmatpush3.bf16.msra.mxu1 %v3662_v48  ;;  %v3235_v21 = vrot.slane %v13856_v47, 2  ;;  %v14435_v48 = vld [vmem:[%s12550_s13 + $0x70] sm:$0xff]  }
 0x26b   : > { %11127 = vmatmul.mubr.msk.bf16.gmra.mrb[4].mxu0 %vm448_vm1, %v7500_v58  ;;  %12147 = vmatprep.subr.msk.bf16.mxu1 %vm497_vm0, %v14392_v30  ;;  %v7527_v58 = vor.u32 %v7525_v52, %v7523_v28  ;;  %v15266_v63 = vshll.u32 %v14435_v48, 16  ;;  %v7541_v28 = vshrl.u32 %v14417_v5, 16 }
 0x26c   : > { %11130 = vmatprep.mubr.msk.bf16.mxu0 %vm448_vm1, %v7508_v13  ;;  %v7535_v13 = vor.u32 %v7533_v15, %v7531_v40  ;;  %v3236_v47 = vsel %vm1476_vm5, %v3233_v37, %v3235_v21  ;;  %v3239_v37 = vrot.slane %v13892_v35, 2 }
 0x26d   : > { %v7532_v26 = vsel %vm315_vm2, %v7527_v58, %v7531_v40  ;;  %v14463_v40 = vld [vmem:[%s12550_s13 + $0x80] sm:$0xff]   ;;  %v7543_v58 = vor.u32 %v7541_v28, %v7539_v14 }
 0x26e   : > { %v3240_v35 = vsel %vm1476_vm5, %v3237_v9, %v3239_v37 }
 0x271   : > { %10719 = vmatmul.mubr.msk.bf16.gmra.mrb[4].mxu1 %vm448_vm1, %v3230_v12  ;;  %v7540_v12 = vsel %vm315_vm2, %v7535_v13, %v7539_v14  ;;  %v15274_v14 = vshrl.u32 %v14445_v20, 16 }
 0x272   : > { %10722 = vmatprep.mubr.msk.bf16.mxu1 %vm448_vm1, %v3232_v46  ;;  %v15268_v46 = vshrl.u32 %v14435_v48, 16 }
 0x273   : > { %11131 = vmatmul.mubr.msk.bf16.gmra.mrb[8].mxu0 %vm448_vm1, %v7516_v1  ;;  %v15267_v1 = vshll.u32 %v14445_v20, 16 }
 0x274   : > { %11134 = vmatprep.mubr.msk.bf16.mxu0 %vm448_vm1, %v7524_v61  ;;  %v7547_v61 = vrot.slane %v15266_v63, 1 }
 0x275   : > { %v7555_v4 = vrot.slane %v15267_v1, 1  ;;  %v15272_v1 = vshrl.u32 %v14463_v40, 16 }
 0x276   : > { %v7551_v13 = vor.u32 %v15268_v46, %v7547_v61 }
 0x278   : > { %v7556_v63 = vsel %vm315_vm2, %v7551_v13, %v7555_v4  ;;  %v7559_v13 = vor.u32 %v15274_v14, %v7555_v4 }
 0x279   : > { %10723 = vmatmul.mubr.msk.bf16.gmra.mrb[8].mxu1 %vm448_vm1, %v3234_v11  ;;  %v14473_v11 = vld [vmem:[%s12550_s13 + $0x88] sm:$0xff]  }
 0x27a   : > { %10726 = vmatprep.mubr.msk.bf16.mxu1 %vm448_vm1, %v3236_v47  ;;  %v3238_v47 = vsel %vm1476_vm5, %v3235_v21, %v3237_v9  ;;  %v15271_v46 = vshll.u32 %v14473_v11, 16  ;;  %v3241_v21 = vrot.slane %v13911_v29, 2  ;;  %v7573_v45 = vshrl.u32 %v14473_v11, 16 }
 0x27b   : > { %11135 = vmatmul.mubr.msk.bf16.gmra.mrb[12].mxu0 %vm448_vm1, %v7532_v26  ;;  %v15269_v26 = vshll.u32 %v14463_v40, 16 }
 0x27c   : > { %11138 = vmatprep.mubr.msk.bf16.mxu0 %vm448_vm1, %v7540_v12  ;;  %v7548_v12 = vsel %vm315_vm2, %v7543_v58, %v7547_v61  ;;  %v3243_v61 = vrot.slane %v13926_v19, 2  ;;  %v14491_v58 = vld [vmem:[%s12550_s13 + $0x90] sm:$0xff]   ;;  %v7571_v29 = vrot.slane %v15271_v46, 1 }
 0x27d   : > { %v7563_v9 = vrot.slane %v15269_v26, 1  ;;  %v15273_v26 = vshll.u32 %v14491_v58, 16  ;;  %v15275_v46 = vshrl.u32 %v14491_v58, 16 }
 0x27e   : > { %v3244_v19 = vsel %vm1476_vm5, %v3241_v21, %v3243_v61 }
 0x281   : > { %10727 = vmatmul.mubr.msk.bf16.gmra.mrb[12].mxu1 %vm448_vm1, %v3238_v47  ;;  %v7567_v47 = vor.u32 %v15272_v1, %v7563_v9 }
 0x282   : > { %10730 = vmatprep.mubr.msk.bf16.mxu1 %vm448_vm1, %v3240_v35  ;;  %v14501_v35 = vld [vmem:[%s12550_s13 + $0x98] sm:$0xff]  }
 0x283   : > { %11139 = vmatmul.mubr.msk.bf16.gmra.mrb[16].mxu0 %vm448_vm1, %v7548_v12  ;;  %v3242_v12 = vsel %vm1476_vm5, %v3239_v37, %v3241_v21  ;;  %v7572_v4 = vsel %vm315_vm2, %v7567_v47, %v7571_v29  ;;  %v7585_v1 = vshll.u32 %v14501_v35, 16  ;;  %v3245_v37 = vrot.slane %v13945_v8, 2  ;;  %v14522_v47 = vld [vmem:[%s12550_s13 + $0xa0] ss:$0 sps:$4 sm:$0x11]  }
 0x284   : > { %11142 = vmatprep.mubr.msk.bf16.mxu0 %vm448_vm1, %v7556_v63  ;;  %v7564_v63 = vsel %vm315_vm2, %v7559_v13, %v7563_v9  ;;  %v7579_v21 = vrot.slane %v15273_v26, 1  ;;  %v3247_v9 = vrot.slane %v13960_v57, 2  ;;  %v7575_v13 = vor.u32 %v7573_v45, %v7571_v29 }
 0x285   : > { %v7587_v8 = vrot.slane %v7585_v1, 1  ;;  %v7593_v14 = vshll.u32 %v14522_v47, 16 }
 0x286   : > { %v3248_v26 = vsel %vm1476_vm5, %v3245_v37, %v3247_v9  ;;  %v7580_v57 = vsel %vm315_vm2, %v7575_v13, %v7579_v21 }
 0x287   : > { %v7595_v13 = vrot.slane %v7593_v14, 1  ;;  %v7850_v14 = vrot.slane %v14308_v50, 1 }
 0x289   : > { %10731 = vmatmul.mubr.msk.bf16.gmra.mrb[16].mxu1 %vm448_vm1, %v3242_v12  ;;  %v7583_v12 = vor.u32 %v15275_v46, %v7579_v21 }
 0x28a   : > { %10734 = vmatprep.mubr.msk.bf16.mxu1 %vm448_vm1, %v3244_v19  ;;  %v3246_v19 = vsel %vm1476_vm5, %v3243_v61, %v3245_v37  ;;  %v3249_v61 = vrot.slane %v13982_v41, 2  ;;  %v3251_v37 = vrot.slane %v13997_v49, 2 }
 0x28b   : > { %11143 = vmatmul.mubr.msk.bf16.gmra.mrb[20].mxu0 %vm448_vm1, %v7564_v63  ;;  %v7841_v63 = vld [vmem:[%s12550_s13 + $0x20] sm:$0xe]  ;;  %v7588_v29 = vsel %vm315_vm2, %v7583_v12, %v7587_v8 }
 0x28c   : > { %11146 = vmatprep.mubr.msk.bf16.mxu0 %vm448_vm1, %v7572_v4  ;;  %v7589_v4 = vshrl.u32 %v14501_v35, 16  ;;  %v14537_v46 = vcombine.low %v7841_v63, %v14269_v38  ;;  %v7848_v38 = vrot.slane %v14284_v39, 1 }
 0x28e   : > { %v7591_v21 = vor.u32 %v7589_v4, %v7587_v8  ;;  %v7847_v12 = vrot.slane %v14537_v46, 1  ;;  %v3253_v8 = vrot.slane %v14292_v42, 2  ;;  %v8256_v42 = vsel %vm497_vm0, %v14361_v59, 0 }
 0x28f   : > { %v7856_v59 = vrot.slane %v14343_v55, 1 }
 0x290   : > { %v7596_v41 = vsel %vm315_vm2, %v7591_v21, %v7595_v13  ;;  %v7849_v49 = vsel %vm864_vm3, %v7847_v12, %v7848_v38  ;;  %v3254_v63 = vsel %vm1476_vm5, %v3251_v37, %v3253_v8  ;;  %v14570_v21 = vld [vmem:[%s15157_s1 + $0x30] sm:$0x3]  ;;  %v12350_v13 = vld [vmem:[%s12550_s13 + $0x18] sm:$0xff]   ;;  %v12351_v12 = vld [vmem:[%s12550_s13 + $0x20] sm:$0xff]  }
 0x291   : > { %10735 = vmatmul.mubr.msk.bf16.gmra.mrb[20].mxu1 %vm448_vm1, %v3246_v19  ;;  %v3250_v19 = vsel %vm1476_vm5, %v3247_v9, %v3249_v61  ;;  %v7852_v9 = vrot.slane %v14315_v36, 1  ;;  %v12353_v8 = vld [vmem:[%s12550_s13 + $0x30] sm:$0xff]  }
 0x292   : > { %10738 = vmatprep.mubr.msk.bf16.mxu1 %vm448_vm1, %v3248_v26  ;;  %v3252_v26 = vsel %vm1476_vm5, %v3249_v61, %v3251_v37  ;;  %v7854_v37 = vrot.slane %v14333_v2, 1 }
 0x293   : > { %11147 = vmatmul.mubr.msk.bf16.gmra.mrb[24].mxu0 %vm448_vm1, %v7580_v57  ;;  %v12349_v57 = vld [vmem:[%s12550_s13 + $0x10] sm:$0xff]   ;;  %v7853_v61 = vsel %vm864_vm3, %v7850_v14, %v7852_v9 }
 0x294   : > { %11150 = vmatprep.mubr.msk.bf16.mxu0 %vm448_vm1, %v7588_v29  ;;  %v7851_v29 = vsel %vm864_vm3, %v7848_v38, %v7850_v14  ;;  %v4156_v38 = vsel %vm497_vm0, %v14392_v30, 0  ;;  %v7860_v30 = vrot.slane %v14378_v17, 1 }
 0x299   : > { %10739 = vmatmul.mubr.msk.bf16.gmra.mrb[24].mxu1 %vm448_vm1, %v3250_v19  ;;  %v7855_v19 = vsel %vm864_vm3, %v7852_v9, %v7854_v37 }
 0x29a   : > { %10742 = vmatprep.mubr.msk.bf16.mxu1 %vm448_vm1, %v3252_v26  ;;  %v7857_v26 = vsel %vm864_vm3, %v7854_v37, %v7856_v59 }
 0x29b   : > { %11151 = vmatmul.mubr.msk.bf16.gmra.mrb[28].mxu0 %vm448_vm1, %v7596_v41  ;;  %v7858_v41 = vrot.slane %v14368_v3, 1 }
 0x29c   : > { %11156 = vmatprep.mubr.msk.bf16.mxu0 %vm448_vm1, %v7849_v49  ;;  %v12352_v49 = vld [vmem:[%s12550_s13 + $0x28] sm:$0xff]  }
 0x29d   : > { %v7859_v14 = vsel %vm864_vm3, %v7856_v59, %v7858_v41  ;;  %v7861_v9 = vsel %vm864_vm3, %v7858_v41, %v7860_v30  ;;  %v8734_v59 = vld [vmem:[%s15158_s2] sm:$0xff]  ;;  %v8735_v41 = vld [vmem:[%s15158_s2 + $0x8] sm:$0xff] }
 0x2a1   : > { %10743 = vmatmul.mubr.msk.bf16.gmra.mrb[28].mxu1 %vm448_vm1, %v3254_v63  ;;  %v7862_v63 = vrot.slane %v14405_v23, 1 }
 0x2a2   : > { %10748 = vmatprep.mubr.msk.bf16.mxu1 %vm448_vm1, %v12349_v57  ;;  %v12354_v57 = vld [vmem:[%s12550_s13 + $0x38] sm:$0xff]  }
 0x2a3   : > { %11157 = vmatmul.mubr.msk.bf16.vlgmr.msra.gmra.mrb[0].mxu0 %vm448_vm1, %v7851_v29  ;;  %v7864_v29 = vrot.slane %v14417_v5, 1  ;;  %v7863_v37 = vsel %vm864_vm3, %v7860_v30, %v7862_v63 }
 0x2a4   : > { %11189 = vmatpush3.bf16.msra.mxu0 %v8256_v42  ;;  %11160 = vmatprep.mubr.msk.bf16.mxu0 %vm448_vm1, %v7853_v61  ;;  %v12452_v42 = vmov 0   ;;  %v12355_v61 = vld [vmem:[%s12550_s13 + $0x40] sm:$0xff]  }
 0x2a5   : > { %12160 = vmatprep.subr.msk.bf16.mxu0 %vm497_vm0, %v14570_v21  ;;  %12202 = vset.pattern.permute.xlu0 %v12452_v42 }
 0x2a6   : > { %12203 = vset.pattern.permute.xlu1 %v12452_v42  ;;  %8768 = vperm.xlu0 %12202, %v8734_v59   ;;  %v8739_v42 = vld [vmem:[%s15158_s2 + $0x28] sm:$0xff] }
 0x2a9   : > { %10749 = vmatmul.mubr.msk.bf16.vlgmr.msra.gmra.mrb[0].mxu1 %vm448_vm1, %v12350_v13  ;;  %v7865_v13 = vsel %vm864_vm3, %v7862_v63, %v7864_v29  ;;  %v7870_v63 = vrot.slane %v14463_v40, 1 }
 0x2aa   : > { %10752 = vmatprep.mubr.msk.bf16.mxu1 %vm448_vm1, %v12351_v12  ;;  %10781 = vmatpush3.bf16.msra.mxu1 %v4156_v38  ;;  %v8736_v12 = vld [vmem:[%s15158_s2 + $0x10] sm:$0xff]  ;;  %v7866_v38 = vrot.slane %v14435_v48, 1 }
 0x2ab   : > { %11161 = vmatmul.mubr.msk.bf16.gmra.mrb[4].mxu0 %vm448_vm1, %v7855_v19  ;;  %v12356_v19 = vld [vmem:[%s12550_s13 + $0x48] sm:$0xff]   ;;  %8778 = vperm.xlu1 %12203, %v8736_v12   ;;  %v8741_v12 = vld [vmem:[%s15158_s2 + $0x38] sm:$0xff] }
 0x2ac   : > { %11164 = vmatprep.mubr.msk.bf16.mxu0 %vm448_vm1, %v7857_v26  ;;  %v7868_v26 = vrot.slane %v14445_v20, 1  ;;  %v7867_v30 = vsel %vm864_vm3, %v7864_v29, %v7866_v38  ;;  %8773 = vperm.xlu0 %12202, %v8735_v41   ;;  %v7872_v29 = vrot.slane %v14473_v11, 1  ;;  %v3857_v41 = vld [vmem:[%s12550_s13 + $0x10] sm:$0xf] }
 0x2ae   : > { %v7873_v59 = vsel %vm864_vm3, %v7870_v63, %v7872_v29 }
 0x2b1   : > { %10753 = vmatmul.mubr.msk.bf16.gmra.mrb[4].mxu1 %vm448_vm1, %v12352_v49  ;;  %v12357_v49 = vld [vmem:[%s12550_s13 + $0x50] sm:$0xff]  }
 0x2b2   : > { %10756 = vmatprep.mubr.msk.bf16.mxu1 %vm448_vm1, %v12353_v8  ;;  %v7869_v8 = vsel %vm864_vm3, %v7866_v38, %v7868_v26  ;;  %v8742_v38 = vld [vmem:[%s15158_s2 + $0x40] sm:$0xff] }
 0x2b3   : > { %11165 = vmatmul.mubr.msk.bf16.gmra.mrb[8].mxu0 %vm448_vm1, %v7859_v14  ;;  %v8737_v14 = vld [vmem:[%s15158_s2 + $0x18] sm:$0xff] }
 0x2b4   : > { %11168 = vmatprep.mubr.msk.bf16.mxu0 %vm448_vm1, %v7861_v9  ;;  %v8738_v9 = vld [vmem:[%s15158_s2 + $0x20] sm:$0xff]  ;;  %8783 = vperm.xlu1 %12203, %v8737_v14   ;;  %v8743_v14 = vld [vmem:[%s15158_s2 + $0x48] sm:$0xff] }
 0x2b5   : > { %8788 = vperm.xlu0 %12202, %v8738_v9   ;;  %v12361_v9 = vld [vmem:[%s12550_s13 + $0x70] sm:$0xff]  }
 0x2b8   : > { %8793 = vperm.xlu1 %12203, %v8739_v42  }
 0x2b9   : > { %10757 = vmatmul.mubr.msk.bf16.gmra.mrb[8].mxu1 %vm448_vm1, %v12354_v57  ;;  %v12358_v57 = vld [vmem:[%s12550_s13 + $0x58] sm:$0xff]  }
 0x2ba   : > { %10760 = vmatprep.mubr.msk.bf16.mxu1 %vm448_vm1, %v12355_v61  ;;  %v12359_v61 = vld [vmem:[%s12550_s13 + $0x60] sm:$0xff]  }
 0x2bb   : > { %11169 = vmatmul.mubr.msk.bf16.gmra.mrb[12].mxu0 %vm448_vm1, %v7863_v37  ;;  %v8740_v37 = vld [vmem:[%s15158_s2 + $0x30] sm:$0xff] }
 0x2bc   : > { %11172 = vmatprep.mubr.msk.bf16.mxu0 %vm448_vm1, %v7865_v13  ;;  %v7871_v13 = vsel %vm864_vm3, %v7868_v26, %v7870_v63  ;;  %8798 = vperm.xlu0 %12202, %v8740_v37   ;;  %v7876_v26 = vrot.slane %v14501_v35, 1  ;;  %v8744_v63 = vld [vmem:[%s15158_s2 + $0x50] sm:$0xff] }
 0x2bd   : > { %8803 = vperm.xlu1 %12203, %v8741_v12   ;;  %v8139_v12 = vrot.slane %v7473_v53, 2  ;;  %v12362_v53 = vld [vmem:[%s12550_s13 + $0x78] sm:$0xff]  }
 0x2c0   : > { %8808 = vperm.xlu0 %12202, %v8742_v38   ;;  %v8745_v38 = vld [vmem:[%s15158_s2 + $0x58] sm:$0xff] }
 0x2c1   : > { %10761 = vmatmul.mubr.msk.bf16.gmra.mrb[12].mxu1 %vm448_vm1, %v12356_v19  ;;  %v7874_v19 = vrot.slane %v14491_v58, 1  ;;  %8813 = vperm.xlu1 %12203, %v8743_v14   ;;  %v8748_v14 = vld [vmem:[%s15158_s2 + $0x70] sm:$0xff] }
 0x2c2   : > { %10764 = vmatprep.mubr.msk.bf16.mxu1 %vm448_vm1, %v12357_v49  ;;  %v12360_v49 = vld [vmem:[%s12550_s13 + $0x68] sm:$0xff]  }
 0x2c3   : > { %11173 = vmatmul.mubr.msk.bf16.gmra.mrb[16].mxu0 %vm448_vm1, %v7867_v30  ;;  %v8131_v30 = vshrl.u32 %v14537_v46, 16  ;;  %v7877_v37 = vsel %vm864_vm3, %v7874_v19, %v7876_v26 }
 0x2c4   : > { %11176 = vmatprep.mubr.msk.bf16.mxu0 %vm448_vm1, %v7869_v8  ;;  %v8134_v8 = vshll.u32 %v14537_v46, 16  ;;  %8818 = vperm.xlu0 %12202, %v8744_v63  }
 0x2c5   : > { %v8133_v46 = vrot.slane %v8131_v30, 1  ;;  %8823 = vperm.xlu1 %12203, %v8745_v38   ;;  %v8747_v30 = vld [vmem:[%s15158_s2 + $0x68] sm:$0xff]  ;;  %v8752_v38 = vld [vmem:[%s15158_s2 + $0x90] sm:$0xff] }
 0x2c9   : > { %10765 = vmatmul.mubr.msk.bf16.gmra.mrb[16].mxu1 %vm448_vm1, %v12358_v57  ;;  %v12385_v57 = vld [vmem:[%s12550_s13 + $0x14] sm:$0xf]  ;;  %8833 = vperm.xlu1 %12203, %v8747_v30   ;;  %v8151_v30 = vrot.slane %v7497_v54, 2  ;;  %v8753_v54 = vld [vmem:[%s15158_s2 + $0x98] sm:$0xff] }
 0x2ca   : > { %10768 = vmatprep.mubr.msk.bf16.mxu1 %vm448_vm1, %v12359_v61  ;;  %v9601_v42 = vcombine.low %v3857_v41, %v12385_v57  ;;  %v7875_v61 = vsel %vm864_vm3, %v7872_v29, %v7874_v19  ;;  %v8746_v19 = vld [vmem:[%s15158_s2 + $0x60] sm:$0xff]  ;;  %v8142_v57 = vrot.slane %v7485_v56, 1 }
 0x2cb   : > { %11177 = vmatmul.mubr.msk.bf16.gmra.mrb[20].mxu0 %vm448_vm1, %v7871_v13  ;;  %v8136_v13 = vrot.slane %v8134_v8, 2  ;;  %8828 = vperm.xlu0 %12202, %v8746_v19   ;;  %v12363_v8 = vld [vmem:[%s12550_s13 + $0x80] sm:$0xff]  }
 0x2cc   : > { %11180 = vmatprep.mubr.msk.bf16.mxu0 %vm448_vm1, %v7873_v59  ;;  %v8138_v59 = vrot.slane %v7477_v18, 1  ;;  %v3978_v29 = vshll.u32 %v9601_v42, 16  ;;  %v7878_v18 = vrot.slane %v14522_v47, 1 }
 0x2cd   : > { %v8137_v41 = vor.u32 %v8136_v13, %v8133_v46  ;;  %v8146_v46 = vrot.slane %v7493_v43, 1  ;;  %v8749_v13 = vld [vmem:[%s15158_s2 + $0x78] sm:$0xff]  ;;  %v8750_v43 = vld [vmem:[%s15158_s2 + $0x80] sm:$0xff] }
 0x2ce   : > { %v3980_v63 = vrot.slane %v3978_v29, 1  ;;  %v7879_v47 = vsel %vm864_vm3, %v7876_v26, %v7878_v18  ;;  %8843 = vperm.xlu1 %12203, %v8749_v13   ;;  %v8751_v29 = vld [vmem:[%s15158_s2 + $0x88] sm:$0xff]  ;;  %v8159_v13 = vrot.slane %v7513_v27, 2  ;;  %v8757_v27 = vld [vmem:[%s15158_s2 + $0xb8] sm:$0xff] }
 0x2cf   : > { %8838 = vperm.xlu0 %12202, %v8748_v14  }
 0x2d1   : > { %10769 = vmatmul.mubr.msk.bf16.gmra.mrb[20].mxu1 %vm448_vm1, %v12360_v49  ;;  %v8140_v49 = vor.u32 %v8139_v12, %v8138_v59  ;;  %v12364_v59 = vld [vmem:[%s12550_s13 + $0x88] sm:$0xff]  }
 0x2d2   : > { %10772 = vmatprep.mubr.msk.bf16.mxu1 %vm448_vm1, %v12361_v9  ;;  %v3976_v9 = vshrl.u32 %v9601_v42, 16  ;;  %v8147_v42 = vrot.slane %v7489_v44, 2  ;;  %8853 = vperm.xlu1 %12203, %v8751_v29   ;;  %v8162_v29 = vrot.slane %v7525_v52, 1  ;;  %v15368_v52 = vld [vmem:[#allocation5_spill] sm:$0xff] }
 0x2d3   : > { %11181 = vmatmul.mubr.msk.bf16.gmra.mrb[24].mxu0 %vm448_vm1, %v7875_v61  ;;  %v8143_v61 = vrot.slane %v7481_v0, 2  ;;  %v15360_v0 = vshll.u32 %v12554_v7, 16  ;;  %8848 = vperm.xlu0 %12202, %v8750_v43   ;;  %v15365_v43 = vshll.u32 %v12597_v32, 16 }
 0x2d4   : > { %11184 = vmatprep.mubr.msk.bf16.mxu0 %vm448_vm1, %v7877_v37  ;;  %v8141_v37 = vsel %vm1148_vm4, %v8137_v41, %v8140_v49  ;;  %v3981_v56 = vor.u32 %v3980_v63, %v3976_v9  ;;  %v8148_v12 = vor.u32 %v8147_v42, %v8146_v46  ;;  %v8150_v41 = vrot.slane %v7501_v60, 1  ;;  %v8755_v42 = vld [vmem:[%s15158_s2 + $0xa8] sm:$0xff] }
 0x2d5   : > { %v3985_v26 = vrot.slane %v15360_v0, 1  ;;  %v8144_v44 = vor.u32 %v8143_v61, %v8142_v57  ;;  %v15362_v60 = vshrl.u32 %v12554_v7, 16  ;;  %v8754_v57 = vld [vmem:[%s15158_s2 + $0xa0] sm:$0xff] }
 0x2d6   : > { %v8152_v7 = vor.u32 %v8151_v30, %v8150_v41  ;;  %8863 = vperm.xlu1 %12203, %v8753_v54  }
 0x2d7   : > { %v3986_v19 = vsel %vm315_vm2, %v3981_v56, %v3985_v26  ;;  %v8145_v18 = vsel %vm1148_vm4, %v8140_v49, %v8144_v44  ;;  %v8149_v9 = vsel %vm1148_vm4, %v8144_v44, %v8148_v12  ;;  %v8154_v49 = vrot.slane %v7509_v62, 1  ;;  %8858 = vperm.xlu0 %12202, %v8752_v38  }
 0x2d8   : > { %v3989_v63 = vor.u32 %v15362_v60, %v3985_v26  ;;  %v15363_v62 = vshrl.u32 %v12560_v10, 16  ;;  %v8153_v0 = vsel %vm1148_vm4, %v8148_v12, %v8152_v7  ;;  %v8158_v26 = vrot.slane %v7517_v16, 1 }
 0x2d9   : > { %10773 = vmatmul.mubr.msk.bf16.gmra.mrb[24].mxu1 %vm448_vm1, %v12362_v53  ;;  %v8539_v53 = vsel %vm497_vm0, %v14570_v21, 0  ;;  %v8155_v21 = vrot.slane %v7505_v31, 2  ;;  %v15364_v31 = vshll.u32 %v12579_v22, 16  ;;  %v4009_v44 = vrot.slane %v15365_v43, 1  ;;  %v8763_v43 = vld [vmem:[%s15158_s2 + $0xe8] sm:$0xff] }
 0x2da   : > { %10776 = vmatprep.mubr.msk.bf16.mxu1 %vm448_vm1, %v12363_v8  ;;  %v15361_v8 = vshll.u32 %v12560_v10, 16  ;;  %v8756_v10 = vld [vmem:[%s15158_s2 + $0xb0] sm:$0xff]  ;;  %v8163_v38 = vrot.slane %v7521_v33, 2  ;;  %8873 = vperm.xlu1 %12203, %v8755_v42   ;;  %v15366_v16 = vshrl.u32 %v12579_v22, 16  ;;  %v8758_v33 = vld [vmem:[%s15158_s2 + $0xc0] sm:$0xff]  ;;  %v8160_v22 = vor.u32 %v8159_v13, %v8158_v26 }
 0x2db   : > { %11185 = vmatmul.mubr.msk.bf16.gmra.mrb[28].mxu0 %vm448_vm1, %v7879_v47  ;;  %v4001_v61 = vrot.slane %v15364_v31, 1  ;;  %8868 = vperm.xlu0 %12202, %v8754_v57   ;;  %v8167_v60 = vrot.slane %v7529_v6, 2  ;;  %v15372_v31 = vshll.u32 %v14417_v5, 16  ;;  %v8761_v6 = vld [vmem:[%s15158_s2 + $0xd8] sm:$0xff] }
 0x2dc   : > { %11190 = vmatprep.mubr.msk.bf16.mxu0 %vm448_vm1, %v8141_v37  ;;  %v3993_v14 = vrot.slane %v15361_v8, 1  ;;  %v8156_v37 = vor.u32 %v8155_v21, %v8154_v49  ;;  %v8164_v30 = vor.u32 %v8163_v38, %v8162_v29  ;;  %v8166_v21 = vrot.slane %v7533_v15, 1 }
 0x2dd   : > { %v4005_v12 = vor.u32 %v15366_v16, %v4001_v61  ;;  %v15373_v15 = vshrl.u32 %v15368_v52, 16  ;;  %v15377_v38 = vshrl.u32 %v14435_v48, 16 }
 0x2de   : > { %v3997_v47 = vor.u32 %v15363_v62, %v3993_v14  ;;  %v3994_v46 = vsel %vm315_vm2, %v3989_v63, %v3993_v14  ;;  %8883 = vperm.xlu1 %12203, %v8757_v27   ;;  %v8161_v49 = vsel %vm1148_vm4, %v8156_v37, %v8160_v22  ;;  %v15370_v63 = vld [vmem:[#allocation6_spill] sm:$0xff]  ;;  %v8165_v62 = vsel %vm1148_vm4, %v8160_v22, %v8164_v30 }
 0x2df   : > { %8878 = vperm.xlu0 %12202, %v8756_v10   ;;  %v4010_v8 = vsel %vm315_vm2, %v4005_v12, %v4009_v44  ;;  %v15371_v54 = vshll.u32 %v15370_v63, 16  ;;  %v8762_v10 = vld [vmem:[%s15158_s2 + $0xe0] sm:$0xff]  ;;  %v8174_v16 = vrot.slane %v15377_v38, 1  ;;  %v15378_v12 = vshll.u32 %v14435_v48, 16 }
 0x2e0   : > { %v4002_v56 = vsel %vm315_vm2, %v3997_v47, %v4001_v61  ;;  %v8170_v47 = vrot.slane %v7541_v28, 1  ;;  %v8171_v61 = vrot.slane %v15372_v31, 2  ;;  %v15375_v28 = vld [vmem:[#allocation7_spill] sm:$0xff]  ;;  %v15382_v22 = vshll.u32 %v14445_v20, 16 }
 0x2e1   : > { %10777 = vmatmul.mubr.msk.bf16.gmra.mrb[28].mxu1 %vm448_vm1, %v12364_v59  ;;  %v8157_v59 = vsel %vm1148_vm4, %v8152_v7, %v8156_v37  ;;  %v4025_v57 = vrot.slane %v15371_v54, 1  ;;  %v15374_v37 = vshrl.u32 %v15370_v63, 16  ;;  %v15376_v42 = vshll.u32 %v15375_v28, 16 }
 0x2e2   : > { %10782 = vmatprep.mubr.msk.bf16.mxu1 %vm448_vm1, %v3986_v19  ;;  %v15367_v19 = vshrl.u32 %v12597_v32, 16  ;;  %v8759_v32 = vld [vmem:[%s15158_s2 + $0xc8] sm:$0xff]  ;;  %v8172_v26 = vor.u32 %v8171_v61, %v8170_v47  ;;  %v8175_v27 = vrot.slane %v15378_v12, 2  ;;  %v15386_v31 = vshrl.u32 %v14463_v40, 16 }
 0x2e3   : > { %11191 = vmatmul.mubr.msk.bf16.vlgmr.msra.gmra.mrb[0].mxu0 %vm448_vm1, %v8145_v18  ;;  %8888 = vperm.xlu0 %12202, %v8758_v33  }
 0x2e4   : > { %11223 = vmatpush3.bf16.msra.mxu0 %v8539_v53  ;;  %11194 = vmatprep.mubr.msk.bf16.mxu0 %vm448_vm1, %v8149_v9  ;;  %v4013_v18 = vor.u32 %v15367_v19, %v4009_v44  ;;  %v15369_v53 = vshll.u32 %v15368_v52, 16  ;;  %v8760_v9 = vld [vmem:[%s15158_s2 + $0xd0] sm:$0xff]  ;;  %v15379_v19 = vld [vmem:[#allocation8_spill] sm:$0xff]  ;;  %v8176_v63 = vor.u32 %v8175_v27, %v8174_v16  ;;  %v8182_v61 = vrot.slane %v15386_v31, 1 }
 0x2e5   : > { %8893 = vperm.xlu1 %12203, %v8759_v32   ;;  %v15400_v31 = vld [vmem:[#allocation10_spill] sm:$0xff] }
 0x2e6   : > { %v4017_v41 = vrot.slane %v15369_v53, 1  ;;  %v8177_v47 = vsel %vm1148_vm4, %v8172_v26, %v8176_v63 }
 0x2e7   : > { %8898 = vperm.xlu0 %12202, %v8760_v9   ;;  %v15384_v9 = vshrl.u32 %v15379_v19, 16 }
 0x2e8   : > { %v4018_v14 = vsel %vm315_vm2, %v4013_v18, %v4017_v41  ;;  %v4021_v7 = vor.u32 %v15373_v15, %v4017_v41  ;;  %v15380_v18 = vshll.u32 %v15379_v19, 16  ;;  %v15381_v41 = vshrl.u32 %v14445_v20, 16 }
 0x2e9   : > { %10783 = vmatmul.mubr.msk.bf16.vlgmr.msra.gmra.mrb[0].mxu1 %vm448_vm1, %v3994_v46  ;;  %v4029_v46 = vor.u32 %v15374_v37, %v4025_v57  ;;  %8903 = vperm.xlu1 %12203, %v8761_v6   ;;  %v15387_v15 = vshll.u32 %v14463_v40, 16  ;;  %v15388_v6 = vld [vmem:[#allocation9_spill] sm:$0xff]  ;;  %v15395_v19 = vshll.u32 %v14491_v58, 16 }
 0x2ea   : > { %10786 = vmatprep.mubr.msk.bf16.mxu1 %vm448_vm1, %v4002_v56  ;;  %v4033_v56 = vrot.slane %v15376_v42, 1  ;;  %v4026_v13 = vsel %vm315_vm2, %v4021_v7, %v4025_v57  ;;  %v4041_v52 = vrot.slane %v15380_v18, 1  ;;  %v8178_v33 = vrot.slane %v15381_v41, 1 }
 0x2eb   : > { %11195 = vmatmul.mubr.msk.bf16.gmra.mrb[4].mxu0 %vm448_vm1, %v8153_v0  ;;  %v8168_v0 = vor.u32 %v8167_v60, %v8166_v21  ;;  %8908 = vperm.xlu0 %12202, %v8762_v10   ;;  %v15385_v21 = vshll.u32 %v12682_v24, 16  ;;  %v8183_v7 = vrot.slane %v15387_v15, 2  ;;  %v15389_v37 = vshll.u32 %v15388_v6, 16 }
 0x2ec   : > { %11198 = vmatprep.mubr.msk.bf16.mxu0 %vm448_vm1, %v8157_v59  ;;  %v4034_v44 = vsel %vm315_vm2, %v4029_v46, %v4033_v56  ;;  %v8764_v59 = vld [vmem:[%s15158_s2 + $0xf0] sm:$0xff]  ;;  %v8186_v42 = vrot.slane %v7573_v45, 1  ;;  %v8191_v18 = vrot.slane %v15395_v19, 2  ;;  %v8462_v19 = vrot.slane %v14315_v36, 2 }
 0x2ed   : > { %v8169_v29 = vsel %vm1148_vm4, %v8164_v30, %v8168_v0  ;;  %v8173_v53 = vsel %vm1148_vm4, %v8168_v0, %v8172_v26  ;;  %8913 = vperm.xlu1 %12203, %v8763_v43   ;;  %v15383_v30 = vshrl.u32 %v15375_v28, 16  ;;  %v4049_v60 = vrot.slane %v15385_v21, 1 }
 0x2ee   : > { %v4057_v46 = vrot.slane %v15389_v37, 1  ;;  %v15391_v0 = vshrl.u32 %v12682_v24, 16  ;;  %v15394_v24 = vshrl.u32 %v14491_v58, 16 }
 0x2ef   : > { %v4037_v32 = vor.u32 %v15383_v30, %v4033_v56  ;;  %8918 = vperm.xlu0 %12202, %v8764_v59   ;;  %v15390_v56 = vshll.u32 %v14473_v11, 16  ;;  %v15397_v30 = vshrl.u32 %v12716_v51, 16 }
 0x2f0   : > { %v4053_v26 = vor.u32 %v15391_v0, %v4049_v60  ;;  %v8190_v27 = vrot.slane %v15394_v24, 1 }
 0x2f1   : > { %10787 = vmatmul.mubr.msk.bf16.gmra.mrb[4].mxu1 %vm448_vm1, %v4010_v8  ;;  %v8179_v8 = vrot.slane %v15382_v22, 2  ;;  %v4042_v57 = vsel %vm315_vm2, %v4037_v32, %v4041_v52  ;;  %v8187_v10 = vrot.slane %v15390_v56, 2  ;;  %v8194_v22 = vrot.slane %v7589_v4, 1 }
 0x2f2   : > { %10790 = vmatprep.mubr.msk.bf16.mxu1 %vm448_vm1, %v4018_v14  ;;  %v8765_v14 = vld [vmem:[%s15158_s2 + $0xf8] sm:$0xff]  ;;  %v4058_v38 = vsel %vm315_vm2, %v4053_v26, %v4057_v46  ;;  %v8192_v4 = vor.u32 %v8191_v18, %v8190_v27 }
 0x2f3   : > { %11199 = vmatmul.mubr.msk.bf16.gmra.mrb[8].mxu0 %vm448_vm1, %v8161_v49  ;;  %v4045_v49 = vor.u32 %v15384_v9, %v4041_v52  ;;  %v8180_v54 = vor.u32 %v8179_v8, %v8178_v33  ;;  %8923 = vperm.xlu1 %12203, %v8765_v14   ;;  %v8188_v45 = vor.u32 %v8187_v10, %v8186_v42  ;;  %v14891_v52 = vld [vmem:[%s12550_s13 + $0xa0] ss:$0 sps:$4 sm:$0x33]   ;;  %v8195_v8 = vrot.slane %v7585_v1, 2  ;;  %v15404_v10 = vld [vmem:[#allocation11_spill] sm:$0xff] }
 0x2f4   : > { %11202 = vmatprep.mubr.msk.bf16.mxu0 %vm448_vm1, %v8165_v62  ;;  %v15398_v14 = vshrl.u32 %v12740_v25, 16  ;;  %v8202_v1 = vshll.u32 %v14891_v52, 16  ;;  %v15403_v42 = vshrl.u32 %v15400_v31, 16  ;;  %v15405_v0 = vshll.u32 %v15404_v10, 16 }
 0x2f5   : > { %v4050_v62 = vsel %vm315_vm2, %v4045_v49, %v4049_v60  ;;  %v8181_v28 = vsel %vm1148_vm4, %v8176_v63, %v8180_v54  ;;  %v15399_v49 = vshll.u32 %v12750_v34, 16  ;;  %v8199_v60 = vshrl.u32 %v14891_v52, 16 }
 0x2f6   : > { %v8196_v63 = vor.u32 %v8195_v8, %v8194_v22  ;;  %v4097_v26 = vrot.slane %v15405_v0, 1  ;;  %v8466_v22 = vrot.slane %v14343_v55, 2  ;;  %v8468_v8 = vrot.slane %v14368_v3, 2  ;;  %v8971_v0 = vld [vmem:[%s15159_s3 + $0x68] sm:$0xff] }
 0x2f7   : > { %v4081_v21 = vrot.slane %v15399_v49, 1  ;;  %v8474_v55 = vrot.slane %v14417_v5, 2  ;;  %v8476_v3 = vrot.slane %v14435_v48, 2  ;;  %v8480_v48 = vrot.slane %v14463_v40, 2 }
 0x2f8   : > { %v8484_v40 = vrot.slane %v14491_v58, 2  ;;  %v8488_v58 = vrot.slane %v14891_v52, 2  ;;  %v8967_v52 = vld [vmem:[%s15159_s3 + $0x48] sm:$0xff] }
 0x2f9   : > { %10791 = vmatmul.mubr.msk.bf16.gmra.mrb[8].mxu1 %vm448_vm1, %v4026_v13  ;;  %v15392_v13 = vshrl.u32 %v15388_v6, 16  ;;  %v12386_v6 = vld [vmem:[%s12550_s13 + $0x24] sm:$0xf]  ;;  %v8477_v5 = vsel %vm1476_vm5, %v8474_v55, %v8476_v3 }
 0x2fa   : > { %10794 = vmatprep.mubr.msk.bf16.mxu1 %vm448_vm1, %v4034_v44  ;;  %v15393_v44 = vshll.u32 %v12716_v51, 16 }
 0x2fb   : > { %11203 = vmatmul.mubr.msk.bf16.gmra.mrb[12].mxu0 %vm448_vm1, %v8169_v29  ;;  %v4061_v43 = vor.u32 %v15392_v13, %v4057_v46  ;;  %v8184_v29 = vor.u32 %v8183_v7, %v8182_v61  ;;  %v15401_v61 = vshll.u32 %v15400_v31, 16  ;;  %v8197_v7 = vsel %vm1148_vm4, %v8192_v4, %v8196_v63 }
 0x2fc   : > { %11206 = vmatprep.mubr.msk.bf16.mxu0 %vm448_vm1, %v8173_v53  ;;  %v4065_v59 = vrot.slane %v15393_v44, 1  ;;  %v15396_v53 = vshll.u32 %v12740_v25, 16  ;;  %v8193_v25 = vsel %vm1148_vm4, %v8188_v45, %v8192_v4  ;;  %v15402_v46 = vshrl.u32 %v12750_v34, 16 }
 0x2fd   : > { %v8185_v12 = vsel %vm1148_vm4, %v8180_v54, %v8184_v29  ;;  %v8189_v33 = vsel %vm1148_vm4, %v8184_v29, %v8188_v45  ;;  %v8451_v54 = vld [vmem:[%s12550_s13 + $0x20] sm:$0xc]  ;;  %v4089_v15 = vrot.slane %v15401_v61, 1  ;;  %v8458_v44 = vrot.slane %v14284_v39, 2 }
 0x2fe   : > { %v4066_v16 = vsel %vm315_vm2, %v4061_v43, %v4065_v59  ;;  %v4073_v41 = vrot.slane %v15396_v53, 1  ;;  %v4069_v32 = vor.u32 %v15397_v30, %v4065_v59  ;;  %v9913_v37 = vcombine.low %v8451_v54, %v12386_v6  ;;  %v12387_v29 = vld [vmem:[%s12550_s13 + $0x90] ss:$0 sps:$4 sm:$0x11]   ;;  %s189_s13 = scalar_lea.vmem [#allocation2], %s188_s5 }
 0x2ff   : > { %v4093_v56 = vor.u32 %v15403_v42, %v4089_v15  ;;  %v4103_v45 = vshll.u32 %v12387_v29, 16  ;;  %v8460_v39 = vrot.slane %v14308_v50, 2  ;;  %v8470_v30 = vrot.slane %v14378_v17, 2  ;;  %v8969_v42 = vld [vmem:[%s15159_s3 + $0x58] sm:$0xff]  ;;  %s9282_s7 = sshll.u32 %s189_s13, 4  ;;  %s15116_s7 = int_to_ptr.vmem [resolvable:$true] %s9282_s7 }
 0x300   : > { %v4077_v9 = vor.u32 %v15398_v14, %v4073_v41  ;;  %v4074_v51 = vsel %vm315_vm2, %v4069_v32, %v4073_v41  ;;  %v8457_v43 = vrot.slane %v9913_v37, 2  ;;  %v8469_v32 = vsel %vm1476_vm5, %v8466_v22, %v8468_v8  ;;  %v8966_v37 = vld [vmem:[%s15159_s3 + $0x40] sm:$0xff]  ;;  %s12388_s12 = scalar_lea.vmem %s15116_s7, 16  ;;  %p12395_p0 = scmp.lt.s32.totalorder %s15116_s7, %s12393_s14 }
 0x301   : > { %10795 = vmatmul.mubr.msk.bf16.gmra.mrb[12].mxu1 %vm448_vm1, %v4042_v57  ;;  %v4098_v34 = vsel %vm315_vm2, %v4093_v56, %v4097_v26  ;;  %v4105_v27 = vrot.slane %v4103_v45, 1  ;;  %v8461_v53 = vsel %vm1476_vm5, %v8458_v44, %v8460_v39  ;;  %v8463_v41 = vsel %vm1476_vm5, %v8460_v39, %v8462_v19  ;;  %p12389_p11 = scmp.ne.s32.totalorder %s15116_s7, %s12388_s12  ;;  %p12396_p1 = scmp.lt.s32.totalorder %s12394_s20, %s12388_s12 }
 0x302   : > { %10798 = vmatprep.mubr.msk.bf16.mxu1 %vm448_vm1, %v4050_v62  ;;  %v4082_v57 = vsel %vm315_vm2, %v4077_v9, %v4081_v21  ;;  %v8201_v62 = vrot.slane %v8199_v60, 1  ;;  %v8471_v14 = vsel %vm1476_vm5, %v8468_v8, %v8470_v30  ;;  %v8478_v17 = vrot.slane %v14445_v20, 2 }
 0x303   : > { %11207 = vmatmul.mubr.msk.bf16.gmra.mrb[16].mxu0 %vm448_vm1, %v8177_v47  ;;  %v8204_v47 = vrot.slane %v8202_v1, 2  ;;  %v8482_v20 = vrot.slane %v14473_v11, 2  ;;  %v8960_v1 = vld [vmem:[%s15159_s3 + $0x10] sm:$0xff]  ;;  %v8486_v11 = vrot.slane %v14501_v35, 2  ;;  %p12390_p12 = pnand %p12389_p11, %p12517_p5  ;;  %p12397_p2 = por %p12396_p1, %p12395_p0 }
 0x304   : > { %11210 = vmatprep.mubr.msk.bf16.mxu0 %vm448_vm1, %v8181_v28  ;;  %v4085_v28 = vor.u32 %v15402_v46, %v4081_v21  ;;  %v8958_v21 = vld [vmem:[%s15159_s3] sm:$0xff]  ;;  %v8479_v60 = vsel %vm1476_vm5, %v8476_v3, %v8478_v17  ;;  %v8964_v35 = vld [vmem:[%s15159_s3 + $0x30] sm:$0xff]  ;;  %v11352_v46 = vpack.c.bf16 %v8967_v52, %v8966_v37 }
 0x305   : > { %v8205_v13 = vor.u32 %v8204_v47, %v8201_v62  ;;  %v8963_v62 = vld [vmem:[%s15159_s3 + $0x28] sm:$0xff]  ;;  %v8485_v47 = vsel %vm1476_vm5, %v8482_v20, %v8484_v40  ;;  %v8487_v61 = vsel %vm1476_vm5, %v8484_v40, %v8486_v11  ;;  %p12391_p13 = pneg %p12390_p12 }
 0x306   : > { %v4090_v59 = vsel %vm315_vm2, %v4085_v28, %v4089_v15  ;;  %v8965_v15 = vld [vmem:[%s15159_s3 + $0x38] sm:$0xff]  ;;  %v8968_v28 = vld [vmem:[%s15159_s3 + $0x50] sm:$0xff] }
 0x307   : > { %v11348_v6 = vpack.c.bf16 %v8965_v15, %v8964_v35  ;;  %v11356_v56 = vpack.c.bf16 %v8969_v42, %v8968_v28  ;;  %p12398_p3 = pnand %p12397_p2, %p12391_p13 }
 0x309   : > { %10799 = vmatmul.mubr.msk.bf16.gmra.mrb[16].mxu1 %vm448_vm1, %v4058_v38  ;;  %v8206_v38 = vsel %vm1148_vm4, %v8196_v63, %v8205_v13  ;;  %v8961_v63 = vld [vmem:[%s15159_s3 + $0x18] sm:$0xff]  ;;  %v8972_v13 = vld [vmem:[%s15159_s3 + $0x70] sm:$0xff] }
 0x30a   : > { %10802 = vmatprep.mubr.msk.bf16.mxu1 %vm448_vm1, %v4066_v16  ;;  %v8459_v16 = vsel %vm1476_vm5, %v8457_v43, %v8458_v44  ;;  %v11340_v54 = vpack.c.bf16 %v8961_v63, %v8960_v1  ;;  %v8973_v43 = vld [vmem:[%s15159_s3 + $0x78] sm:$0xff] }
 0x30b   : > { %11211 = vmatmul.mubr.msk.bf16.gmra.mrb[20].mxu0 %vm448_vm1, %v8185_v12  ;;  %v15406_v12 = vshrl.u32 %v15404_v10, 16  ;;  %v8970_v10 = vld [vmem:[%s15159_s3 + $0x60] sm:$0xff]  ;;  %v11364_v44 = vpack.c.bf16 %v8973_v43, %v8972_v13 }
 0x30c   : > { %11214 = vmatprep.mubr.msk.bf16.mxu0 %vm448_vm1, %v8189_v33  ;;  %v8464_v33 = vrot.slane %v14333_v2, 2  ;;  %v8472_v2 = vrot.slane %v14405_v23, 2  ;;  %v8959_v23 = vld [vmem:[%s15159_s3 + $0x8] sm:$0xff] }
 0x30d   : > { %v4101_v24 = vor.u32 %v15406_v12, %v4097_v26  ;;  %v11336_v4 = vpack.c.bf16 %v8959_v23, %v8958_v21  ;;  %v11360_v26 = vpack.c.bf16 %v8971_v0, %v8970_v10 }
 0x30e   : > { %v8465_v50 = vsel %vm1476_vm5, %v8462_v19, %v8464_v33  ;;  %v8467_v36 = vsel %vm1476_vm5, %v8464_v33, %v8466_v22  ;;  %v8473_v9 = vsel %vm1476_vm5, %v8470_v30, %v8472_v2  ;;  %v8475_v49 = vsel %vm1476_vm5, %v8472_v2, %v8474_v55 }
 0x30f   : > { %v4106_v18 = vsel %vm315_vm2, %v4101_v24, %v4105_v27  ;;  %11337 = vmatprep.subr.bf16.mxu1 %v11336_v4 }
 0x310   : > { %11339 = vmatpush3.bf16.msra.mxu1 %v11336_v4 }
 0x311   : > { %10803 = vmatmul.mubr.msk.bf16.gmra.mrb[20].mxu1 %vm448_vm1, %v4074_v51  ;;  %v8481_v51 = vsel %vm1476_vm5, %v8478_v17, %v8480_v48  ;;  %11341 = vmatprep.subr.bf16.mxu1 %v11340_v54 }
 0x312   : > { %10806 = vmatprep.mubr.msk.bf16.mxu1 %vm448_vm1, %v4082_v57  ;;  %v8483_v57 = vsel %vm1476_vm5, %v8480_v48, %v8482_v20 }
 0x313   : > { %11215 = vmatmul.mubr.msk.bf16.gmra.mrb[24].mxu0 %vm448_vm1, %v8193_v25  ;;  %v8962_v25 = vld [vmem:[%s15159_s3 + $0x20] sm:$0xff] }
 0x314   : > { %11218 = vmatprep.mubr.msk.bf16.mxu0 %vm448_vm1, %v8197_v7  ;;  %11343 = vmatpush3.bf16.msra.mxu1 %v11340_v54  ;;  %v11344_v31 = vpack.c.bf16 %v8963_v62, %v8962_v25  ;;  %v8489_v7 = vsel %vm1476_vm5, %v8486_v11, %v8488_v58 }
 0x316   : > { %11345 = vmatprep.subr.bf16.mxu1 %v11344_v31 }
 0x318   : > { %11347 = vmatpush3.bf16.msra.mxu1 %v11344_v31 }
 0x319   : > { %10807 = vmatmul.mubr.msk.bf16.gmra.mrb[24].mxu1 %vm448_vm1, %v4090_v59  ;;  %11349 = vmatprep.subr.bf16.mxu1 %v11348_v6 }
 0x31a   : > { %10810 = vmatprep.mubr.msk.bf16.mxu1 %vm448_vm1, %v4098_v34 }
 0x31b   : > { %11219 = vmatmul.mubr.msk.bf16.gmra.mrb[28].mxu0 %vm448_vm1, %v8206_v38 }
 0x31c   : > { %11224 = vmatprep.mubr.msk.bf16.mxu0 %vm448_vm1, %v8459_v16  ;;  %11351 = vmatpush3.bf16.msra.mxu1 %v11348_v6 }
 0x31d   : > { %11353 = vmatprep.subr.bf16.mxu1 %v11352_v46 }
 0x320   : > { %11355 = vmatpush3.bf16.msra.mxu1 %v11352_v46 }
 0x321   : > { %10811 = vmatmul.mubr.msk.bf16.gmra.mrb[28].mxu1 %vm448_vm1, %v4106_v18  ;;  %11357 = vmatprep.subr.bf16.mxu1 %v11356_v56 }
 0x323   : > { %11225 = vmatmul.mubr.msk.bf16.vlgmr.msra.gmra.mrb[0].mxu0 %vm448_vm1, %v8461_v53 }
 0x324   : > { %11228 = vmatprep.mubr.msk.bf16.mxu0 %vm448_vm1, %v8463_v41  ;;  %11359 = vmatpush3.bf16.msra.mxu1 %v11356_v56 }
 0x325   : > { %11361 = vmatprep.subr.bf16.mxu1 %v11360_v26 }
 0x328   : > { %11363 = vmatpush3.bf16.msra.mxu1 %v11360_v26 }
 0x329   : > { %11365 = vmatprep.subr.bf16.mxu1 %v11364_v44 }
 0x32a   : > { %v8779_v8 = vpop.permute.xlu1 %8778 }
 0x32b   : > { %11229 = vmatmul.mubr.msk.bf16.gmra.mrb[4].mxu0 %vm448_vm1, %v8465_v50  ;;  %v8769_v50 = vpop.permute.xlu0 %8768 }
 0x32c   : > { %11232 = vmatprep.mubr.msk.bf16.mxu0 %vm448_vm1, %v8467_v36  ;;  %11367 = vmatpush3.bf16.msra.mxu1 %v11364_v44 }
 0x32f   : > { %v8774_v2 = vpop.permute.xlu0 %8773 }
 0x333   : > { %11233 = vmatmul.mubr.msk.bf16.gmra.mrb[8].mxu0 %vm448_vm1, %v8469_v32  ;;  %v8784_v55 = vpop.permute.xlu1 %8783 }
 0x334   : > { %11236 = vmatprep.mubr.msk.bf16.mxu0 %vm448_vm1, %v8471_v14  ;;  %v8789_v3 = vpop.permute.xlu0 %8788 }
 0x337   : > { %v8794_v23 = vpop.permute.xlu1 %8793 }
 0x33b   : > { %11237 = vmatmul.mubr.msk.bf16.gmra.mrb[12].mxu0 %vm448_vm1, %v8473_v9 }
 0x33c   : > { %11240 = vmatprep.mubr.msk.bf16.mxu0 %vm448_vm1, %v8475_v49  ;;  %v8804_v20 = vpop.permute.xlu1 %8803 }
 0x340   : > { %v8814_v54 = vpop.permute.xlu1 %8813 }
 0x343   : > { %11241 = vmatmul.mubr.msk.bf16.gmra.mrb[16].mxu0 %vm448_vm1, %v8477_v5  ;;  %v8799_v5 = vpop.permute.xlu0 %8798 }
 0x344   : > { %11244 = vmatprep.mubr.msk.bf16.mxu0 %vm448_vm1, %v8479_v60  ;;  %v8824_v37 = vpop.permute.xlu1 %8823 }
 0x347   : > { %v8809_v63 = vpop.permute.xlu0 %8808 }
 0x348   : > { %v8834_v43 = vpop.permute.xlu1 %8833 }
 0x34b   : > { %11245 = vmatmul.mubr.msk.bf16.gmra.mrb[20].mxu0 %vm448_vm1, %v8481_v51  ;;  %v8819_v31 = vpop.permute.xlu0 %8818 }
 0x34c   : > { %11248 = vmatprep.mubr.msk.bf16.mxu0 %vm448_vm1, %v8483_v57 }
 0x34f   : > { %v8829_v28 = vpop.permute.xlu0 %8828 }
 0x353   : > { %11249 = vmatmul.mubr.msk.bf16.gmra.mrb[24].mxu0 %vm448_vm1, %v8485_v47 }
 0x354   : > { %11252 = vmatprep.mubr.msk.bf16.mxu0 %vm448_vm1, %v8487_v61 }
 0x35b   : > { %11253 = vmatmul.mubr.msk.bf16.gmra.mrb[28].mxu0 %vm448_vm1, %v8489_v7 }
 0x3bc   : > { %v10784_v59 = vpop.f32.mrb[0].mxu1 }
 0x3bd   : > { %v4192_v29 = vpop.f32.mrb[1].mxu1 }
 0x3be   : > { %v10785_v45 = vpop.f32.mrb[2].mxu1 }
 0x3bf   : > { %v4195_v34 = vpop.f32.mrb[3].mxu1 }
 0x3c4   : > { %v10788_v38 = vpop.f32.mrb[4].mxu1 }
 0x3c5   : > { %v4208_v16 = vpop.f32.mrb[5].mxu1 }
 0x3c6   : > { %v10789_v12 = vpop.f32.mrb[6].mxu1 }
 0x3c7   : > { %v4211_v24 = vpop.f32.mrb[7].mxu1 }
 0x3cc   : > { %v15037_v27 = vpop.f32.mrb[8].mxu1 }
 0x3cd   : > { %v15039_v39 = vpop.f32.mrb[9].mxu1 }
 0x3ce   : > { %v15041_v19 = vpop.f32.mrb[10].mxu1 }
 0x3cf   : > { %v15043_v18 = vpop.f32.mrb[11].mxu1 }
 0x3d4   : > { %v15045_v53 = vpop.f32.mrb[12].mxu1 }
 0x3d5   : > { %v15047_v41 = vpop.f32.mrb[13].mxu1 }
 0x3d6   : > { %v15049_v33 = vpop.f32.mrb[14].mxu1 }
 0x3d7   : > { %v15051_v22 = vpop.f32.mrb[15].mxu1 }
 0x3dc   : > { %v15053_v36 = vpop.f32.mrb[16].mxu1 }
 0x3dd   : > { %v15055_v30 = vpop.f32.mrb[17].mxu1 }
 0x3de   : > { %v15057_v32 = vpop.f32.mrb[18].mxu1 }
 0x3df   : > { %v15059_v14 = vpop.f32.mrb[19].mxu1 }
 0x3e4   : > { %v15061_v9 = vpop.f32.mrb[20].mxu1 }
 0x3e5   : > { %v15063_v49 = vpop.f32.mrb[21].mxu1 }
 0x3e6   : > { %v15065_v17 = vpop.f32.mrb[22].mxu1 }
 0x3e7   : > { %v15067_v21 = vpop.f32.mrb[23].mxu1 }
 0x3ec   : > { %v15069_v4 = vpop.f32.mrb[24].mxu1 }
 0x3ed   : > { %v15071_v60 = vpop.f32.mrb[25].mxu1 }
 0x3ee   : > { %v15073_v48 = vpop.f32.mrb[26].mxu1 }
 0x3ef   : > { %v15075_v1 = vpop.f32.mrb[27].mxu1 }
 0x3f4   : > { %v15077_v51 = vpop.f32.mrb[28].mxu1 }
 0x3f5   : > { %v15079_v57 = vpop.f32.mrb[29].mxu1 }
 0x3f6   : > { %v15081_v40 = vpop.f32.mrb[30].mxu1  ;;  %v11226_v11 = vpop.f32.mrb[0].mxu0 }
 0x3f7   : > { %v15083_v25 = vpop.f32.mrb[31].mxu1  ;;  %v11368_v62 = vadd.f32 %v11226_v11, %v10784_v59  ;;  %v8575_v47 = vpop.f32.mrb[1].mxu0 }
 0x3f8   : > { %v11369_v61 = vadd.f32 %v8575_v47, %v4192_v29  ;;  %v11227_v58 = vpop.f32.mrb[2].mxu0  ;;  %v8844_v11 = vpop.permute.xlu1 %8843 }
 0x3f9   : > { %v11370_v35 = vadd.f32 %v11227_v58, %v10785_v45  ;;  %v8578_v15 = vpop.f32.mrb[3].mxu0  ;;  %v8928_v46 = vmul.f32 %v11368_v62, %v8779_v8 }
 0x3fa   : > { %v8926_v7 = vmul.f32 %v11369_v61, %v8769_v50  ;;  %v11371_v6 = vadd.f32 %v8578_v15, %v4195_v34  ;;  %v8839_v34 = vpop.permute.xlu0 %8838 }
 0x3fb   : > { %v8929_v0 = vmul.f32 %v11370_v35, %v8784_v55 }
 0x3fc   : > { %v8927_v52 = vmul.f32 %v11371_v6, %v8774_v2  ;;  %11288 = vmatprep.mubr.f32.mxu1 %v8926_v7  ;;  %v8854_v58 = vpop.permute.xlu1 %8853 }
 0x3fe   : > { %v11230_v42 = vpop.f32.mrb[4].mxu0  ;;  %11289 = vmatmul.mubr.f32.vlgmr.msra.gmra.mrb[32].mxu1 %v8927_v52 }
 0x3ff   : > { %v11372_v56 = vadd.f32 %v11230_v42, %v10788_v38  ;;  %v8591_v10 = vpop.f32.mrb[5].mxu0  ;;  %11291 = vmatprep.mubr.f32.mxu1 %v8928_v46 }
 0x400   : > { %v11373_v26 = vadd.f32 %v8591_v10, %v4208_v16  ;;  %v11231_v13 = vpop.f32.mrb[6].mxu0  ;;  %v8864_v46 = vpop.permute.xlu1 %8863 }
 0x401   : > { %v11374_v44 = vadd.f32 %v11231_v13, %v10789_v12  ;;  %v8594_v59 = vpop.f32.mrb[7].mxu0  ;;  %v8932_v2 = vmul.f32 %v11372_v56, %v8799_v5 }
 0x402   : > { %v8930_v29 = vmul.f32 %v11373_v26, %v8789_v3  ;;  %v11375_v45 = vadd.f32 %v8594_v59, %v4211_v24  ;;  %11292 = vmatmul.mubr.f32.gmra.mrb[34].mxu1 %v8929_v0  ;;  %v8849_v24 = vpop.permute.xlu0 %8848 }
 0x403   : > { %v8933_v55 = vmul.f32 %v11374_v44, %v8804_v20 }
 0x404   : > { %v8931_v50 = vmul.f32 %v11375_v45, %v8794_v23  ;;  %11294 = vmatprep.mubr.f32.mxu1 %v8930_v29  ;;  %v8874_v26 = vpop.permute.xlu1 %8873 }
 0x406   : > { %v11234_v8 = vpop.f32.mrb[8].mxu0  ;;  %11295 = vmatmul.mubr.f32.gmra.mrb[36].mxu1 %v8931_v50 }
 0x407   : > { %v11376_v38 = vadd.f32 %v11234_v8, %v15037_v27  ;;  %v8607_v62 = vpop.f32.mrb[9].mxu0  ;;  %11297 = vmatprep.mubr.f32.mxu1 %v8932_v2 }
 0x408   : > { %v11377_v16 = vadd.f32 %v8607_v62, %v15039_v39  ;;  %v11235_v47 = vpop.f32.mrb[10].mxu0  ;;  %v8859_v39 = vpop.permute.xlu0 %8858 }
 0x409   : > { %v11378_v12 = vadd.f32 %v11235_v47, %v15041_v19  ;;  %v8610_v3 = vpop.f32.mrb[11].mxu0  ;;  %v8936_v35 = vmul.f32 %v11376_v38, %v8819_v31 }
 0x40a   : > { %v8934_v61 = vmul.f32 %v11377_v16, %v8809_v63  ;;  %v11379_v23 = vadd.f32 %v8610_v3, %v15043_v18  ;;  %11298 = vmatmul.mubr.f32.gmra.mrb[38].mxu1 %v8933_v55 }
 0x40b   : > { %v8937_v7 = vmul.f32 %v11378_v12, %v8824_v37 }
 0x40c   : > { %v8935_v5 = vmul.f32 %v11379_v23, %v8814_v54  ;;  %11300 = vmatprep.mubr.f32.mxu1 %v8934_v61  ;;  %v8869_v56 = vpop.permute.xlu0 %8868 }
 0x40e   : > { %v11238_v15 = vpop.f32.mrb[12].mxu0  ;;  %11301 = vmatmul.mubr.f32.gmra.mrb[40].mxu1 %v8935_v5 }
 0x40f   : > { %v11380_v27 = vadd.f32 %v11238_v15, %v15045_v53  ;;  %v8623_v20 = vpop.f32.mrb[13].mxu0  ;;  %11303 = vmatprep.mubr.f32.mxu1 %v8936_v35 }
 0x410   : > { %v11381_v19 = vadd.f32 %v8623_v20, %v15047_v41  ;;  %v11239_v6 = vpop.f32.mrb[14].mxu0  ;;  %v8879_v44 = vpop.permute.xlu0 %8878 }
 0x411   : > { %v11382_v63 = vadd.f32 %v11239_v6, %v15049_v33  ;;  %v8626_v52 = vpop.f32.mrb[15].mxu0  ;;  %v8940_v42 = vmul.f32 %v11380_v27, %v8839_v34 }
 0x412   : > { %v8938_v18 = vmul.f32 %v11381_v19, %v8829_v28  ;;  %v11383_v54 = vadd.f32 %v8626_v52, %v15051_v22  ;;  %11304 = vmatmul.mubr.f32.gmra.mrb[42].mxu1 %v8937_v7 }
 0x413   : > { %v8941_v41 = vmul.f32 %v11382_v63, %v8844_v11 }
 0x414   : > { %v8939_v31 = vmul.f32 %v11383_v54, %v8834_v43  ;;  %11306 = vmatprep.mubr.f32.mxu1 %v8938_v18 }
 0x416   : > { %v11242_v53 = vpop.f32.mrb[16].mxu0  ;;  %11307 = vmatmul.mubr.f32.gmra.mrb[44].mxu1 %v8939_v31 }
 0x417   : > { %v11384_v10 = vadd.f32 %v11242_v53, %v15053_v36  ;;  %v8639_v37 = vpop.f32.mrb[17].mxu0  ;;  %11309 = vmatprep.mubr.f32.mxu1 %v8940_v42  ;;  %v8884_v36 = vpop.permute.xlu1 %8883 }
 0x418   : > { %v11385_v0 = vadd.f32 %v8639_v37, %v15055_v30  ;;  %v11243_v33 = vpop.f32.mrb[18].mxu0 }
 0x419   : > { %v11386_v28 = vadd.f32 %v11243_v33, %v15057_v32  ;;  %v8642_v22 = vpop.f32.mrb[19].mxu0  ;;  %v8944_v29 = vmul.f32 %v11384_v10, %v8859_v39 }
 0x41a   : > { %v8942_v13 = vmul.f32 %v11385_v0, %v8849_v24  ;;  %v11387_v43 = vadd.f32 %v8642_v22, %v15059_v14  ;;  %11310 = vmatmul.mubr.f32.gmra.mrb[46].mxu1 %v8941_v41  ;;  %v8889_v14 = vpop.permute.xlu0 %8888 }
 0x41b   : > { %v8945_v30 = vmul.f32 %v11386_v28, %v8864_v46  ;;  %v8894_v16 = vpop.permute.xlu1 %8893 }
 0x41c   : > { %v8943_v59 = vmul.f32 %v11387_v43, %v8854_v58  ;;  %11312 = vmatprep.mubr.f32.mxu1 %v8942_v13 }
 0x41e   : > { %v11246_v45 = vpop.f32.mrb[20].mxu0  ;;  %11313 = vmatmul.mubr.f32.gmra.mrb[48].mxu1 %v8943_v59 }
 0x41f   : > { %v11388_v34 = vadd.f32 %v11246_v45, %v15061_v9  ;;  %v8655_v50 = vpop.f32.mrb[21].mxu0  ;;  %11315 = vmatprep.mubr.f32.mxu1 %v8944_v29  ;;  %v8904_v35 = vpop.permute.xlu1 %8903 }
 0x420   : > { %v11389_v2 = vadd.f32 %v8655_v50, %v15063_v49  ;;  %v11247_v32 = vpop.f32.mrb[22].mxu0  ;;  %v8899_v49 = vpop.permute.xlu0 %8898 }
 0x421   : > { %v11390_v8 = vadd.f32 %v11247_v32, %v15065_v17  ;;  %v8658_v11 = vpop.f32.mrb[23].mxu0  ;;  %v8948_v47 = vmul.f32 %v11388_v34, %v8879_v44 }
 0x422   : > { %v8946_v38 = vmul.f32 %v11389_v2, %v8869_v56  ;;  %v11391_v62 = vadd.f32 %v8658_v11, %v15067_v21  ;;  %11316 = vmatmul.mubr.f32.gmra.mrb[50].mxu1 %v8945_v30 }
 0x423   : > { %v8949_v24 = vmul.f32 %v11390_v8, %v8884_v36  ;;  %v8914_v6 = vpop.permute.xlu1 %8913 }
 0x424   : > { %v8947_v55 = vmul.f32 %v11391_v62, %v8874_v26  ;;  %11318 = vmatprep.mubr.f32.mxu1 %v8946_v38  ;;  %v8909_v20 = vpop.permute.xlu0 %8908 }
 0x426   : > { %v11250_v12 = vpop.f32.mrb[24].mxu0  ;;  %11319 = vmatmul.mubr.f32.gmra.mrb[52].mxu1 %v8947_v55 }
 0x427   : > { %v11392_v9 = vadd.f32 %v11250_v12, %v15069_v4  ;;  %v8671_v3 = vpop.f32.mrb[25].mxu0  ;;  %11321 = vmatprep.mubr.f32.mxu1 %v8948_v47 }
 0x428   : > { %v11393_v17 = vadd.f32 %v8671_v3, %v15071_v60  ;;  %v11251_v61 = vpop.f32.mrb[26].mxu0  ;;  %v8919_v54 = vpop.permute.xlu0 %8918 }
 0x429   : > { %v11394_v23 = vadd.f32 %v11251_v61, %v15073_v48  ;;  %v8674_v5 = vpop.f32.mrb[27].mxu0  ;;  %v8952_v27 = vmul.f32 %v11392_v9, %v8899_v49 }
 0x42a   : > { %v8950_v21 = vmul.f32 %v11393_v17, %v8889_v14  ;;  %v11395_v58 = vadd.f32 %v8674_v5, %v15075_v1  ;;  %11322 = vmatmul.mubr.f32.gmra.mrb[54].mxu1 %v8949_v24 }
 0x42b   : > { %v8953_v60 = vmul.f32 %v11394_v23, %v8904_v35 }
 0x42c   : > { %v8951_v15 = vmul.f32 %v11395_v58, %v8894_v16  ;;  %11324 = vmatprep.mubr.f32.mxu1 %v8950_v21 }
 0x42e   : > { %v11254_v4 = vpop.f32.mrb[28].mxu0  ;;  %11325 = vmatmul.mubr.f32.gmra.mrb[56].mxu1 %v8951_v15 }
 0x42f   : > { %v11396_v39 = vadd.f32 %v11254_v4, %v15077_v51  ;;  %v8687_v7 = vpop.f32.mrb[29].mxu0  ;;  %11327 = vmatprep.mubr.f32.mxu1 %v8952_v27  ;;  %v8924_v51 = vpop.permute.xlu1 %8923 }
 0x430   : > { %v11397_v19 = vadd.f32 %v8687_v7, %v15079_v57  ;;  %v11255_v48 = vpop.f32.mrb[30].mxu0 }
 0x431   : > { %v11398_v63 = vadd.f32 %v11255_v48, %v15081_v40  ;;  %v8690_v1 = vpop.f32.mrb[31].mxu0  ;;  %v8956_v31 = vmul.f32 %v11396_v39, %v8919_v54 }
 0x432   : > { %v8954_v52 = vmul.f32 %v11397_v19, %v8909_v20  ;;  %v11399_v18 = vadd.f32 %v8690_v1, %v15083_v25  ;;  %11328 = vmatmul.mubr.f32.gmra.mrb[58].mxu1 %v8953_v60 }
 0x433   : > { %v8957_v42 = vmul.f32 %v11398_v63, %v8924_v51 }
 0x434   : > { %v8955_v46 = vmul.f32 %v11399_v18, %v8914_v6  ;;  %11330 = vmatprep.mubr.f32.mxu1 %v8954_v52 }
 0x436   : > { %11331 = vmatmul.mubr.f32.gmra.mrb[60].mxu1 %v8955_v46 }
 0x437   : > { %11333 = vmatprep.mubr.f32.mxu1 %v8956_v31 }
 0x43a   : > { %11334 = vmatmul.mubr.f32.gmra.mrb[62].mxu1 %v8957_v42 }
 0x4d1   : > { %v11290_v56 = vpop.f32.mrb[32].mxu1 }
 0x4d2   : > { %v9200_v57 = vmul.f32 %v11290_v56, %v11290_v56  ;;  %v9040_v53 = vpop.f32.mrb[33].mxu1 }
 0x4d3   : > { %v9199_v10 = vmul.f32 %v9040_v53, %v9040_v53 }
 0x4d5   : > { %v9231_v37 = vadd.f32 %v9200_v57, %v9199_v10  ;;  %v11293_v40 = vpop.f32.mrb[34].mxu1 }
 0x4d6   : > { %v9050_v41 = vpop.f32.mrb[35].mxu1  ;;  %v9202_v33 = vmul.f32 %v11293_v40, %v11293_v40 }
 0x4d7   : > { %v9201_v0 = vmul.f32 %v9050_v41, %v9050_v41 }
 0x4d9   : > { %v9232_v25 = vadd.f32 %v9231_v37, %v9201_v0  ;;  %v11296_v26 = vpop.f32.mrb[36].mxu1 }
 0x4da   : > { %v9060_v28 = vpop.f32.mrb[37].mxu1  ;;  %v9204_v43 = vmul.f32 %v11296_v26, %v11296_v26 }
 0x4db   : > { %v9203_v22 = vmul.f32 %v9060_v28, %v9060_v28  ;;  %v9233_v13 = vadd.f32 %v9232_v25, %v9202_v33 }
 0x4dd   : > { %v9234_v44 = vadd.f32 %v9233_v13, %v9203_v22  ;;  %v11299_v59 = vpop.f32.mrb[38].mxu1 }
 0x4de   : > { %v9070_v29 = vpop.f32.mrb[39].mxu1  ;;  %v9206_v34 = vmul.f32 %v11299_v59, %v11299_v59 }
 0x4df   : > { %v9205_v45 = vmul.f32 %v9070_v29, %v9070_v29  ;;  %v9235_v36 = vadd.f32 %v9234_v44, %v9204_v43 }
 0x4e1   : > { %v9236_v50 = vadd.f32 %v9235_v36, %v9205_v45  ;;  %v11302_v30 = vpop.f32.mrb[40].mxu1 }
 0x4e2   : > { %v9080_v2 = vpop.f32.mrb[41].mxu1  ;;  %v9208_v11 = vmul.f32 %v11302_v30, %v11302_v30 }
 0x4e3   : > { %v9207_v32 = vmul.f32 %v9080_v2, %v9080_v2  ;;  %v9237_v8 = vadd.f32 %v9236_v50, %v9206_v34 }
 0x4e5   : > { %v9238_v14 = vadd.f32 %v9237_v8, %v9207_v32  ;;  %v11305_v38 = vpop.f32.mrb[42].mxu1 }
 0x4e6   : > { %v9090_v62 = vpop.f32.mrb[43].mxu1  ;;  %v9210_v47 = vmul.f32 %v11305_v38, %v11305_v38 }
 0x4e7   : > { %v9209_v55 = vmul.f32 %v9090_v62, %v9090_v62  ;;  %v9239_v16 = vadd.f32 %v9238_v14, %v9208_v11 }
 0x4e9   : > { %v9240_v12 = vadd.f32 %v9239_v16, %v9209_v55  ;;  %v11308_v9 = vpop.f32.mrb[44].mxu1 }
 0x4ea   : > { %v9100_v3 = vpop.f32.mrb[45].mxu1  ;;  %v9212_v17 = vmul.f32 %v11308_v9, %v11308_v9 }
 0x4eb   : > { %v9211_v49 = vmul.f32 %v9100_v3, %v9100_v3  ;;  %v9241_v24 = vadd.f32 %v9240_v12, %v9210_v47 }
 0x4ed   : > { %v9242_v61 = vadd.f32 %v9241_v24, %v9211_v49  ;;  %v11311_v23 = vpop.f32.mrb[46].mxu1 }
 0x4ee   : > { %v9110_v5 = vpop.f32.mrb[47].mxu1  ;;  %v9214_v35 = vmul.f32 %v11311_v23, %v11311_v23 }
 0x4ef   : > { %v9213_v21 = vmul.f32 %v9110_v5, %v9110_v5  ;;  %v9243_v58 = vadd.f32 %v9242_v61, %v9212_v17 }
 0x4f1   : > { %v9244_v15 = vadd.f32 %v9243_v58, %v9213_v21  ;;  %v11314_v27 = vpop.f32.mrb[48].mxu1 }
 0x4f2   : > { %v9120_v20 = vpop.f32.mrb[49].mxu1  ;;  %v9216_v7 = vmul.f32 %v11314_v27, %v11314_v27 }
 0x4f3   : > { %v9215_v4 = vmul.f32 %v9120_v20, %v9120_v20  ;;  %v9245_v39 = vadd.f32 %v9244_v15, %v9214_v35 }
 0x4f5   : > { %v9246_v60 = vadd.f32 %v9245_v39, %v9215_v4  ;;  %v11317_v19 = vpop.f32.mrb[50].mxu1 }
 0x4f6   : > { %v9130_v48 = vpop.f32.mrb[51].mxu1  ;;  %v9218_v1 = vmul.f32 %v11317_v19, %v11317_v19 }
 0x4f7   : > { %v9217_v6 = vmul.f32 %v9130_v48, %v9130_v48  ;;  %v9247_v63 = vadd.f32 %v9246_v60, %v9216_v7 }
 0x4f9   : > { %v9248_v52 = vadd.f32 %v9247_v63, %v9217_v6  ;;  %v11320_v18 = vpop.f32.mrb[52].mxu1 }
 0x4fa   : > { %v9140_v54 = vpop.f32.mrb[53].mxu1  ;;  %v9220_v51 = vmul.f32 %v11320_v18, %v11320_v18 }
 0x4fb   : > { %v9219_v46 = vmul.f32 %v9140_v54, %v9140_v54  ;;  %v9249_v31 = vadd.f32 %v9248_v52, %v9218_v1 }
 0x4fd   : > { %v9250_v42 = vadd.f32 %v9249_v31, %v9219_v46  ;;  %v11323_v56 = vpop.f32.mrb[54].mxu1 }
 0x4fe   : > { %v9150_v57 = vpop.f32.mrb[55].mxu1  ;;  %v9222_v37 = vmul.f32 %v11323_v56, %v11323_v56 }
 0x4ff   : > { %v9221_v53 = vmul.f32 %v9150_v57, %v9150_v57  ;;  %v9251_v10 = vadd.f32 %v9250_v42, %v9220_v51 }
 0x501   : > { %v9252_v40 = vadd.f32 %v9251_v10, %v9221_v53  ;;  %v11326_v41 = vpop.f32.mrb[56].mxu1 }
 0x502   : > { %v9160_v0 = vpop.f32.mrb[57].mxu1  ;;  %v9224_v26 = vmul.f32 %v11326_v41, %v11326_v41 }
 0x503   : > { %v9223_v33 = vmul.f32 %v9160_v0, %v9160_v0  ;;  %v9253_v25 = vadd.f32 %v9252_v40, %v9222_v37 }
 0x505   : > { %v9254_v28 = vadd.f32 %v9253_v25, %v9223_v33  ;;  %v11329_v22 = vpop.f32.mrb[58].mxu1 }
 0x506   : > { %v9170_v13 = vpop.f32.mrb[59].mxu1  ;;  %v9226_v59 = vmul.f32 %v11329_v22, %v11329_v22 }
 0x507   : > { %v9225_v43 = vmul.f32 %v9170_v13, %v9170_v13  ;;  %v9255_v44 = vadd.f32 %v9254_v28, %v9224_v26 }
 0x509   : > { %v9256_v29 = vadd.f32 %v9255_v44, %v9225_v43  ;;  %v11332_v45 = vpop.f32.mrb[60].mxu1 }
 0x50a   : > { %v9180_v36 = vpop.f32.mrb[61].mxu1  ;;  %v9228_v30 = vmul.f32 %v11332_v45, %v11332_v45 }
 0x50b   : > { %v9227_v34 = vmul.f32 %v9180_v36, %v9180_v36  ;;  %v9257_v50 = vadd.f32 %v9256_v29, %v9226_v59 }
 0x50d   : > { %v9258_v2 = vadd.f32 %v9257_v50, %v9227_v34  ;;  %v11335_v32 = vpop.f32.mrb[62].mxu1 }
 0x50e   : > { %v9190_v8 = vpop.f32.mrb[63].mxu1  ;;  %v9230_v38 = vmul.f32 %v11335_v32, %v11335_v32 }
 0x50f   : > { %v9229_v11 = vmul.f32 %v9190_v8, %v9190_v8  ;;  %v9259_v14 = vadd.f32 %v9258_v2, %v9228_v30 }
 0x511   : > { %v9260_v62 = vadd.f32 %v9259_v14, %v9229_v11 }
 0x513   : > { %v9261_v55 = vadd.f32 %v9260_v62, %v9230_v38 }
 0x515   : > { %v9262_v16 = vrot.slane %v9261_v55, 4 }
 0x517   : > { %v9263_v47 = vadd.f32 %v9262_v16, %v9261_v55 }
 0x519   : > { %v9264_v12 = vrot.slane %v9263_v47, 2 }
 0x51b   : > { %v9265_v9 = vadd.f32 %v9264_v12, %v9263_v47 }
 0x51d   : > { %v9266_v3 = vrot.slane %v9265_v9, 1 }
 0x51f   : > { %v9267_v49 = vadd.f32 %v9266_v3, %v9265_v9 }
 0x521   : > { %9268 = vst [vmem:[%s189_s13] sm:$0x1] %v9267_v49 }
 0x522   : > { %12401 = shalt.err (!%p12398_p3)
}
 0x523   : > { %s12402_s22 = scalar_lea.hbm %s15114_s10, 16  ;;  %s12406_s28 = scalar_lea.hbm %s15160_s4, 32 }
 0x524   : > { %p12403_p4 = scmp.ne.s32.totalorder %s15114_s10, %s12402_s22  ;;  %p12407_p9 = scmp.lt.u32.totalorder %s15114_s10, %s15160_s4 }
 0x525   : > { %p12408_p10 = scmp.lt.u32.totalorder %s12406_s28, %s12402_s22  ;;  %p12410_p12 = scmp.lt.u32.totalorder %s12402_s22, %s15114_s10 }
 0x526   : > { %p12404_p7 = pnand %p12403_p4, %p12517_p5 }
 0x527   : > { %p12409_p11 = por %p12408_p10, %p12407_p9 }
 0x528   : > { %p12405_p8 = pneg %p12404_p7 }
 0x529   : > { %p12411_p13 = por %p12410_p12, %p12409_p11 }
 0x52b   : > { %p12412_p0 = pnand %p12411_p13, %p12405_p8 }
 0x52d   : > { %12415 = shalt.err (!%p12412_p0)
}
 0x52e   : > { %12162 = dma.vmem_to_hbm [thread:$0]  (%p12517_p5), %s15116_s7, 16, %s15114_s10, %s9270_s11  }
 0x52f PF: > { %p12168_p1 = scmp.ge.s32.totalorder %s12450_s18, 2  ;;  %s9294_s5 = sand.u32 1, %s12438_s15  }
 0x530   : > { %s9295_s6 = scalar_lea.sflag [#allocation3], %s9294_s5 }
 0x531   : > { %p12165_p2 = pnand %p12168_p1, %p12521_p6 }
 0x533   : > { %12433 = dma.done.wait (!%p12165_p2), %s9295_s6, 16  }
 0x534   : > { %12435 = vsyncadd (!%p12165_p2), %s9295_s6, 4294967280  ;;  %p14_p3 = scmp.ge.s32.totalorder %s12504_s21, 4   ;;  %s15407_s15 = smov %s12442_s16 }
 0x535   : > { %s15408_s16 = smov %s12446_s17  ;;  %s15409_s17 = smov %s12515_s24 }
 0x536   : > { %s15410_s18 = smov %s12504_s21  ;;  %16 = sbr.rel (!%p14_p3) target bundleno = 3 (0x3), region = 95 }
 0x53d   :  { %9299 = vsyncpa [#allocation3], 1 }
 0x53e   :  { %9301 = vsyncpa [#allocation3 + $0x1], 1 }

</bundles_post_ra>
